<compile_context>
chip_gen: v6e
topology: v6e:2x2x1
jax: 0.10.0
libtpu: 0.0.40
codegen_flags: <defaults>
</compile_context>

<pallas_src>
import math
import numpy as np

import jax
import jax.numpy as jnp
from jax.experimental import pallas as pl
from jax.experimental.pallas import tpu as pltpu


def _make_kernel(*, TB, P, C, head, dh, T, nb):
    dtheta = math.pi / float(nb)
    M = TB * P

    def softmax_last(x):
        m = jnp.max(x, axis=-1, keepdims=True)
        e = jnp.exp(x - m)
        return e * pl.reciprocal(jnp.sum(e, axis=-1, keepdims=True), approx=True)

    def kernel(x_ref, lat_ref, wkv_ref, bkv_ref, wd_ref, bd_ref, ws_ref, wc_ref,
               out_ref):
        x = x_ref[...]                                             # (M, C) lane-dense

        # ---- fused channel projections (1x1 convs) on the MXU ----
        kv = jnp.dot(x, wkv_ref[...],
                     preferred_element_type=jnp.float32) + bkv_ref[...]   # (M, 2C)
        qd = jnp.dot(x, wd_ref[...],
                     preferred_element_type=jnp.float32) + bd_ref[...]    # (M, C)

        k3 = kv[:, :C].reshape(TB, P, C)                           # channel = h*dh + d
        v3 = kv[:, C:].reshape(TB, P, C)
        q3 = qd.reshape(TB, P, C)
        lat = lat_ref[...]                                         # (head, T, dh)

        # ---- latent encoder attention (small per-head work) ----
        t0_heads = []
        for h in range(head):
            lh = jnp.broadcast_to(lat[h][None], (TB, T, dh))       # (TB, T, dh)
            kh = k3[:, :, h * dh:(h + 1) * dh]                     # (TB, P, dh)
            vh = v3[:, :, h * dh:(h + 1) * dh]
            s1 = jnp.einsum('btd,bpd->btp', lh, kh,
                            preferred_element_type=jnp.float32)    # (TB, T, P)
            a1 = softmax_last(s1)
            t0_heads.append(
                jnp.einsum('btp,bpd->btd', a1, vh,
                           preferred_element_type=jnp.float32) + lh)
        t0 = jnp.concatenate(t0_heads, axis=-1)                    # (TB, T, C)

        # ---- spectral basis + learned mixing via angle-addition recurrence ----
        ws = ws_ref[...]                                           # (nb, C) sin weights
        wc = wc_ref[...]                                           # (nb, C) cos weights
        sd = jnp.sin(dtheta * t0)
        cd = jnp.cos(dtheta * t0)
        s_n = jnp.zeros_like(t0)                                   # sin(0 * theta)
        c_n = jnp.ones_like(t0)                                    # cos(0 * theta)
        acc = jnp.broadcast_to(wc[0:1][None], t0.shape)            # mode 0: sin=0, cos=1
        for n in range(1, nb):
            s_n, c_n = s_n * cd + c_n * sd, c_n * cd - s_n * sd
            acc = acc + s_n * ws[n:n + 1][None] + c_n * wc[n:n + 1][None]
        t1 = acc + t0                                              # (TB, T, C)

        # ---- latent decoder attention ----
        o_heads = []
        for h in range(head):
            qh = q3[:, :, h * dh:(h + 1) * dh]                     # (TB, P, dh)
            th = t1[:, :, h * dh:(h + 1) * dh]                     # (TB, T, dh)
            s2 = jnp.einsum('bpd,btd->bpt', qh, th,
                            preferred_element_type=jnp.float32)    # (TB, P, T)
            a2 = softmax_last(s2)
            o_heads.append(jnp.einsum('bpt,btd->bpd', a2, th,
                                      preferred_element_type=jnp.float32))
        o = jnp.concatenate(o_heads, axis=-1).reshape(M, C)        # channel = h*dh+d == c

        # residual comes straight from the input block (no extra xr DMA)
        out_ref[...] = o + x

    return kernel


def _pick_tile_b(Bp, P, target_rows=512):
    """Largest TB dividing Bp with (TB*P) % 8 == 0, grid >= 2, rows <= target."""
    best = None
    for t in range(1, Bp):                       # t < Bp  =>  grid >= 2
        if Bp % t or (t * P) % 8:
            continue
        if best is None or t * P <= target_rows:
            best = t
    return best if best is not None else Bp      # fall back to one full-array block


def neural_spectral_block_1d(x, params, *, patch_size, num_basis, num_token, head=8):
    B, C, H = x.shape
    P = patch_size
    dh = C // head
    nb = num_basis
    T = num_token
    G = H // P

    # ---- patchify (replicates torch view/permute/contiguous/view exactly) ----
    xp = x.reshape(B, C, G, P).transpose(0, 3, 1, 2).reshape(B * G, C, P)
    Bp = xp.shape[0]
    xflat = jnp.transpose(xp, (0, 2, 1)).reshape(Bp * P, C)        # rows (b', p), cols c

    # ---- parameter re-layout (glue, done once) ----
    enc_w, enc_b = params['enc_w'], params['enc_b']                # (2C, C), (2C,)
    dec_w, dec_b = params['dec_w'], params['dec_b']                # (C, C), (C,)
    latent = params['latent']                                      # (head, T, dh)
    weights = params['weights']                                    # (C, 2*nb)

    ew = enc_w.reshape(head, dh, 2, C)                             # [h, d, {K,V}, c_in]
    wk = ew[:, :, 0, :].reshape(C, C)                              # rows = h*dh+d
    wv = ew[:, :, 1, :].reshape(C, C)
    wkv = jnp.concatenate([wk.T, wv.T], axis=1)                    # (C_in, 2C)
    eb = enc_b.reshape(head, dh, 2)
    bkv = jnp.concatenate([eb[:, :, 0].reshape(C),
                           eb[:, :, 1].reshape(C)])[None, :]       # (1, 2C)
    wd = dec_w.T                                                   # (C_in, C_out)
    bd = dec_b[None, :]                                            # (1, C)
    ws = jnp.transpose(weights[:, :nb])                            # (nb, C) sin weights
    wcs = jnp.transpose(weights[:, nb:])                           # (nb, C) cos weights

    TB = _pick_tile_b(Bp, P)
    M = TB * P
    kernel = _make_kernel(TB=TB, P=P, C=C, head=head, dh=dh, T=T, nb=nb)

    def const_spec(shape):
        nd = len(shape)
        return pl.BlockSpec(shape, lambda i: (0,) * nd)

    out = pl.pallas_call(
        kernel,
        out_shape=jax.ShapeDtypeStruct((Bp * P, C), jnp.float32),
        grid=(Bp // TB,),
        in_specs=[
            pl.BlockSpec((M, C), lambda i: (i, 0)),                # x (lane-dense rows)
            const_spec((head, T, dh)),                             # latent
            const_spec((C, 2 * C)),                                # fused K/V weights
            const_spec((1, 2 * C)),                                # fused K/V bias
            const_spec((C, C)),                                    # decoder weights
            const_spec((1, C)),                                    # decoder bias
            const_spec((nb, C)),                                   # sin mixing weights
            const_spec((nb, C)),                                   # cos mixing weights
        ],
        out_specs=pl.BlockSpec((M, C), lambda i: (i, 0)),
        compiler_params=pltpu.CompilerParams(dimension_semantics=("parallel",)),
    )(xflat, latent, wkv, bkv, wd, bd, ws, wcs)

    # ---- un-patchify ----
    xo = jnp.transpose(out.reshape(Bp, P, C), (0, 2, 1))           # (Bp, C, P)
    y = xo.reshape(B, G, C, P).transpose(0, 2, 1, 3).reshape(B, C, H)
    return y


def reference(x, params, *, patch_size, num_basis, num_token, head=8):
    """Pure-JAX line-by-line port of the PyTorch forward (for validation)."""
    B, C, H = x.shape
    P = patch_size
    dh = C // head
    nb = num_basis
    T = num_token

    xp = x.reshape(B, C, H // P, P).transpose(0, 3, 1, 2).reshape(B * (H // P), C, P)
    Bp = xp.shape[0]

    def self_attn(q, k, v):
        attn = jax.nn.softmax(jnp.einsum('bhlc,bhsc->bhls', q, k), axis=-1)
        return jnp.einsum('bhls,bhsc->bhlc', attn, v)

    # latent encoder attention
    y = jnp.einsum('oc,bcp->bop', params['enc_w'], xp) + params['enc_b'][None, :, None]
    x_tmp = jnp.transpose(y, (0, 2, 1)).reshape(Bp, P, head, dh, 2).transpose(4, 0, 2, 1, 3)
    q = jnp.broadcast_to(params['latent'][None], (Bp, head, T, dh))
    lt = self_attn(q, x_tmp[0], x_tmp[1]) + q
    lt = jnp.transpose(lt, (0, 1, 3, 2)).reshape(Bp, C, T)

    # spectral basis + mixing
    modes = jnp.arange(nb, dtype=jnp.float32) / nb
    arg = modes[None, None, None, :] * lt[:, :, :, None] * math.pi
    basis = jnp.concatenate([jnp.sin(arg), jnp.cos(arg)], axis=-1)
    lt = jnp.einsum('bilm,im->bil', basis, params['weights']) + lt

    # latent decoder attention
    lt2 = lt.reshape(Bp, head, dh, T).transpose(0, 1, 3, 2)
    d = jnp.einsum('oc,bcp->bop', params['dec_w'], xp) + params['dec_b'][None, :, None]
    q2 = jnp.transpose(d, (0, 2, 1)).reshape(Bp, P, head, dh).transpose(0, 2, 1, 3)
    o = self_attn(q2, lt2, lt2)
    xo = jnp.transpose(o, (0, 1, 3, 2)).reshape(Bp, C, P) + xp

    return xo.reshape(B, H // P, C, P).transpose(0, 2, 1, 3).reshape(B, C, H)


if __name__ == "__main__":
    width = 32          # C (must be divisible by head=8)
    num_basis = 8
    num_token = 4
    patch = 4           # patch_size=[4]
    head = 8
    B, H = 2, 16        # H divisible by patch

    key = jax.random.PRNGKey(0)
    ks = jax.random.split(key, 8)
    bound = 1.0 / math.sqrt(width)
    params = dict(
        weights=(1.0 / width) * jax.random.uniform(ks[0], (width, 2 * num_basis), jnp.float32),
        latent=(1.0 / width) * jax.random.uniform(ks[1], (head, num_token, width // head), jnp.float32),
        enc_w=jax.random.uniform(ks[2], (2 * width, width), jnp.float32, minval=-bound, maxval=bound),
        enc_b=jax.random.uniform(ks[3], (2 * width,), jnp.float32, minval=-bound, maxval=bound),
        dec_w=jax.random.uniform(ks[4], (width, width), jnp.float32, minval=-bound, maxval=bound),
        dec_b=jax.random.uniform(ks[5], (width,), jnp.float32, minval=-bound, maxval=bound),
    )
    x = jax.random.normal(ks[6], (B, width, H), jnp.float32)

    out = neural_spectral_block_1d(x, params, patch_size=patch, num_basis=num_basis,
                                   num_token=num_token, head=head)
    out = jax.block_until_ready(out)

    ref = jax.block_until_ready(
        reference(x, params, patch_size=patch, num_basis=num_basis,
                  num_token=num_token, head=head))
    np.testing.assert_allclose(np.asarray(out), np.asarray(ref), rtol=3e-2, atol=3e-2)

    print("KERNEL_OK")
</pallas_src>

<mosaic_0001>
module attributes {stable_mosaic.version = 11 : i64} {
  func.func @kernel(%arg0: i32, %arg1: memref<16x32xf32, #tpu.memory_space<vmem>>, %arg2: memref<8x4x4xf32, #tpu.memory_space<vmem>>, %arg3: memref<32x64xf32, #tpu.memory_space<vmem>>, %arg4: memref<1x64xf32, #tpu.memory_space<vmem>>, %arg5: memref<32x32xf32, #tpu.memory_space<vmem>>, %arg6: memref<1x32xf32, #tpu.memory_space<vmem>>, %arg7: memref<8x32xf32, #tpu.memory_space<vmem>>, %arg8: memref<8x32xf32, #tpu.memory_space<vmem>>, %arg9: memref<16x32xf32, #tpu.memory_space<vmem>>) attributes {dimension_semantics = [#tpu.dimension_semantics<parallel>], iteration_bounds = array<i64: 2>, scalar_prefetch = 0 : i64, scratch_operands = 0 : i64, tpu.core_type = #tpu.core_type<tc>, window_params = [{transform_indices = @transform_0, window_bounds = array<i64: 16, 32>}, {pipeline_mode = #tpu.pipeline_mode<synchronous>, transform_indices = @transform_1, window_bounds = array<i64: 8, 4, 4>}, {pipeline_mode = #tpu.pipeline_mode<synchronous>, transform_indices = @transform_2, window_bounds = array<i64: 32, 64>}, {pipeline_mode = #tpu.pipeline_mode<synchronous>, transform_indices = @transform_3, window_bounds = array<i64: 1, 64>}, {pipeline_mode = #tpu.pipeline_mode<synchronous>, transform_indices = @transform_4, window_bounds = array<i64: 32, 32>}, {pipeline_mode = #tpu.pipeline_mode<synchronous>, transform_indices = @transform_5, window_bounds = array<i64: 1, 32>}, {pipeline_mode = #tpu.pipeline_mode<synchronous>, transform_indices = @transform_6, window_bounds = array<i64: 8, 32>}, {pipeline_mode = #tpu.pipeline_mode<synchronous>, transform_indices = @transform_7, window_bounds = array<i64: 8, 32>}, {transform_indices = @transform_8, window_bounds = array<i64: 16, 32>}]} {
    %c0 = arith.constant 0 : index
    %c0_0 = arith.constant 0 : index
    %0 = vector.load %arg1[%c0, %c0_0] : memref<16x32xf32, #tpu.memory_space<vmem>>, vector<16x32xf32>
    %c0_1 = arith.constant 0 : index
    %c0_2 = arith.constant 0 : index
    %1 = vector.load %arg3[%c0_1, %c0_2] : memref<32x64xf32, #tpu.memory_space<vmem>>, vector<32x64xf32>
    %cst = arith.constant dense<0.000000e+00> : vector<16x64xf32>
    %2 = tpu.matmul %0, %1, %cst {dimension_numbers = #tpu.dot_dimension_numbers<[1], [0], [0], [1], [0, 0, 1, 1], [], []>} : vector<16x32xf32>, vector<32x64xf32>, vector<16x64xf32> -> vector<16x64xf32>
    %c0_3 = arith.constant 0 : index
    %c0_4 = arith.constant 0 : index
    %3 = vector.load %arg4[%c0_3, %c0_4] : memref<1x64xf32, #tpu.memory_space<vmem>>, vector<1x64xf32>
    %4 = vector.broadcast %3 : vector<1x64xf32> to vector<16x64xf32>
    %5 = arith.addf %2, %4 : vector<16x64xf32>
    %c0_5 = arith.constant 0 : index
    %c0_6 = arith.constant 0 : index
    %6 = vector.load %arg5[%c0_5, %c0_6] : memref<32x32xf32, #tpu.memory_space<vmem>>, vector<32x32xf32>
    %cst_7 = arith.constant dense<0.000000e+00> : vector<16x32xf32>
    %7 = tpu.matmul %0, %6, %cst_7 {dimension_numbers = #tpu.dot_dimension_numbers<[1], [0], [0], [1], [0, 0, 1, 1], [], []>} : vector<16x32xf32>, vector<32x32xf32>, vector<16x32xf32> -> vector<16x32xf32>
    %c0_8 = arith.constant 0 : index
    %c0_9 = arith.constant 0 : index
    %8 = vector.load %arg6[%c0_8, %c0_9] : memref<1x32xf32, #tpu.memory_space<vmem>>, vector<1x32xf32>
    %9 = vector.broadcast %8 : vector<1x32xf32> to vector<16x32xf32>
    %10 = arith.addf %7, %9 : vector<16x32xf32>
    %11 = vector.extract_strided_slice %5 {offsets = [0, 0], sizes = [16, 32], strides = [1, 1]} : vector<16x64xf32> to vector<16x32xf32>
    %12 = vector.shape_cast %11 : vector<16x32xf32> to vector<4x4x32xf32>
    %13 = vector.extract_strided_slice %5 {offsets = [0, 32], sizes = [16, 32], strides = [1, 1]} : vector<16x64xf32> to vector<16x32xf32>
    %14 = vector.shape_cast %13 : vector<16x32xf32> to vector<4x4x32xf32>
    %15 = vector.shape_cast %10 : vector<16x32xf32> to vector<4x4x32xf32>
    %c0_10 = arith.constant 0 : index
    %c0_11 = arith.constant 0 : index
    %c0_12 = arith.constant 0 : index
    %16 = vector.load %arg2[%c0_10, %c0_11, %c0_12] : memref<8x4x4xf32, #tpu.memory_space<vmem>>, vector<8x4x4xf32>
    %17 = vector.extract_strided_slice %16 {offsets = [0, 0, 0], sizes = [1, 4, 4], strides = [1, 1, 1]} : vector<8x4x4xf32> to vector<1x4x4xf32>
    %18 = vector.shape_cast %17 : vector<1x4x4xf32> to vector<4x4xf32>
    %19 = vector.shape_cast %18 : vector<4x4xf32> to vector<1x4x4xf32>
    %20 = vector.shape_cast %19 : vector<1x4x4xf32> to vector<1x4x4xf32>
    %21 = vector.broadcast %20 : vector<1x4x4xf32> to vector<4x4x4xf32>
    %22 = vector.extract_strided_slice %12 {offsets = [0, 0, 0], sizes = [4, 4, 4], strides = [1, 1, 1]} : vector<4x4x32xf32> to vector<4x4x4xf32>
    %23 = vector.extract_strided_slice %14 {offsets = [0, 0, 0], sizes = [4, 4, 4], strides = [1, 1, 1]} : vector<4x4x32xf32> to vector<4x4x4xf32>
    "tpu.trace_start"() <{level = 10 : i32, message = "btd,bpd->btp"}> : () -> ()
    %cst_13 = arith.constant dense<0.000000e+00> : vector<4x4x4xf32>
    %24 = tpu.matmul %21, %22, %cst_13 {dimension_numbers = #tpu.dot_dimension_numbers<[2], [2], [1], [1], [0, 0, 0, 1, 1, 1], [0], [0]>} : vector<4x4x4xf32>, vector<4x4x4xf32>, vector<4x4x4xf32> -> vector<4x4x4xf32>
    "tpu.trace_stop"() : () -> ()
    %cst_14 = arith.constant dense<0xFF800000> : vector<4x4xf32>
    %25 = vector.multi_reduction <maximumf>, %24, %cst_14 [2] : vector<4x4x4xf32> to vector<4x4xf32>
    %26 = vector.shape_cast %25 : vector<4x4xf32> to vector<4x4x1xf32>
    %27 = vector.broadcast %26 : vector<4x4x1xf32> to vector<4x4x4xf32>
    %28 = arith.subf %24, %27 : vector<4x4x4xf32>
    %29 = math.exp %28 : vector<4x4x4xf32>
    %cst_15 = arith.constant dense<0.000000e+00> : vector<4x4xf32>
    %30 = vector.multi_reduction <add>, %29, %cst_15 [2] : vector<4x4x4xf32> to vector<4x4xf32>
    %31 = vector.shape_cast %30 : vector<4x4xf32> to vector<4x4x1xf32>
    %32 = tpu.reciprocal %31 {approx = true} : vector<4x4x1xf32> -> vector<4x4x1xf32>
    %33 = vector.broadcast %32 : vector<4x4x1xf32> to vector<4x4x4xf32>
    %34 = arith.mulf %29, %33 : vector<4x4x4xf32>
    "tpu.trace_start"() <{level = 10 : i32, message = "btp,bpd->btd"}> : () -> ()
    %cst_16 = arith.constant dense<0.000000e+00> : vector<4x4x4xf32>
    %35 = tpu.matmul %34, %23, %cst_16 {dimension_numbers = #tpu.dot_dimension_numbers<[2], [1], [1], [2], [0, 0, 0, 1, 1, 2], [0], [0]>} : vector<4x4x4xf32>, vector<4x4x4xf32>, vector<4x4x4xf32> -> vector<4x4x4xf32>
    "tpu.trace_stop"() : () -> ()
    %36 = arith.addf %35, %21 : vector<4x4x4xf32>
    %37 = vector.extract_strided_slice %16 {offsets = [1, 0, 0], sizes = [1, 4, 4], strides = [1, 1, 1]} : vector<8x4x4xf32> to vector<1x4x4xf32>
    %38 = vector.shape_cast %37 : vector<1x4x4xf32> to vector<4x4xf32>
    %39 = vector.shape_cast %38 : vector<4x4xf32> to vector<1x4x4xf32>
    %40 = vector.shape_cast %39 : vector<1x4x4xf32> to vector<1x4x4xf32>
    %41 = vector.broadcast %40 : vector<1x4x4xf32> to vector<4x4x4xf32>
    %42 = vector.extract_strided_slice %12 {offsets = [0, 0, 4], sizes = [4, 4, 4], strides = [1, 1, 1]} : vector<4x4x32xf32> to vector<4x4x4xf32>
    %43 = vector.extract_strided_slice %14 {offsets = [0, 0, 4], sizes = [4, 4, 4], strides = [1, 1, 1]} : vector<4x4x32xf32> to vector<4x4x4xf32>
    "tpu.trace_start"() <{level = 10 : i32, message = "btd,bpd->btp"}> : () -> ()
    %cst_17 = arith.constant dense<0.000000e+00> : vector<4x4x4xf32>
    %44 = tpu.matmul %41, %42, %cst_17 {dimension_numbers = #tpu.dot_dimension_numbers<[2], [2], [1], [1], [0, 0, 0, 1, 1, 1], [0], [0]>} : vector<4x4x4xf32>, vector<4x4x4xf32>, vector<4x4x4xf32> -> vector<4x4x4xf32>
    "tpu.trace_stop"() : () -> ()
    %cst_18 = arith.constant dense<0xFF800000> : vector<4x4xf32>
    %45 = vector.multi_reduction <maximumf>, %44, %cst_18 [2] : vector<4x4x4xf32> to vector<4x4xf32>
    %46 = vector.shape_cast %45 : vector<4x4xf32> to vector<4x4x1xf32>
    %47 = vector.broadcast %46 : vector<4x4x1xf32> to vector<4x4x4xf32>
    %48 = arith.subf %44, %47 : vector<4x4x4xf32>
    %49 = math.exp %48 : vector<4x4x4xf32>
    %cst_19 = arith.constant dense<0.000000e+00> : vector<4x4xf32>
    %50 = vector.multi_reduction <add>, %49, %cst_19 [2] : vector<4x4x4xf32> to vector<4x4xf32>
    %51 = vector.shape_cast %50 : vector<4x4xf32> to vector<4x4x1xf32>
    %52 = tpu.reciprocal %51 {approx = true} : vector<4x4x1xf32> -> vector<4x4x1xf32>
    %53 = vector.broadcast %52 : vector<4x4x1xf32> to vector<4x4x4xf32>
    %54 = arith.mulf %49, %53 : vector<4x4x4xf32>
    "tpu.trace_start"() <{level = 10 : i32, message = "btp,bpd->btd"}> : () -> ()
    %cst_20 = arith.constant dense<0.000000e+00> : vector<4x4x4xf32>
    %55 = tpu.matmul %54, %43, %cst_20 {dimension_numbers = #tpu.dot_dimension_numbers<[2], [1], [1], [2], [0, 0, 0, 1, 1, 2], [0], [0]>} : vector<4x4x4xf32>, vector<4x4x4xf32>, vector<4x4x4xf32> -> vector<4x4x4xf32>
    "tpu.trace_stop"() : () -> ()
    %56 = arith.addf %55, %41 : vector<4x4x4xf32>
    %57 = vector.extract_strided_slice %16 {offsets = [2, 0, 0], sizes = [1, 4, 4], strides = [1, 1, 1]} : vector<8x4x4xf32> to vector<1x4x4xf32>
    %58 = vector.shape_cast %57 : vector<1x4x4xf32> to vector<4x4xf32>
    %59 = vector.shape_cast %58 : vector<4x4xf32> to vector<1x4x4xf32>
    %60 = vector.shape_cast %59 : vector<1x4x4xf32> to vector<1x4x4xf32>
    %61 = vector.broadcast %60 : vector<1x4x4xf32> to vector<4x4x4xf32>
    %62 = vector.extract_strided_slice %12 {offsets = [0, 0, 8], sizes = [4, 4, 4], strides = [1, 1, 1]} : vector<4x4x32xf32> to vector<4x4x4xf32>
    %63 = vector.extract_strided_slice %14 {offsets = [0, 0, 8], sizes = [4, 4, 4], strides = [1, 1, 1]} : vector<4x4x32xf32> to vector<4x4x4xf32>
    "tpu.trace_start"() <{level = 10 : i32, message = "btd,bpd->btp"}> : () -> ()
    %cst_21 = arith.constant dense<0.000000e+00> : vector<4x4x4xf32>
    %64 = tpu.matmul %61, %62, %cst_21 {dimension_numbers = #tpu.dot_dimension_numbers<[2], [2], [1], [1], [0, 0, 0, 1, 1, 1], [0], [0]>} : vector<4x4x4xf32>, vector<4x4x4xf32>, vector<4x4x4xf32> -> vector<4x4x4xf32>
    "tpu.trace_stop"() : () -> ()
    %cst_22 = arith.constant dense<0xFF800000> : vector<4x4xf32>
    %65 = vector.multi_reduction <maximumf>, %64, %cst_22 [2] : vector<4x4x4xf32> to vector<4x4xf32>
    %66 = vector.shape_cast %65 : vector<4x4xf32> to vector<4x4x1xf32>
    %67 = vector.broadcast %66 : vector<4x4x1xf32> to vector<4x4x4xf32>
    %68 = arith.subf %64, %67 : vector<4x4x4xf32>
    %69 = math.exp %68 : vector<4x4x4xf32>
    %cst_23 = arith.constant dense<0.000000e+00> : vector<4x4xf32>
    %70 = vector.multi_reduction <add>, %69, %cst_23 [2] : vector<4x4x4xf32> to vector<4x4xf32>
    %71 = vector.shape_cast %70 : vector<4x4xf32> to vector<4x4x1xf32>
    %72 = tpu.reciprocal %71 {approx = true} : vector<4x4x1xf32> -> vector<4x4x1xf32>
    %73 = vector.broadcast %72 : vector<4x4x1xf32> to vector<4x4x4xf32>
    %74 = arith.mulf %69, %73 : vector<4x4x4xf32>
    "tpu.trace_start"() <{level = 10 : i32, message = "btp,bpd->btd"}> : () -> ()
    %cst_24 = arith.constant dense<0.000000e+00> : vector<4x4x4xf32>
    %75 = tpu.matmul %74, %63, %cst_24 {dimension_numbers = #tpu.dot_dimension_numbers<[2], [1], [1], [2], [0, 0, 0, 1, 1, 2], [0], [0]>} : vector<4x4x4xf32>, vector<4x4x4xf32>, vector<4x4x4xf32> -> vector<4x4x4xf32>
    "tpu.trace_stop"() : () -> ()
    %76 = arith.addf %75, %61 : vector<4x4x4xf32>
    %77 = vector.extract_strided_slice %16 {offsets = [3, 0, 0], sizes = [1, 4, 4], strides = [1, 1, 1]} : vector<8x4x4xf32> to vector<1x4x4xf32>
    %78 = vector.shape_cast %77 : vector<1x4x4xf32> to vector<4x4xf32>
    %79 = vector.shape_cast %78 : vector<4x4xf32> to vector<1x4x4xf32>
    %80 = vector.shape_cast %79 : vector<1x4x4xf32> to vector<1x4x4xf32>
    %81 = vector.broadcast %80 : vector<1x4x4xf32> to vector<4x4x4xf32>
    %82 = vector.extract_strided_slice %12 {offsets = [0, 0, 12], sizes = [4, 4, 4], strides = [1, 1, 1]} : vector<4x4x32xf32> to vector<4x4x4xf32>
    %83 = vector.extract_strided_slice %14 {offsets = [0, 0, 12], sizes = [4, 4, 4], strides = [1, 1, 1]} : vector<4x4x32xf32> to vector<4x4x4xf32>
    "tpu.trace_start"() <{level = 10 : i32, message = "btd,bpd->btp"}> : () -> ()
    %cst_25 = arith.constant dense<0.000000e+00> : vector<4x4x4xf32>
    %84 = tpu.matmul %81, %82, %cst_25 {dimension_numbers = #tpu.dot_dimension_numbers<[2], [2], [1], [1], [0, 0, 0, 1, 1, 1], [0], [0]>} : vector<4x4x4xf32>, vector<4x4x4xf32>, vector<4x4x4xf32> -> vector<4x4x4xf32>
    "tpu.trace_stop"() : () -> ()
    %cst_26 = arith.constant dense<0xFF800000> : vector<4x4xf32>
    %85 = vector.multi_reduction <maximumf>, %84, %cst_26 [2] : vector<4x4x4xf32> to vector<4x4xf32>
    %86 = vector.shape_cast %85 : vector<4x4xf32> to vector<4x4x1xf32>
    %87 = vector.broadcast %86 : vector<4x4x1xf32> to vector<4x4x4xf32>
    %88 = arith.subf %84, %87 : vector<4x4x4xf32>
    %89 = math.exp %88 : vector<4x4x4xf32>
    %cst_27 = arith.constant dense<0.000000e+00> : vector<4x4xf32>
    %90 = vector.multi_reduction <add>, %89, %cst_27 [2] : vector<4x4x4xf32> to vector<4x4xf32>
    %91 = vector.shape_cast %90 : vector<4x4xf32> to vector<4x4x1xf32>
    %92 = tpu.reciprocal %91 {approx = true} : vector<4x4x1xf32> -> vector<4x4x1xf32>
    %93 = vector.broadcast %92 : vector<4x4x1xf32> to vector<4x4x4xf32>
    %94 = arith.mulf %89, %93 : vector<4x4x4xf32>
    "tpu.trace_start"() <{level = 10 : i32, message = "btp,bpd->btd"}> : () -> ()
    %cst_28 = arith.constant dense<0.000000e+00> : vector<4x4x4xf32>
    %95 = tpu.matmul %94, %83, %cst_28 {dimension_numbers = #tpu.dot_dimension_numbers<[2], [1], [1], [2], [0, 0, 0, 1, 1, 2], [0], [0]>} : vector<4x4x4xf32>, vector<4x4x4xf32>, vector<4x4x4xf32> -> vector<4x4x4xf32>
    "tpu.trace_stop"() : () -> ()
    %96 = arith.addf %95, %81 : vector<4x4x4xf32>
    %97 = vector.extract_strided_slice %16 {offsets = [4, 0, 0], sizes = [1, 4, 4], strides = [1, 1, 1]} : vector<8x4x4xf32> to vector<1x4x4xf32>
    %98 = vector.shape_cast %97 : vector<1x4x4xf32> to vector<4x4xf32>
    %99 = vector.shape_cast %98 : vector<4x4xf32> to vector<1x4x4xf32>
    %100 = vector.shape_cast %99 : vector<1x4x4xf32> to vector<1x4x4xf32>
    %101 = vector.broadcast %100 : vector<1x4x4xf32> to vector<4x4x4xf32>
    %102 = vector.extract_strided_slice %12 {offsets = [0, 0, 16], sizes = [4, 4, 4], strides = [1, 1, 1]} : vector<4x4x32xf32> to vector<4x4x4xf32>
    %103 = vector.extract_strided_slice %14 {offsets = [0, 0, 16], sizes = [4, 4, 4], strides = [1, 1, 1]} : vector<4x4x32xf32> to vector<4x4x4xf32>
    "tpu.trace_start"() <{level = 10 : i32, message = "btd,bpd->btp"}> : () -> ()
    %cst_29 = arith.constant dense<0.000000e+00> : vector<4x4x4xf32>
    %104 = tpu.matmul %101, %102, %cst_29 {dimension_numbers = #tpu.dot_dimension_numbers<[2], [2], [1], [1], [0, 0, 0, 1, 1, 1], [0], [0]>} : vector<4x4x4xf32>, vector<4x4x4xf32>, vector<4x4x4xf32> -> vector<4x4x4xf32>
    "tpu.trace_stop"() : () -> ()
    %cst_30 = arith.constant dense<0xFF800000> : vector<4x4xf32>
    %105 = vector.multi_reduction <maximumf>, %104, %cst_30 [2] : vector<4x4x4xf32> to vector<4x4xf32>
    %106 = vector.shape_cast %105 : vector<4x4xf32> to vector<4x4x1xf32>
    %107 = vector.broadcast %106 : vector<4x4x1xf32> to vector<4x4x4xf32>
    %108 = arith.subf %104, %107 : vector<4x4x4xf32>
    %109 = math.exp %108 : vector<4x4x4xf32>
    %cst_31 = arith.constant dense<0.000000e+00> : vector<4x4xf32>
    %110 = vector.multi_reduction <add>, %109, %cst_31 [2] : vector<4x4x4xf32> to vector<4x4xf32>
    %111 = vector.shape_cast %110 : vector<4x4xf32> to vector<4x4x1xf32>
    %112 = tpu.reciprocal %111 {approx = true} : vector<4x4x1xf32> -> vector<4x4x1xf32>
    %113 = vector.broadcast %112 : vector<4x4x1xf32> to vector<4x4x4xf32>
    %114 = arith.mulf %109, %113 : vector<4x4x4xf32>
    "tpu.trace_start"() <{level = 10 : i32, message = "btp,bpd->btd"}> : () -> ()
    %cst_32 = arith.constant dense<0.000000e+00> : vector<4x4x4xf32>
    %115 = tpu.matmul %114, %103, %cst_32 {dimension_numbers = #tpu.dot_dimension_numbers<[2], [1], [1], [2], [0, 0, 0, 1, 1, 2], [0], [0]>} : vector<4x4x4xf32>, vector<4x4x4xf32>, vector<4x4x4xf32> -> vector<4x4x4xf32>
    "tpu.trace_stop"() : () -> ()
    %116 = arith.addf %115, %101 : vector<4x4x4xf32>
    %117 = vector.extract_strided_slice %16 {offsets = [5, 0, 0], sizes = [1, 4, 4], strides = [1, 1, 1]} : vector<8x4x4xf32> to vector<1x4x4xf32>
    %118 = vector.shape_cast %117 : vector<1x4x4xf32> to vector<4x4xf32>
    %119 = vector.shape_cast %118 : vector<4x4xf32> to vector<1x4x4xf32>
    %120 = vector.shape_cast %119 : vector<1x4x4xf32> to vector<1x4x4xf32>
    %121 = vector.broadcast %120 : vector<1x4x4xf32> to vector<4x4x4xf32>
    %122 = vector.extract_strided_slice %12 {offsets = [0, 0, 20], sizes = [4, 4, 4], strides = [1, 1, 1]} : vector<4x4x32xf32> to vector<4x4x4xf32>
    %123 = vector.extract_strided_slice %14 {offsets = [0, 0, 20], sizes = [4, 4, 4], strides = [1, 1, 1]} : vector<4x4x32xf32> to vector<4x4x4xf32>
    "tpu.trace_start"() <{level = 10 : i32, message = "btd,bpd->btp"}> : () -> ()
    %cst_33 = arith.constant dense<0.000000e+00> : vector<4x4x4xf32>
    %124 = tpu.matmul %121, %122, %cst_33 {dimension_numbers = #tpu.dot_dimension_numbers<[2], [2], [1], [1], [0, 0, 0, 1, 1, 1], [0], [0]>} : vector<4x4x4xf32>, vector<4x4x4xf32>, vector<4x4x4xf32> -> vector<4x4x4xf32>
    "tpu.trace_stop"() : () -> ()
    %cst_34 = arith.constant dense<0xFF800000> : vector<4x4xf32>
    %125 = vector.multi_reduction <maximumf>, %124, %cst_34 [2] : vector<4x4x4xf32> to vector<4x4xf32>
    %126 = vector.shape_cast %125 : vector<4x4xf32> to vector<4x4x1xf32>
    %127 = vector.broadcast %126 : vector<4x4x1xf32> to vector<4x4x4xf32>
    %128 = arith.subf %124, %127 : vector<4x4x4xf32>
    %129 = math.exp %128 : vector<4x4x4xf32>
    %cst_35 = arith.constant dense<0.000000e+00> : vector<4x4xf32>
    %130 = vector.multi_reduction <add>, %129, %cst_35 [2] : vector<4x4x4xf32> to vector<4x4xf32>
    %131 = vector.shape_cast %130 : vector<4x4xf32> to vector<4x4x1xf32>
    %132 = tpu.reciprocal %131 {approx = true} : vector<4x4x1xf32> -> vector<4x4x1xf32>
    %133 = vector.broadcast %132 : vector<4x4x1xf32> to vector<4x4x4xf32>
    %134 = arith.mulf %129, %133 : vector<4x4x4xf32>
    "tpu.trace_start"() <{level = 10 : i32, message = "btp,bpd->btd"}> : () -> ()
    %cst_36 = arith.constant dense<0.000000e+00> : vector<4x4x4xf32>
    %135 = tpu.matmul %134, %123, %cst_36 {dimension_numbers = #tpu.dot_dimension_numbers<[2], [1], [1], [2], [0, 0, 0, 1, 1, 2], [0], [0]>} : vector<4x4x4xf32>, vector<4x4x4xf32>, vector<4x4x4xf32> -> vector<4x4x4xf32>
    "tpu.trace_stop"() : () -> ()
    %136 = arith.addf %135, %121 : vector<4x4x4xf32>
    %137 = vector.extract_strided_slice %16 {offsets = [6, 0, 0], sizes = [1, 4, 4], strides = [1, 1, 1]} : vector<8x4x4xf32> to vector<1x4x4xf32>
    %138 = vector.shape_cast %137 : vector<1x4x4xf32> to vector<4x4xf32>
    %139 = vector.shape_cast %138 : vector<4x4xf32> to vector<1x4x4xf32>
    %140 = vector.shape_cast %139 : vector<1x4x4xf32> to vector<1x4x4xf32>
    %141 = vector.broadcast %140 : vector<1x4x4xf32> to vector<4x4x4xf32>
    %142 = vector.extract_strided_slice %12 {offsets = [0, 0, 24], sizes = [4, 4, 4], strides = [1, 1, 1]} : vector<4x4x32xf32> to vector<4x4x4xf32>
    %143 = vector.extract_strided_slice %14 {offsets = [0, 0, 24], sizes = [4, 4, 4], strides = [1, 1, 1]} : vector<4x4x32xf32> to vector<4x4x4xf32>
    "tpu.trace_start"() <{level = 10 : i32, message = "btd,bpd->btp"}> : () -> ()
    %cst_37 = arith.constant dense<0.000000e+00> : vector<4x4x4xf32>
    %144 = tpu.matmul %141, %142, %cst_37 {dimension_numbers = #tpu.dot_dimension_numbers<[2], [2], [1], [1], [0, 0, 0, 1, 1, 1], [0], [0]>} : vector<4x4x4xf32>, vector<4x4x4xf32>, vector<4x4x4xf32> -> vector<4x4x4xf32>
    "tpu.trace_stop"() : () -> ()
    %cst_38 = arith.constant dense<0xFF800000> : vector<4x4xf32>
    %145 = vector.multi_reduction <maximumf>, %144, %cst_38 [2] : vector<4x4x4xf32> to vector<4x4xf32>
    %146 = vector.shape_cast %145 : vector<4x4xf32> to vector<4x4x1xf32>
    %147 = vector.broadcast %146 : vector<4x4x1xf32> to vector<4x4x4xf32>
    %148 = arith.subf %144, %147 : vector<4x4x4xf32>
    %149 = math.exp %148 : vector<4x4x4xf32>
    %cst_39 = arith.constant dense<0.000000e+00> : vector<4x4xf32>
    %150 = vector.multi_reduction <add>, %149, %cst_39 [2] : vector<4x4x4xf32> to vector<4x4xf32>
    %151 = vector.shape_cast %150 : vector<4x4xf32> to vector<4x4x1xf32>
    %152 = tpu.reciprocal %151 {approx = true} : vector<4x4x1xf32> -> vector<4x4x1xf32>
    %153 = vector.broadcast %152 : vector<4x4x1xf32> to vector<4x4x4xf32>
    %154 = arith.mulf %149, %153 : vector<4x4x4xf32>
    "tpu.trace_start"() <{level = 10 : i32, message = "btp,bpd->btd"}> : () -> ()
    %cst_40 = arith.constant dense<0.000000e+00> : vector<4x4x4xf32>
    %155 = tpu.matmul %154, %143, %cst_40 {dimension_numbers = #tpu.dot_dimension_numbers<[2], [1], [1], [2], [0, 0, 0, 1, 1, 2], [0], [0]>} : vector<4x4x4xf32>, vector<4x4x4xf32>, vector<4x4x4xf32> -> vector<4x4x4xf32>
    "tpu.trace_stop"() : () -> ()
    %156 = arith.addf %155, %141 : vector<4x4x4xf32>
    %157 = vector.extract_strided_slice %16 {offsets = [7, 0, 0], sizes = [1, 4, 4], strides = [1, 1, 1]} : vector<8x4x4xf32> to vector<1x4x4xf32>
    %158 = vector.shape_cast %157 : vector<1x4x4xf32> to vector<4x4xf32>
    %159 = vector.shape_cast %158 : vector<4x4xf32> to vector<1x4x4xf32>
    %160 = vector.shape_cast %159 : vector<1x4x4xf32> to vector<1x4x4xf32>
    %161 = vector.broadcast %160 : vector<1x4x4xf32> to vector<4x4x4xf32>
    %162 = vector.extract_strided_slice %12 {offsets = [0, 0, 28], sizes = [4, 4, 4], strides = [1, 1, 1]} : vector<4x4x32xf32> to vector<4x4x4xf32>
    %163 = vector.extract_strided_slice %14 {offsets = [0, 0, 28], sizes = [4, 4, 4], strides = [1, 1, 1]} : vector<4x4x32xf32> to vector<4x4x4xf32>
    "tpu.trace_start"() <{level = 10 : i32, message = "btd,bpd->btp"}> : () -> ()
    %cst_41 = arith.constant dense<0.000000e+00> : vector<4x4x4xf32>
    %164 = tpu.matmul %161, %162, %cst_41 {dimension_numbers = #tpu.dot_dimension_numbers<[2], [2], [1], [1], [0, 0, 0, 1, 1, 1], [0], [0]>} : vector<4x4x4xf32>, vector<4x4x4xf32>, vector<4x4x4xf32> -> vector<4x4x4xf32>
    "tpu.trace_stop"() : () -> ()
    %cst_42 = arith.constant dense<0xFF800000> : vector<4x4xf32>
    %165 = vector.multi_reduction <maximumf>, %164, %cst_42 [2] : vector<4x4x4xf32> to vector<4x4xf32>
    %166 = vector.shape_cast %165 : vector<4x4xf32> to vector<4x4x1xf32>
    %167 = vector.broadcast %166 : vector<4x4x1xf32> to vector<4x4x4xf32>
    %168 = arith.subf %164, %167 : vector<4x4x4xf32>
    %169 = math.exp %168 : vector<4x4x4xf32>
    %cst_43 = arith.constant dense<0.000000e+00> : vector<4x4xf32>
    %170 = vector.multi_reduction <add>, %169, %cst_43 [2] : vector<4x4x4xf32> to vector<4x4xf32>
    %171 = vector.shape_cast %170 : vector<4x4xf32> to vector<4x4x1xf32>
    %172 = tpu.reciprocal %171 {approx = true} : vector<4x4x1xf32> -> vector<4x4x1xf32>
    %173 = vector.broadcast %172 : vector<4x4x1xf32> to vector<4x4x4xf32>
    %174 = arith.mulf %169, %173 : vector<4x4x4xf32>
    "tpu.trace_start"() <{level = 10 : i32, message = "btp,bpd->btd"}> : () -> ()
    %cst_44 = arith.constant dense<0.000000e+00> : vector<4x4x4xf32>
    %175 = tpu.matmul %174, %163, %cst_44 {dimension_numbers = #tpu.dot_dimension_numbers<[2], [1], [1], [2], [0, 0, 0, 1, 1, 2], [0], [0]>} : vector<4x4x4xf32>, vector<4x4x4xf32>, vector<4x4x4xf32> -> vector<4x4x4xf32>
    "tpu.trace_stop"() : () -> ()
    %176 = arith.addf %175, %161 : vector<4x4x4xf32>
    %177 = tpu.concatenate %36, %56, %76, %96, %116, %136, %156, %176 in 2 : vector<4x4x4xf32>, vector<4x4x4xf32>, vector<4x4x4xf32>, vector<4x4x4xf32>, vector<4x4x4xf32>, vector<4x4x4xf32>, vector<4x4x4xf32>, vector<4x4x4xf32> -> vector<4x4x32xf32>
    %c0_45 = arith.constant 0 : index
    %c0_46 = arith.constant 0 : index
    %178 = vector.load %arg7[%c0_45, %c0_46] : memref<8x32xf32, #tpu.memory_space<vmem>>, vector<8x32xf32>
    %c0_47 = arith.constant 0 : index
    %c0_48 = arith.constant 0 : index
    %179 = vector.load %arg8[%c0_47, %c0_48] : memref<8x32xf32, #tpu.memory_space<vmem>>, vector<8x32xf32>
    %cst_49 = arith.constant 0.392699093 : f32
    %180 = vector.broadcast %cst_49 : f32 to vector<4x4x32xf32>
    %181 = arith.mulf %180, %177 : vector<4x4x32xf32>
    %182 = math.sin %181 : vector<4x4x32xf32>
    %cst_50 = arith.constant 0.392699093 : f32
    %183 = vector.broadcast %cst_50 : f32 to vector<4x4x32xf32>
    %184 = arith.mulf %183, %177 : vector<4x4x32xf32>
    %185 = math.cos %184 : vector<4x4x32xf32>
    %cst_51 = arith.constant 0.000000e+00 : f32
    %186 = vector.broadcast %cst_51 : f32 to vector<4x4x32xf32>
    %cst_52 = arith.constant 1.000000e+00 : f32
    %187 = vector.broadcast %cst_52 : f32 to vector<4x4x32xf32>
    %188 = vector.extract_strided_slice %179 {offsets = [0, 0], sizes = [1, 32], strides = [1, 1]} : vector<8x32xf32> to vector<1x32xf32>
    %189 = vector.shape_cast %188 : vector<1x32xf32> to vector<1x1x32xf32>
    %190 = vector.shape_cast %189 : vector<1x1x32xf32> to vector<1x1x32xf32>
    %191 = vector.broadcast %190 : vector<1x1x32xf32> to vector<4x4x32xf32>
    %192 = arith.mulf %186, %185 : vector<4x4x32xf32>
    %193 = arith.mulf %187, %182 : vector<4x4x32xf32>
    %194 = arith.addf %192, %193 : vector<4x4x32xf32>
    %195 = arith.mulf %187, %185 : vector<4x4x32xf32>
    %196 = arith.mulf %186, %182 : vector<4x4x32xf32>
    %197 = arith.subf %195, %196 : vector<4x4x32xf32>
    %198 = vector.extract_strided_slice %178 {offsets = [1, 0], sizes = [1, 32], strides = [1, 1]} : vector<8x32xf32> to vector<1x32xf32>
    %199 = vector.shape_cast %198 : vector<1x32xf32> to vector<1x1x32xf32>
    %200 = vector.broadcast %199 : vector<1x1x32xf32> to vector<4x4x32xf32>
    %201 = arith.mulf %194, %200 : vector<4x4x32xf32>
    %202 = arith.addf %191, %201 : vector<4x4x32xf32>
    %203 = vector.extract_strided_slice %179 {offsets = [1, 0], sizes = [1, 32], strides = [1, 1]} : vector<8x32xf32> to vector<1x32xf32>
    %204 = vector.shape_cast %203 : vector<1x32xf32> to vector<1x1x32xf32>
    %205 = vector.broadcast %204 : vector<1x1x32xf32> to vector<4x4x32xf32>
    %206 = arith.mulf %197, %205 : vector<4x4x32xf32>
    %207 = arith.addf %202, %206 : vector<4x4x32xf32>
    %208 = arith.mulf %194, %185 : vector<4x4x32xf32>
    %209 = arith.mulf %197, %182 : vector<4x4x32xf32>
    %210 = arith.addf %208, %209 : vector<4x4x32xf32>
    %211 = arith.mulf %197, %185 : vector<4x4x32xf32>
    %212 = arith.mulf %194, %182 : vector<4x4x32xf32>
    %213 = arith.subf %211, %212 : vector<4x4x32xf32>
    %214 = vector.extract_strided_slice %178 {offsets = [2, 0], sizes = [1, 32], strides = [1, 1]} : vector<8x32xf32> to vector<1x32xf32>
    %215 = vector.shape_cast %214 : vector<1x32xf32> to vector<1x1x32xf32>
    %216 = vector.broadcast %215 : vector<1x1x32xf32> to vector<4x4x32xf32>
    %217 = arith.mulf %210, %216 : vector<4x4x32xf32>
    %218 = arith.addf %207, %217 : vector<4x4x32xf32>
    %219 = vector.extract_strided_slice %179 {offsets = [2, 0], sizes = [1, 32], strides = [1, 1]} : vector<8x32xf32> to vector<1x32xf32>
    %220 = vector.shape_cast %219 : vector<1x32xf32> to vector<1x1x32xf32>
    %221 = vector.broadcast %220 : vector<1x1x32xf32> to vector<4x4x32xf32>
    %222 = arith.mulf %213, %221 : vector<4x4x32xf32>
    %223 = arith.addf %218, %222 : vector<4x4x32xf32>
    %224 = arith.mulf %210, %185 : vector<4x4x32xf32>
    %225 = arith.mulf %213, %182 : vector<4x4x32xf32>
    %226 = arith.addf %224, %225 : vector<4x4x32xf32>
    %227 = arith.mulf %213, %185 : vector<4x4x32xf32>
    %228 = arith.mulf %210, %182 : vector<4x4x32xf32>
    %229 = arith.subf %227, %228 : vector<4x4x32xf32>
    %230 = vector.extract_strided_slice %178 {offsets = [3, 0], sizes = [1, 32], strides = [1, 1]} : vector<8x32xf32> to vector<1x32xf32>
    %231 = vector.shape_cast %230 : vector<1x32xf32> to vector<1x1x32xf32>
    %232 = vector.broadcast %231 : vector<1x1x32xf32> to vector<4x4x32xf32>
    %233 = arith.mulf %226, %232 : vector<4x4x32xf32>
    %234 = arith.addf %223, %233 : vector<4x4x32xf32>
    %235 = vector.extract_strided_slice %179 {offsets = [3, 0], sizes = [1, 32], strides = [1, 1]} : vector<8x32xf32> to vector<1x32xf32>
    %236 = vector.shape_cast %235 : vector<1x32xf32> to vector<1x1x32xf32>
    %237 = vector.broadcast %236 : vector<1x1x32xf32> to vector<4x4x32xf32>
    %238 = arith.mulf %229, %237 : vector<4x4x32xf32>
    %239 = arith.addf %234, %238 : vector<4x4x32xf32>
    %240 = arith.mulf %226, %185 : vector<4x4x32xf32>
    %241 = arith.mulf %229, %182 : vector<4x4x32xf32>
    %242 = arith.addf %240, %241 : vector<4x4x32xf32>
    %243 = arith.mulf %229, %185 : vector<4x4x32xf32>
    %244 = arith.mulf %226, %182 : vector<4x4x32xf32>
    %245 = arith.subf %243, %244 : vector<4x4x32xf32>
    %246 = vector.extract_strided_slice %178 {offsets = [4, 0], sizes = [1, 32], strides = [1, 1]} : vector<8x32xf32> to vector<1x32xf32>
    %247 = vector.shape_cast %246 : vector<1x32xf32> to vector<1x1x32xf32>
    %248 = vector.broadcast %247 : vector<1x1x32xf32> to vector<4x4x32xf32>
    %249 = arith.mulf %242, %248 : vector<4x4x32xf32>
    %250 = arith.addf %239, %249 : vector<4x4x32xf32>
    %251 = vector.extract_strided_slice %179 {offsets = [4, 0], sizes = [1, 32], strides = [1, 1]} : vector<8x32xf32> to vector<1x32xf32>
    %252 = vector.shape_cast %251 : vector<1x32xf32> to vector<1x1x32xf32>
    %253 = vector.broadcast %252 : vector<1x1x32xf32> to vector<4x4x32xf32>
    %254 = arith.mulf %245, %253 : vector<4x4x32xf32>
    %255 = arith.addf %250, %254 : vector<4x4x32xf32>
    %256 = arith.mulf %242, %185 : vector<4x4x32xf32>
    %257 = arith.mulf %245, %182 : vector<4x4x32xf32>
    %258 = arith.addf %256, %257 : vector<4x4x32xf32>
    %259 = arith.mulf %245, %185 : vector<4x4x32xf32>
    %260 = arith.mulf %242, %182 : vector<4x4x32xf32>
    %261 = arith.subf %259, %260 : vector<4x4x32xf32>
    %262 = vector.extract_strided_slice %178 {offsets = [5, 0], sizes = [1, 32], strides = [1, 1]} : vector<8x32xf32> to vector<1x32xf32>
    %263 = vector.shape_cast %262 : vector<1x32xf32> to vector<1x1x32xf32>
    %264 = vector.broadcast %263 : vector<1x1x32xf32> to vector<4x4x32xf32>
    %265 = arith.mulf %258, %264 : vector<4x4x32xf32>
    %266 = arith.addf %255, %265 : vector<4x4x32xf32>
    %267 = vector.extract_strided_slice %179 {offsets = [5, 0], sizes = [1, 32], strides = [1, 1]} : vector<8x32xf32> to vector<1x32xf32>
    %268 = vector.shape_cast %267 : vector<1x32xf32> to vector<1x1x32xf32>
    %269 = vector.broadcast %268 : vector<1x1x32xf32> to vector<4x4x32xf32>
    %270 = arith.mulf %261, %269 : vector<4x4x32xf32>
    %271 = arith.addf %266, %270 : vector<4x4x32xf32>
    %272 = arith.mulf %258, %185 : vector<4x4x32xf32>
    %273 = arith.mulf %261, %182 : vector<4x4x32xf32>
    %274 = arith.addf %272, %273 : vector<4x4x32xf32>
    %275 = arith.mulf %261, %185 : vector<4x4x32xf32>
    %276 = arith.mulf %258, %182 : vector<4x4x32xf32>
    %277 = arith.subf %275, %276 : vector<4x4x32xf32>
    %278 = vector.extract_strided_slice %178 {offsets = [6, 0], sizes = [1, 32], strides = [1, 1]} : vector<8x32xf32> to vector<1x32xf32>
    %279 = vector.shape_cast %278 : vector<1x32xf32> to vector<1x1x32xf32>
    %280 = vector.broadcast %279 : vector<1x1x32xf32> to vector<4x4x32xf32>
    %281 = arith.mulf %274, %280 : vector<4x4x32xf32>
    %282 = arith.addf %271, %281 : vector<4x4x32xf32>
    %283 = vector.extract_strided_slice %179 {offsets = [6, 0], sizes = [1, 32], strides = [1, 1]} : vector<8x32xf32> to vector<1x32xf32>
    %284 = vector.shape_cast %283 : vector<1x32xf32> to vector<1x1x32xf32>
    %285 = vector.broadcast %284 : vector<1x1x32xf32> to vector<4x4x32xf32>
    %286 = arith.mulf %277, %285 : vector<4x4x32xf32>
    %287 = arith.addf %282, %286 : vector<4x4x32xf32>
    %288 = arith.mulf %274, %185 : vector<4x4x32xf32>
    %289 = arith.mulf %277, %182 : vector<4x4x32xf32>
    %290 = arith.addf %288, %289 : vector<4x4x32xf32>
    %291 = arith.mulf %277, %185 : vector<4x4x32xf32>
    %292 = arith.mulf %274, %182 : vector<4x4x32xf32>
    %293 = arith.subf %291, %292 : vector<4x4x32xf32>
    %294 = vector.extract_strided_slice %178 {offsets = [7, 0], sizes = [1, 32], strides = [1, 1]} : vector<8x32xf32> to vector<1x32xf32>
    %295 = vector.shape_cast %294 : vector<1x32xf32> to vector<1x1x32xf32>
    %296 = vector.broadcast %295 : vector<1x1x32xf32> to vector<4x4x32xf32>
    %297 = arith.mulf %290, %296 : vector<4x4x32xf32>
    %298 = arith.addf %287, %297 : vector<4x4x32xf32>
    %299 = vector.extract_strided_slice %179 {offsets = [7, 0], sizes = [1, 32], strides = [1, 1]} : vector<8x32xf32> to vector<1x32xf32>
    %300 = vector.shape_cast %299 : vector<1x32xf32> to vector<1x1x32xf32>
    %301 = vector.broadcast %300 : vector<1x1x32xf32> to vector<4x4x32xf32>
    %302 = arith.mulf %293, %301 : vector<4x4x32xf32>
    %303 = arith.addf %298, %302 : vector<4x4x32xf32>
    %304 = arith.addf %303, %177 : vector<4x4x32xf32>
    %305 = vector.extract_strided_slice %15 {offsets = [0, 0, 0], sizes = [4, 4, 4], strides = [1, 1, 1]} : vector<4x4x32xf32> to vector<4x4x4xf32>
    %306 = vector.extract_strided_slice %304 {offsets = [0, 0, 0], sizes = [4, 4, 4], strides = [1, 1, 1]} : vector<4x4x32xf32> to vector<4x4x4xf32>
    "tpu.trace_start"() <{level = 10 : i32, message = "bpd,btd->bpt"}> : () -> ()
    %cst_53 = arith.constant dense<0.000000e+00> : vector<4x4x4xf32>
    %307 = tpu.matmul %305, %306, %cst_53 {dimension_numbers = #tpu.dot_dimension_numbers<[2], [2], [1], [1], [0, 0, 0, 1, 1, 1], [0], [0]>} : vector<4x4x4xf32>, vector<4x4x4xf32>, vector<4x4x4xf32> -> vector<4x4x4xf32>
    "tpu.trace_stop"() : () -> ()
    %cst_54 = arith.constant dense<0xFF800000> : vector<4x4xf32>
    %308 = vector.multi_reduction <maximumf>, %307, %cst_54 [2] : vector<4x4x4xf32> to vector<4x4xf32>
    %309 = vector.shape_cast %308 : vector<4x4xf32> to vector<4x4x1xf32>
    %310 = vector.broadcast %309 : vector<4x4x1xf32> to vector<4x4x4xf32>
    %311 = arith.subf %307, %310 : vector<4x4x4xf32>
    %312 = math.exp %311 : vector<4x4x4xf32>
    %cst_55 = arith.constant dense<0.000000e+00> : vector<4x4xf32>
    %313 = vector.multi_reduction <add>, %312, %cst_55 [2] : vector<4x4x4xf32> to vector<4x4xf32>
    %314 = vector.shape_cast %313 : vector<4x4xf32> to vector<4x4x1xf32>
    %315 = tpu.reciprocal %314 {approx = true} : vector<4x4x1xf32> -> vector<4x4x1xf32>
    %316 = vector.broadcast %315 : vector<4x4x1xf32> to vector<4x4x4xf32>
    %317 = arith.mulf %312, %316 : vector<4x4x4xf32>
    "tpu.trace_start"() <{level = 10 : i32, message = "bpt,btd->bpd"}> : () -> ()
    %cst_56 = arith.constant dense<0.000000e+00> : vector<4x4x4xf32>
    %318 = tpu.matmul %317, %306, %cst_56 {dimension_numbers = #tpu.dot_dimension_numbers<[2], [1], [1], [2], [0, 0, 0, 1, 1, 2], [0], [0]>} : vector<4x4x4xf32>, vector<4x4x4xf32>, vector<4x4x4xf32> -> vector<4x4x4xf32>
    "tpu.trace_stop"() : () -> ()
    %319 = vector.extract_strided_slice %15 {offsets = [0, 0, 4], sizes = [4, 4, 4], strides = [1, 1, 1]} : vector<4x4x32xf32> to vector<4x4x4xf32>
    %320 = vector.extract_strided_slice %304 {offsets = [0, 0, 4], sizes = [4, 4, 4], strides = [1, 1, 1]} : vector<4x4x32xf32> to vector<4x4x4xf32>
    "tpu.trace_start"() <{level = 10 : i32, message = "bpd,btd->bpt"}> : () -> ()
    %cst_57 = arith.constant dense<0.000000e+00> : vector<4x4x4xf32>
    %321 = tpu.matmul %319, %320, %cst_57 {dimension_numbers = #tpu.dot_dimension_numbers<[2], [2], [1], [1], [0, 0, 0, 1, 1, 1], [0], [0]>} : vector<4x4x4xf32>, vector<4x4x4xf32>, vector<4x4x4xf32> -> vector<4x4x4xf32>
    "tpu.trace_stop"() : () -> ()
    %cst_58 = arith.constant dense<0xFF800000> : vector<4x4xf32>
    %322 = vector.multi_reduction <maximumf>, %321, %cst_58 [2] : vector<4x4x4xf32> to vector<4x4xf32>
    %323 = vector.shape_cast %322 : vector<4x4xf32> to vector<4x4x1xf32>
    %324 = vector.broadcast %323 : vector<4x4x1xf32> to vector<4x4x4xf32>
    %325 = arith.subf %321, %324 : vector<4x4x4xf32>
    %326 = math.exp %325 : vector<4x4x4xf32>
    %cst_59 = arith.constant dense<0.000000e+00> : vector<4x4xf32>
    %327 = vector.multi_reduction <add>, %326, %cst_59 [2] : vector<4x4x4xf32> to vector<4x4xf32>
    %328 = vector.shape_cast %327 : vector<4x4xf32> to vector<4x4x1xf32>
    %329 = tpu.reciprocal %328 {approx = true} : vector<4x4x1xf32> -> vector<4x4x1xf32>
    %330 = vector.broadcast %329 : vector<4x4x1xf32> to vector<4x4x4xf32>
    %331 = arith.mulf %326, %330 : vector<4x4x4xf32>
    "tpu.trace_start"() <{level = 10 : i32, message = "bpt,btd->bpd"}> : () -> ()
    %cst_60 = arith.constant dense<0.000000e+00> : vector<4x4x4xf32>
    %332 = tpu.matmul %331, %320, %cst_60 {dimension_numbers = #tpu.dot_dimension_numbers<[2], [1], [1], [2], [0, 0, 0, 1, 1, 2], [0], [0]>} : vector<4x4x4xf32>, vector<4x4x4xf32>, vector<4x4x4xf32> -> vector<4x4x4xf32>
    "tpu.trace_stop"() : () -> ()
    %333 = vector.extract_strided_slice %15 {offsets = [0, 0, 8], sizes = [4, 4, 4], strides = [1, 1, 1]} : vector<4x4x32xf32> to vector<4x4x4xf32>
    %334 = vector.extract_strided_slice %304 {offsets = [0, 0, 8], sizes = [4, 4, 4], strides = [1, 1, 1]} : vector<4x4x32xf32> to vector<4x4x4xf32>
    "tpu.trace_start"() <{level = 10 : i32, message = "bpd,btd->bpt"}> : () -> ()
    %cst_61 = arith.constant dense<0.000000e+00> : vector<4x4x4xf32>
    %335 = tpu.matmul %333, %334, %cst_61 {dimension_numbers = #tpu.dot_dimension_numbers<[2], [2], [1], [1], [0, 0, 0, 1, 1, 1], [0], [0]>} : vector<4x4x4xf32>, vector<4x4x4xf32>, vector<4x4x4xf32> -> vector<4x4x4xf32>
    "tpu.trace_stop"() : () -> ()
    %cst_62 = arith.constant dense<0xFF800000> : vector<4x4xf32>
    %336 = vector.multi_reduction <maximumf>, %335, %cst_62 [2] : vector<4x4x4xf32> to vector<4x4xf32>
    %337 = vector.shape_cast %336 : vector<4x4xf32> to vector<4x4x1xf32>
    %338 = vector.broadcast %337 : vector<4x4x1xf32> to vector<4x4x4xf32>
    %339 = arith.subf %335, %338 : vector<4x4x4xf32>
    %340 = math.exp %339 : vector<4x4x4xf32>
    %cst_63 = arith.constant dense<0.000000e+00> : vector<4x4xf32>
    %341 = vector.multi_reduction <add>, %340, %cst_63 [2] : vector<4x4x4xf32> to vector<4x4xf32>
    %342 = vector.shape_cast %341 : vector<4x4xf32> to vector<4x4x1xf32>
    %343 = tpu.reciprocal %342 {approx = true} : vector<4x4x1xf32> -> vector<4x4x1xf32>
    %344 = vector.broadcast %343 : vector<4x4x1xf32> to vector<4x4x4xf32>
    %345 = arith.mulf %340, %344 : vector<4x4x4xf32>
    "tpu.trace_start"() <{level = 10 : i32, message = "bpt,btd->bpd"}> : () -> ()
    %cst_64 = arith.constant dense<0.000000e+00> : vector<4x4x4xf32>
    %346 = tpu.matmul %345, %334, %cst_64 {dimension_numbers = #tpu.dot_dimension_numbers<[2], [1], [1], [2], [0, 0, 0, 1, 1, 2], [0], [0]>} : vector<4x4x4xf32>, vector<4x4x4xf32>, vector<4x4x4xf32> -> vector<4x4x4xf32>
    "tpu.trace_stop"() : () -> ()
    %347 = vector.extract_strided_slice %15 {offsets = [0, 0, 12], sizes = [4, 4, 4], strides = [1, 1, 1]} : vector<4x4x32xf32> to vector<4x4x4xf32>
    %348 = vector.extract_strided_slice %304 {offsets = [0, 0, 12], sizes = [4, 4, 4], strides = [1, 1, 1]} : vector<4x4x32xf32> to vector<4x4x4xf32>
    "tpu.trace_start"() <{level = 10 : i32, message = "bpd,btd->bpt"}> : () -> ()
    %cst_65 = arith.constant dense<0.000000e+00> : vector<4x4x4xf32>
    %349 = tpu.matmul %347, %348, %cst_65 {dimension_numbers = #tpu.dot_dimension_numbers<[2], [2], [1], [1], [0, 0, 0, 1, 1, 1], [0], [0]>} : vector<4x4x4xf32>, vector<4x4x4xf32>, vector<4x4x4xf32> -> vector<4x4x4xf32>
    "tpu.trace_stop"() : () -> ()
    %cst_66 = arith.constant dense<0xFF800000> : vector<4x4xf32>
    %350 = vector.multi_reduction <maximumf>, %349, %cst_66 [2] : vector<4x4x4xf32> to vector<4x4xf32>
    %351 = vector.shape_cast %350 : vector<4x4xf32> to vector<4x4x1xf32>
    %352 = vector.broadcast %351 : vector<4x4x1xf32> to vector<4x4x4xf32>
    %353 = arith.subf %349, %352 : vector<4x4x4xf32>
    %354 = math.exp %353 : vector<4x4x4xf32>
    %cst_67 = arith.constant dense<0.000000e+00> : vector<4x4xf32>
    %355 = vector.multi_reduction <add>, %354, %cst_67 [2] : vector<4x4x4xf32> to vector<4x4xf32>
    %356 = vector.shape_cast %355 : vector<4x4xf32> to vector<4x4x1xf32>
    %357 = tpu.reciprocal %356 {approx = true} : vector<4x4x1xf32> -> vector<4x4x1xf32>
    %358 = vector.broadcast %357 : vector<4x4x1xf32> to vector<4x4x4xf32>
    %359 = arith.mulf %354, %358 : vector<4x4x4xf32>
    "tpu.trace_start"() <{level = 10 : i32, message = "bpt,btd->bpd"}> : () -> ()
    %cst_68 = arith.constant dense<0.000000e+00> : vector<4x4x4xf32>
    %360 = tpu.matmul %359, %348, %cst_68 {dimension_numbers = #tpu.dot_dimension_numbers<[2], [1], [1], [2], [0, 0, 0, 1, 1, 2], [0], [0]>} : vector<4x4x4xf32>, vector<4x4x4xf32>, vector<4x4x4xf32> -> vector<4x4x4xf32>
    "tpu.trace_stop"() : () -> ()
    %361 = vector.extract_strided_slice %15 {offsets = [0, 0, 16], sizes = [4, 4, 4], strides = [1, 1, 1]} : vector<4x4x32xf32> to vector<4x4x4xf32>
    %362 = vector.extract_strided_slice %304 {offsets = [0, 0, 16], sizes = [4, 4, 4], strides = [1, 1, 1]} : vector<4x4x32xf32> to vector<4x4x4xf32>
    "tpu.trace_start"() <{level = 10 : i32, message = "bpd,btd->bpt"}> : () -> ()
    %cst_69 = arith.constant dense<0.000000e+00> : vector<4x4x4xf32>
    %363 = tpu.matmul %361, %362, %cst_69 {dimension_numbers = #tpu.dot_dimension_numbers<[2], [2], [1], [1], [0, 0, 0, 1, 1, 1], [0], [0]>} : vector<4x4x4xf32>, vector<4x4x4xf32>, vector<4x4x4xf32> -> vector<4x4x4xf32>
    "tpu.trace_stop"() : () -> ()
    %cst_70 = arith.constant dense<0xFF800000> : vector<4x4xf32>
    %364 = vector.multi_reduction <maximumf>, %363, %cst_70 [2] : vector<4x4x4xf32> to vector<4x4xf32>
    %365 = vector.shape_cast %364 : vector<4x4xf32> to vector<4x4x1xf32>
    %366 = vector.broadcast %365 : vector<4x4x1xf32> to vector<4x4x4xf32>
    %367 = arith.subf %363, %366 : vector<4x4x4xf32>
    %368 = math.exp %367 : vector<4x4x4xf32>
    %cst_71 = arith.constant dense<0.000000e+00> : vector<4x4xf32>
    %369 = vector.multi_reduction <add>, %368, %cst_71 [2] : vector<4x4x4xf32> to vector<4x4xf32>
    %370 = vector.shape_cast %369 : vector<4x4xf32> to vector<4x4x1xf32>
    %371 = tpu.reciprocal %370 {approx = true} : vector<4x4x1xf32> -> vector<4x4x1xf32>
    %372 = vector.broadcast %371 : vector<4x4x1xf32> to vector<4x4x4xf32>
    %373 = arith.mulf %368, %372 : vector<4x4x4xf32>
    "tpu.trace_start"() <{level = 10 : i32, message = "bpt,btd->bpd"}> : () -> ()
    %cst_72 = arith.constant dense<0.000000e+00> : vector<4x4x4xf32>
    %374 = tpu.matmul %373, %362, %cst_72 {dimension_numbers = #tpu.dot_dimension_numbers<[2], [1], [1], [2], [0, 0, 0, 1, 1, 2], [0], [0]>} : vector<4x4x4xf32>, vector<4x4x4xf32>, vector<4x4x4xf32> -> vector<4x4x4xf32>
    "tpu.trace_stop"() : () -> ()
    %375 = vector.extract_strided_slice %15 {offsets = [0, 0, 20], sizes = [4, 4, 4], strides = [1, 1, 1]} : vector<4x4x32xf32> to vector<4x4x4xf32>
    %376 = vector.extract_strided_slice %304 {offsets = [0, 0, 20], sizes = [4, 4, 4], strides = [1, 1, 1]} : vector<4x4x32xf32> to vector<4x4x4xf32>
    "tpu.trace_start"() <{level = 10 : i32, message = "bpd,btd->bpt"}> : () -> ()
    %cst_73 = arith.constant dense<0.000000e+00> : vector<4x4x4xf32>
    %377 = tpu.matmul %375, %376, %cst_73 {dimension_numbers = #tpu.dot_dimension_numbers<[2], [2], [1], [1], [0, 0, 0, 1, 1, 1], [0], [0]>} : vector<4x4x4xf32>, vector<4x4x4xf32>, vector<4x4x4xf32> -> vector<4x4x4xf32>
    "tpu.trace_stop"() : () -> ()
    %cst_74 = arith.constant dense<0xFF800000> : vector<4x4xf32>
    %378 = vector.multi_reduction <maximumf>, %377, %cst_74 [2] : vector<4x4x4xf32> to vector<4x4xf32>
    %379 = vector.shape_cast %378 : vector<4x4xf32> to vector<4x4x1xf32>
    %380 = vector.broadcast %379 : vector<4x4x1xf32> to vector<4x4x4xf32>
    %381 = arith.subf %377, %380 : vector<4x4x4xf32>
    %382 = math.exp %381 : vector<4x4x4xf32>
    %cst_75 = arith.constant dense<0.000000e+00> : vector<4x4xf32>
    %383 = vector.multi_reduction <add>, %382, %cst_75 [2] : vector<4x4x4xf32> to vector<4x4xf32>
    %384 = vector.shape_cast %383 : vector<4x4xf32> to vector<4x4x1xf32>
    %385 = tpu.reciprocal %384 {approx = true} : vector<4x4x1xf32> -> vector<4x4x1xf32>
    %386 = vector.broadcast %385 : vector<4x4x1xf32> to vector<4x4x4xf32>
    %387 = arith.mulf %382, %386 : vector<4x4x4xf32>
    "tpu.trace_start"() <{level = 10 : i32, message = "bpt,btd->bpd"}> : () -> ()
    %cst_76 = arith.constant dense<0.000000e+00> : vector<4x4x4xf32>
    %388 = tpu.matmul %387, %376, %cst_76 {dimension_numbers = #tpu.dot_dimension_numbers<[2], [1], [1], [2], [0, 0, 0, 1, 1, 2], [0], [0]>} : vector<4x4x4xf32>, vector<4x4x4xf32>, vector<4x4x4xf32> -> vector<4x4x4xf32>
    "tpu.trace_stop"() : () -> ()
    %389 = vector.extract_strided_slice %15 {offsets = [0, 0, 24], sizes = [4, 4, 4], strides = [1, 1, 1]} : vector<4x4x32xf32> to vector<4x4x4xf32>
    %390 = vector.extract_strided_slice %304 {offsets = [0, 0, 24], sizes = [4, 4, 4], strides = [1, 1, 1]} : vector<4x4x32xf32> to vector<4x4x4xf32>
    "tpu.trace_start"() <{level = 10 : i32, message = "bpd,btd->bpt"}> : () -> ()
    %cst_77 = arith.constant dense<0.000000e+00> : vector<4x4x4xf32>
    %391 = tpu.matmul %389, %390, %cst_77 {dimension_numbers = #tpu.dot_dimension_numbers<[2], [2], [1], [1], [0, 0, 0, 1, 1, 1], [0], [0]>} : vector<4x4x4xf32>, vector<4x4x4xf32>, vector<4x4x4xf32> -> vector<4x4x4xf32>
    "tpu.trace_stop"() : () -> ()
    %cst_78 = arith.constant dense<0xFF800000> : vector<4x4xf32>
    %392 = vector.multi_reduction <maximumf>, %391, %cst_78 [2] : vector<4x4x4xf32> to vector<4x4xf32>
    %393 = vector.shape_cast %392 : vector<4x4xf32> to vector<4x4x1xf32>
    %394 = vector.broadcast %393 : vector<4x4x1xf32> to vector<4x4x4xf32>
    %395 = arith.subf %391, %394 : vector<4x4x4xf32>
    %396 = math.exp %395 : vector<4x4x4xf32>
    %cst_79 = arith.constant dense<0.000000e+00> : vector<4x4xf32>
    %397 = vector.multi_reduction <add>, %396, %cst_79 [2] : vector<4x4x4xf32> to vector<4x4xf32>
    %398 = vector.shape_cast %397 : vector<4x4xf32> to vector<4x4x1xf32>
    %399 = tpu.reciprocal %398 {approx = true} : vector<4x4x1xf32> -> vector<4x4x1xf32>
    %400 = vector.broadcast %399 : vector<4x4x1xf32> to vector<4x4x4xf32>
    %401 = arith.mulf %396, %400 : vector<4x4x4xf32>
    "tpu.trace_start"() <{level = 10 : i32, message = "bpt,btd->bpd"}> : () -> ()
    %cst_80 = arith.constant dense<0.000000e+00> : vector<4x4x4xf32>
    %402 = tpu.matmul %401, %390, %cst_80 {dimension_numbers = #tpu.dot_dimension_numbers<[2], [1], [1], [2], [0, 0, 0, 1, 1, 2], [0], [0]>} : vector<4x4x4xf32>, vector<4x4x4xf32>, vector<4x4x4xf32> -> vector<4x4x4xf32>
    "tpu.trace_stop"() : () -> ()
    %403 = vector.extract_strided_slice %15 {offsets = [0, 0, 28], sizes = [4, 4, 4], strides = [1, 1, 1]} : vector<4x4x32xf32> to vector<4x4x4xf32>
    %404 = vector.extract_strided_slice %304 {offsets = [0, 0, 28], sizes = [4, 4, 4], strides = [1, 1, 1]} : vector<4x4x32xf32> to vector<4x4x4xf32>
    "tpu.trace_start"() <{level = 10 : i32, message = "bpd,btd->bpt"}> : () -> ()
    %cst_81 = arith.constant dense<0.000000e+00> : vector<4x4x4xf32>
    %405 = tpu.matmul %403, %404, %cst_81 {dimension_numbers = #tpu.dot_dimension_numbers<[2], [2], [1], [1], [0, 0, 0, 1, 1, 1], [0], [0]>} : vector<4x4x4xf32>, vector<4x4x4xf32>, vector<4x4x4xf32> -> vector<4x4x4xf32>
    "tpu.trace_stop"() : () -> ()
    %cst_82 = arith.constant dense<0xFF800000> : vector<4x4xf32>
    %406 = vector.multi_reduction <maximumf>, %405, %cst_82 [2] : vector<4x4x4xf32> to vector<4x4xf32>
    %407 = vector.shape_cast %406 : vector<4x4xf32> to vector<4x4x1xf32>
    %408 = vector.broadcast %407 : vector<4x4x1xf32> to vector<4x4x4xf32>
    %409 = arith.subf %405, %408 : vector<4x4x4xf32>
    %410 = math.exp %409 : vector<4x4x4xf32>
    %cst_83 = arith.constant dense<0.000000e+00> : vector<4x4xf32>
    %411 = vector.multi_reduction <add>, %410, %cst_83 [2] : vector<4x4x4xf32> to vector<4x4xf32>
    %412 = vector.shape_cast %411 : vector<4x4xf32> to vector<4x4x1xf32>
    %413 = tpu.reciprocal %412 {approx = true} : vector<4x4x1xf32> -> vector<4x4x1xf32>
    %414 = vector.broadcast %413 : vector<4x4x1xf32> to vector<4x4x4xf32>
    %415 = arith.mulf %410, %414 : vector<4x4x4xf32>
    "tpu.trace_start"() <{level = 10 : i32, message = "bpt,btd->bpd"}> : () -> ()
    %cst_84 = arith.constant dense<0.000000e+00> : vector<4x4x4xf32>
    %416 = tpu.matmul %415, %404, %cst_84 {dimension_numbers = #tpu.dot_dimension_numbers<[2], [1], [1], [2], [0, 0, 0, 1, 1, 2], [0], [0]>} : vector<4x4x4xf32>, vector<4x4x4xf32>, vector<4x4x4xf32> -> vector<4x4x4xf32>
    "tpu.trace_stop"() : () -> ()
    %417 = tpu.concatenate %318, %332, %346, %360, %374, %388, %402, %416 in 2 : vector<4x4x4xf32>, vector<4x4x4xf32>, vector<4x4x4xf32>, vector<4x4x4xf32>, vector<4x4x4xf32>, vector<4x4x4xf32>, vector<4x4x4xf32>, vector<4x4x4xf32> -> vector<4x4x32xf32>
    %418 = vector.shape_cast %417 : vector<4x4x32xf32> to vector<16x32xf32>
    %419 = arith.addf %418, %0 : vector<16x32xf32>
    %c0_85 = arith.constant 0 : index
    %c0_86 = arith.constant 0 : index
    %420 = vector.load %arg9[%c0_85, %c0_86] : memref<16x32xf32, #tpu.memory_space<vmem>>, vector<16x32xf32>
    tpu.vector_store %arg9[%c0_85, %c0_86], %419 {strides = array<i32>} : memref<16x32xf32, #tpu.memory_space<vmem>>, vector<16x32xf32>,
    return
  }
  func.func @transform_0(%arg0: i32) -> (i32, i32) {
    %c0_i32 = arith.constant 0 : i32
    %c0_i32_0 = arith.constant 0 : i32
    return %arg0, %c0_i32 : i32, i32
  }
  func.func @transform_1(%arg0: i32) -> (i32, i32, i32) {
    %c0_i32 = arith.constant 0 : i32
    %c0_i32_0 = arith.constant 0 : i32
    %c0_i32_1 = arith.constant 0 : i32
    %c0_i32_2 = arith.constant 0 : i32
    return %c0_i32, %c0_i32_0, %c0_i32_1 : i32, i32, i32
  }
  func.func @transform_2(%arg0: i32) -> (i32, i32) {
    %c0_i32 = arith.constant 0 : i32
    %c0_i32_0 = arith.constant 0 : i32
    %c0_i32_1 = arith.constant 0 : i32
    return %c0_i32, %c0_i32_0 : i32, i32
  }
  func.func @transform_3(%arg0: i32) -> (i32, i32) {
    %c0_i32 = arith.constant 0 : i32
    %c0_i32_0 = arith.constant 0 : i32
    %c0_i32_1 = arith.constant 0 : i32
    return %c0_i32, %c0_i32_0 : i32, i32
  }
  func.func @transform_4(%arg0: i32) -> (i32, i32) {
    %c0_i32 = arith.constant 0 : i32
    %c0_i32_0 = arith.constant 0 : i32
    %c0_i32_1 = arith.constant 0 : i32
    return %c0_i32, %c0_i32_0 : i32, i32
  }
  func.func @transform_5(%arg0: i32) -> (i32, i32) {
    %c0_i32 = arith.constant 0 : i32
    %c0_i32_0 = arith.constant 0 : i32
    %c0_i32_1 = arith.constant 0 : i32
    return %c0_i32, %c0_i32_0 : i32, i32
  }
  func.func @transform_6(%arg0: i32) -> (i32, i32) {
    %c0_i32 = arith.constant 0 : i32
    %c0_i32_0 = arith.constant 0 : i32
    %c0_i32_1 = arith.constant 0 : i32
    return %c0_i32, %c0_i32_0 : i32, i32
  }
  func.func @transform_7(%arg0: i32) -> (i32, i32) {
    %c0_i32 = arith.constant 0 : i32
    %c0_i32_0 = arith.constant 0 : i32
    %c0_i32_1 = arith.constant 0 : i32
    return %c0_i32, %c0_i32_0 : i32, i32
  }
  func.func @transform_8(%arg0: i32) -> (i32, i32) {
    %c0_i32 = arith.constant 0 : i32
    %c0_i32_0 = arith.constant 0 : i32
    return %arg0, %c0_i32 : i32, i32
  }
}

</mosaic_0001>

<bundles_post_ra>
// kernel: tpu_custom_call.1
= control target key start
LH: loop header
LB: loop body
LE: loop exit
PB: predicated region body
PF: predicated region fallthrough
CT: control target
= control target key end

     0   :  { %13 = vsyncpa [#allocation3], 0  ;;  %s16563_s0 = inlined_call_operand.vmem [shape: f32[32,32], index: 0, kind: input, shape index: {}]   ;;  %s16564_s1 = inlined_call_operand.vmem [shape: f32[8,4,4], index: 1, kind: input, shape index: {}]   ;;  %s16565_s2 = inlined_call_operand.hbm [shape: f32[32,64], index: 2, kind: input, shape index: {}]   ;;  %s16566_s3 = inlined_call_operand.vmem [shape: f32[1,64], index: 3, kind: input, shape index: {}]   ;;  %s16567_s4 = inlined_call_operand.hbm [shape: f32[32,32], index: 4, kind: input, shape index: {}]   ;;  %s16568_s5 = inlined_call_operand.vmem [shape: f32[1,32], index: 5, kind: input, shape index: {}]   ;;  %s16569_s6 = inlined_call_operand.vmem [shape: f32[8,32], index: 6, kind: input, shape index: {}]   ;;  %s16570_s7 = inlined_call_operand.vmem [shape: f32[8,32], index: 7, kind: input, shape index: {}]   ;;  %s16571_s8 = inlined_call_operand.hbm [shape: f32[32,32], index: 8, kind: output, shape index: {}]  }
   0x1   :  { %14 = vsyncpa [#allocation6], 0 }
   0x2   :  { %15 = vsyncpa [#allocation4], 0 }
   0x3   :  { %17 = vsyncpa [#allocation4 + $0x1], 0  ;;  %s14378_s27 = smov 0   ;;  %s14380_s28 = smov 0  }
   0x4   :  { %s14382_s29 = smov 0   ;;  %s14384_s30 = smov 0  }
   0x5 LB: > { %s14399_s9 = sadd.s32 4294967295, %s14295_s30   ;;  %s12545_s10 = sadd.s32 4294967294, %s14295_s30   ;;  %s14295_s30 = sphi %s14384_s30, %s16708_s30   ;;  %s14291_s29 = sphi %s14382_s29, %s16707_s29   ;;  %s14287_s28 = sphi %s14380_s28, %s16706_s28   ;;  %s14283_s27 = sphi %s14378_s27, %s16705_s27  }
   0x6   : > { %s14403_s11 = sadd.s32 1, %s14295_s30   ;;  %s203_s12 = sadd.s32 1, %s14291_s29 }
   0x7   : > { %s200_s13 = ssub.s32 %s14295_s30, %s14403_s11  ;;  %p213_p0 = scmp.ne.s32.totalorder %s14291_s29, %s14287_s28 }
   0x8   : > { %p201_p1 = scmp.eq.s32.totalorder %s200_s13, 0  ;;  %p214_p2 = scmp.eq.s32.totalorder %s14399_s9, 1 }
   0x9   : > { %p219_p3 = scmp.ne.s32.totalorder %s14287_s28, %s14283_s27  ;;  %p220_p4 = scmp.eq.s32.totalorder %s12545_s10, 1 }
   0xa   : > { %s14414_s14 = scalar_select %p201_p1, %s14291_s29, %s203_s12  }
   0xb   : > { %p14416_p5 = por %p214_p2, %p213_p0  ;;  %p14420_p6 = por %p220_p4, %p219_p3 }
   0xc   : > { %p12546_p7 = scmp.ge.s32.totalorder %s14295_s30, 1  ;;  %p227_p8 = scmp.lt.s32.totalorder %s14295_s30, 3 }
   0xd   : > { %s16607_s16 = scalar_select %p14420_p6, 1, 0 }
   0xe   : > { %p16572_p9 = scmp.eq.s32.totalorder %s14399_s9, 0  ;;  %p14427_p10 = pnand %p12546_p7, %p227_p8 }
   0xf   : > { %s14297_s18 = smov [#allocation2]   ;;  %s14298_s21 = smov [#allocation5]  }
  0x10   : > { %s242_s19 = sshll.u32 %s14297_s18, 4  ;;  %p13812_p11 = pneg %p14427_p10  ;;  %s243_s19 = int_to_ptr.vmem [resolvable:$true] %s242_s19 }
  0x11   : > { %s258_s22 = sshll.u32 %s14298_s21, 4  ;;  %s14186_s23 = scalar_lea.vmem %s243_s19, 512  ;;  %s259_s22 = int_to_ptr.vmem [resolvable:$true] %s258_s22 }
  0x12   : > { %p14435_p12 = pnand %p16572_p9, %p13812_p11  ;;  %p14187_p0 = scmp.ne.s32.totalorder %s243_s19, %s14186_s23 }
  0x13   : > { %p14194_p3 = scmp.lt.s32.totalorder %s243_s19, %s243_s19  ;;  %p14195_p4 = scmp.lt.s32.totalorder %s14186_s23, %s14186_s23 }
  0x14   : > { %p14177_p13 = pneg %p14435_p12 }
  0x15   : > { %p14196_p7 = por %p14195_p4, %p14194_p3 }
  0x16   : > { %p14189_p1 = pnand %p14187_p0, %p14177_p13 }
  0x18   : > { %p14190_p2 = pneg %p14189_p1 }
  0x1a   : > { %p14197_p8 = pnand %p14196_p7, %p14190_p2 }
  0x1c   : > { %14200 = shalt.err (!%p14197_p8)
}
  0x1d   : > { %s14299_s24 = smov 128   ;;  %s14300_s25 = smov 8  }
  0x1e   : > { %13815 = dma.hbm_to_vmem [thread:$0]  (!%p14435_p12), %s16565_s2, 512, %s243_s19, [#allocation3], %s14299_s24, %s14299_s24, %s14300_s25  }
  0x1f   : > { %s14212_s12 = scalar_lea.vmem %s259_s22, 512  ;;  %p14220_p9 = scmp.lt.s32.totalorder %s259_s22, %s259_s22 }
  0x20   : > { %p14213_p11 = scmp.ne.s32.totalorder %s259_s22, %s14212_s12  ;;  %p14221_p6 = scmp.lt.s32.totalorder %s14212_s12, %s14212_s12 }
  0x22   : > { %p14215_p0 = pnand %p14213_p11, %p14177_p13  ;;  %p14222_p3 = por %p14221_p6, %p14220_p9 }
  0x24   : > { %p14216_p1 = pneg %p14215_p0 }
  0x26   : > { %p14223_p2 = pnand %p14222_p3, %p14216_p1 }
  0x28   : > { %14226 = shalt.err (!%p14223_p2)
}
  0x29   : > { %13818 = dma.hbm_to_vmem [thread:$0]  (!%p14435_p12), %s16567_s4, 512, %s259_s22, [#allocation6], %s14299_s24, %s14299_s24, %s14300_s25  }
  0x2a   : > { %292 = sbr.rel (%p14427_p10) target bundleno = 10012 (0x271c), region = 52  ;;  %p16610_p4 = scmp.eq.s32.totalorder (!%p14427_p10), %s14399_s9, 0 }
  0x2f   : > { %14270 = dma.done.wait (%p16610_p4), [#allocation3], 512   ;;  %p16611_p13 = pmov %p16610_p4 }
  0x30   : > { %p16612_p7 = pmov %p16610_p4 }
  0x31   : > { %14272 = vsyncadd (%p16611_p13), [#allocation3], 4294966784 }
  0x32   : > { %14274 = dma.done.wait (%p16612_p7), [#allocation6], 512   ;;  %p16613_p6 = pmov %p16610_p4 }
  0x33   : > { %s12554_s19 = sshll.u32 %s14399_s9, 1  ;;  %vm16581_vm0 = vcmask 261120   ;;  %v342_v0 = vld [vmem:[#allocation2 + $0x18] sm:$0xff]  ;;  %v341_v1 = vld [vmem:[#allocation2 + $0x10] sm:$0xff]  ;;  %v340_v3 = vld [vmem:[#allocation2 + $0x8] sm:$0xff]  ;;  %v16587_v10 = vmov 0.0  }
  0x34   : > { %14276 = vsyncadd (%p16613_p6), [#allocation6], 4294966784  ;;  %p331_p9 = scmp.lt.s32.totalorder %s12554_s19, 3  ;;  %13124 = vmatprep.subr.mxu0 %v342_v0  ;;  %v435_v4 = vld [vmem:[#allocation5 + $0x18] sm:$0xff]  ;;  %v339_v5 = vld [vmem:[#allocation2] sm:$0xff]  ;;  %vm14302_vm1 = vmmov 0  }
  0x35   : > { %13125 = vmatpush3.msra.mxu0 %v342_v0  ;;  %13135 = vmatprep.subr.mxu1 %v435_v4  ;;  %v434_v7 = vld [vmem:[#allocation5 + $0x10] sm:$0xff]  ;;  %v433_v8 = vld [vmem:[#allocation5 + $0x8] sm:$0xff]  ;;  %v432_v9 = vld [vmem:[#allocation5] sm:$0xff]  ;;  %vm534_vm2 = vcmask 31744   ;;  %s14303_s10 = smov 96   ;;  %vm876_vm3 = vcmask 1043456  }
  0x36   : > { %s16710_s19 = smov (!%p331_p9, %s12554_s19), 3  ;;  %13126 = vmatprep.subr.mxu0 %v341_v1  ;;  %13136 = vmatpush3.msra.mxu1 %v435_v4  ;;  %v12556_v12 = vld [vmem:[%s16566_s3] ss:$0 sm:$0xff]  ;;  %vm16582_vm4 = vcmask 27648   ;;  %s14304_s18 = smov 124   ;;  %vm5853_vm5 = vcmask 64512  }
  0x37   : > { %s12555_s20 = sshll.u32 %s16710_s19, 3  ;;  %13127 = vmatpush3.msra.mxu0 %v341_v1  ;;  %13137 = vmatprep.subr.mxu1 %v434_v7  ;;  %v526_v17 = vld [vmem:[%s16564_s1] sm:$0xf]  ;;  %s14305_s21 = smov 92   ;;  %vm5858_vm6 = vcmask 97280   ;;  %vm5863_vm7 = vcmask 130048  }
  0x38   : > { %s14471_s22 = scalar_lea.vmem %s16563_s0, %s12555_s20  ;;  %13128 = vmatprep.subr.mxu0 %v340_v3  ;;  %13138 = vmatpush3.msra.mxu1 %v434_v7  ;;  %v12559_v19 = vld [vmem:[%s16568_s5] ss:$0 sm:$0xff]  ;;  %s14306_s17 = smov 120   ;;  %vm16605_vm8 = vcmask 162816   ;;  %vm16604_vm9 = vcmask 195584   ;;  %vm16603_vm10 = vcmask 228352  }
  0x39   : > { %v337_v2 = vld [vmem:[%s14471_s22] sm:$0xff]  ;;  %13129 = vmatpush3.msra.mxu0 %v340_v3  ;;  %v338_v6 = vld [vmem:[%s14471_s22 + $0x8] sm:$0xff]  ;;  %13139 = vmatprep.subr.mxu1 %v433_v8  ;;  %s14307_s25 = smov 88   ;;  %s14308_s26 = smov 116  }
  0x3a   : > { %13132 = vmatprep.mubr.msk.f32.mxu0 %vm16581_vm0, %v337_v2  ;;  %13143 = vmatprep.mubr.msk.f32.mxu1 %vm16581_vm0, %v337_v2  ;;  %s14309_s13 = smov 84   ;;  %s14310_s19 = smov 112  }
  0x3b   : > { %13130 = vmatprep.subr.mxu0 %v339_v5  ;;  %13140 = vmatpush3.msra.mxu1 %v433_v8  ;;  %s14311_s23 = smov 80   ;;  %s16577_s24 = smov 108  }
  0x3c   : > { %13131 = vmatpush3.msra.mxu0 %v339_v5  ;;  %13141 = vmatprep.subr.mxu1 %v432_v9  ;;  %v527_v5 = vld [vmem:[%s16564_s1 + $0x4] sm:$0xf]  ;;  %s14313_s12 = smov 76   ;;  %s14317_s20 = smov 68  }
  0x3d   : > { %13133 = vmatmul.mubr.msk.f32.vlgmr.msra.gmra.mxu0 %vm16581_vm0, %v338_v6  ;;  %13146 = vmatprep.subr.mxu0 %v16587_v10 }
  0x3e   : > { %13142 = vmatpush3.msra.mxu1 %v432_v9  ;;  %13148 = vmatprep.mubr.msk.f32.mxu0 %vm14302_vm1, %v16587_v10 }
  0x3f   : > { %13144 = vmatmul.mubr.msk.f32.vlgmr.msra.gmra.mxu1 %vm16581_vm0, %v338_v6  ;;  %13151 = vmatprep.subr.mxu1 %v16587_v10 }
  0x40   : > { %13153 = vmatprep.mubr.msk.f32.mxu1 %vm14302_vm1, %v16587_v10 }
  0xfd   : > { %v13134_v11 = vpop.f32.mrf.mxu0 }
  0xfe   : > { %v14490_v15 = vadd.f32 %v13134_v11, %v12556_v12 }
  0xff   : > { %v423_v13 = vpop.f32.mrf.mxu0  ;;  %v13145_v20 = vpop.f32.mrf.mxu1 }
 0x100   : > { %v14488_v14 = vadd.f32 %v12556_v12, %v423_v13  ;;  %v14514_v18 = vcombine.high %v14490_v15, %v14490_v15  ;;  %v14534_v21 = vadd.f32 %v13145_v20, %v12559_v19 }
 0x101   : > { %v14538_v23 = vpop.f32.mrf.mxu1 }
 0x102   : > { %13147 = vmatpush3.xpose.msk.msra.mxu0 %vm534_vm2, %v14488_v14  ;;  %v14496_v16 = vcombine.high %v14488_v14, %v14488_v14 }
 0x103   : > { %13156 = vmatprep.subr.mxu0 %v16587_v10 }
 0x104   : > { %949 = vrot.lane.b32.xlu1 %v14496_v16, %s14303_s10  ;;  %13152 = vmatpush3.xpose.msk.msra.mxu1 %vm534_vm2, %v14496_v16 }
 0x105   : > { %13149 = vmatmul.mubr.msk.f32.vlgmr.msra.gmra.mxu0 %vm534_vm2, %v526_v17  ;;  %13161 = vmatprep.subr.mxu1 %v16587_v10 }
 0x106   : > { %13157 = vmatpush3.xpose.msk.msra.mxu0 %vm534_vm2, %v14490_v15  ;;  %13158 = vmatprep.mubr.msk.f32.mxu0 %vm14302_vm1, %v16587_v10 }
 0x107   : > { %13154 = vmatmul.mubr.msk.f32.vlgmr.msra.gmra.mxu1 %vm534_vm2, %v526_v17  ;;  %13166 = vmatprep.subr.mxu0 %v16587_v10 }
 0x108   : > { %1026 = vrot.lane.b32.xlu1 %v14490_v15, %s14303_s10  ;;  %13162 = vmatpush3.xpose.msk.msra.mxu1 %vm534_vm2, %v14514_v18 }
 0x109   : > { %13159 = vmatmul.mubr.msk.f32.vlgmr.msra.gmra.mxu0 %vm534_vm2, %v526_v17  ;;  %13163 = vmatprep.mubr.msk.f32.mxu1 %vm14302_vm1, %v16587_v10 }
 0x10a   : > { %13171 = vmatprep.subr.mxu1 %v16587_v10  ;;  %13168 = vmatprep.mubr.msk.f32.mxu0 %vm14302_vm1, %v16587_v10 }
 0x10b   : > { %13164 = vmatmul.mubr.msk.f32.vlgmr.msra.gmra.mxu1 %vm534_vm2, %v526_v17 }
 0x10c   : > { %13173 = vmatprep.mubr.msk.f32.mxu1 %vm14302_vm1, %v16587_v10 }
 0x176   : > { %v950_v22 = vpop.permute.xlu1 %949 }
 0x177   : > { %13172 = vmatpush3.msk.msra.mxu1 %vm876_vm3, %v950_v22 }
 0x178   : > { %13181 = vmatprep.subr.mxu1 %v16587_v10 }
 0x17a   : > { %v1027_v36 = vpop.permute.xlu1 %1026 }
 0x1c5   : > { %v606_v24 = vpop.f32.mrf.mxu0 }
 0x1c6   : > { %v827_v25 = vsel %vm16582_vm4, %v606_v24, -inf }
 0x1c7   : > { %828 = vmax.xlane.f32.xlu0 %v827_v25  ;;  %v13150_v26 = vpop.f32.mrf.mxu0  ;;  %v678_v27 = vpop.f32.mrf.mxu1 }
 0x1c8   : > { %v830_v28 = vsel %vm16582_vm4, %v678_v27, -inf }
 0x1c9   : > { %v13155_v29 = vpop.f32.mrf.mxu1  ;;  %v750_v30 = vpop.f32.mrf.mxu0 }
 0x1ca   : > { %v833_v31 = vsel %vm16582_vm4, %v750_v30, -inf }
 0x1cb   : > { %834 = vmax.xlane.f32.xlu1 %v833_v31  ;;  %831 = vmax.xlane.f32.xlu0 %v830_v28  ;;  %v822_v32 = vpop.f32.mrf.mxu1  ;;  %v13160_v33 = vpop.f32.mrf.mxu0 }
 0x1cc   : > { %v836_v34 = vsel %vm16582_vm4, %v822_v32, -inf }
 0x1cd   : > { %v13165_v35 = vpop.f32.mrf.mxu1 }
 0x1cf   : > { %837 = vmax.xlane.f32.xlu1 %v836_v34 }
 0x1e0   : > { %1103 = vrot.lane.b32.xlu1 %v14514_v18, %s14303_s10 }
 0x1e1   : > { %871 = vrot.lane.b32.xlu0 %v14488_v14, %s14303_s10  ;;  %s14318_s10 = smov 4  }
 0x250   : > { %v829_v37 = vpop.xlane.xlu0 %828 }
 0x251   : > { %v839_v38 = vsub.f32 %v606_v24, %v829_v37 }
 0x253   : > { %v843_v39 = vmul.f32 1.442695, %v839_v38 }
 0x254   : > { %v835_v40 = vpop.xlane.xlu1 %834  ;;  %v832_v41 = vpop.xlane.xlu0 %831 }
 0x255   : > { %13896 = vpow2.f32 %v843_v39  ;;  %v841_v42 = vsub.f32 %v750_v30, %v835_v40  ;;  %v840_v43 = vsub.f32 %v678_v27, %v832_v41 }
 0x257   : > { %v847_v44 = vmul.f32 1.442695, %v841_v42  ;;  %v845_v45 = vmul.f32 1.442695, %v840_v43 }
 0x258   : > { %v872_v46 = vpop.permute.xlu0 %871  ;;  %v838_v53 = vpop.xlane.xlu1 %837 }
 0x259   : > { %13898 = vpow2.f32 %v847_v44  ;;  %13167 = vmatpush3.msk.msra.mxu0 %vm876_vm3, %v872_v46  ;;  %v842_v54 = vsub.f32 %v822_v32, %v838_v53 }
 0x25a   : > { %13900 = vpow2.f32 %v845_v45  ;;  %13176 = vmatprep.subr.mxu0 %v16587_v10 }
 0x25b   : > { %v849_v55 = vmul.f32 1.442695, %v842_v54 }
 0x25c   : > { %v1104_v59 = vpop.permute.xlu1 %1103 }
 0x25d   : > { %13902 = vpow2.f32 %v849_v55 }
 0x262   : > { %v13897_v47 = vpop.eup %13896 }
 0x263   : > { %v851_v48 = vsel %vm16582_vm4, %v13897_v47, 0.0 }
 0x264   : > { %852 = vadd.xlane.f32.xlu0 %v851_v48 }
 0x266   : > { %v13899_v49 = vpop.eup %13898 }
 0x267   : > { %v13901_v50 = vpop.eup %13900  ;;  %v857_v51 = vsel %vm16582_vm4, %v13899_v49, 0.0 }
 0x268   : > { %858 = vadd.xlane.f32.xlu0 %v857_v51  ;;  %v854_v52 = vsel %vm16582_vm4, %v13901_v50, 0.0 }
 0x269   : > { %855 = vadd.xlane.f32.xlu1 %v854_v52 }
 0x26a   : > { %v13903_v56 = vpop.eup %13902 }
 0x26b   : > { %v860_v57 = vsel %vm16582_vm4, %v13903_v56, 0.0 }
 0x27a   : > { %1257 = vrot.lane.b32.xlu1 %v14496_v16, %s14304_s18 }
 0x27e   : > { %1180 = vrot.lane.b32.xlu0 %v14488_v14, %s14304_s18 }
 0x282   : > { %1331 = vrot.lane.b32.xlu0 %v14490_v15, %s14304_s18 }
 0x29e   : > { %861 = vadd.xlane.f32.xlu1 %v860_v57 }
 0x2af   : > { %1405 = vrot.lane.b32.xlu1 %v14514_v18, %s14304_s18 }
 0x2ed   : > { %v853_v58 = vpop.xlane.xlu0 %852 }
 0x2ee   : > { %13904 = vrcp.f32 %v853_v58 }
 0x2f1   : > { %v859_v60 = vpop.xlane.xlu0 %858 }
 0x2f2   : > { %13906 = vrcp.f32 %v859_v60  ;;  %v856_v61 = vpop.xlane.xlu1 %855 }
 0x2f3   : > { %13908 = vrcp.f32 %v856_v61 }
 0x2f5   : > { %v1181_v2 = vpop.permute.xlu0 %1180 }
 0x2f6   : > { %v1258_v7 = vpop.permute.xlu1 %1257 }
 0x2f9   : > { %v1332_v6 = vpop.permute.xlu0 %1331 }
 0x2fb   : > { %v13905_v62 = vpop.eup %13904 }
 0x2fc   : > { %v867_v63 = vmul.f32 %v13905_v62, %v13897_v47 }
 0x2fe   : > { %13169 = vmatmul.mubr.msk.f32.vlgmr.msra.gmra.mxu0 %vm534_vm2, %v867_v63 }
 0x2ff   : > { %v13907_v0 = vpop.eup %13906  ;;  %13177 = vmatpush3.msk.msra.mxu0 %vm876_vm3, %v1027_v36  ;;  %13178 = vmatprep.mubr.msk.f32.mxu0 %vm14302_vm1, %v16587_v10 }
 0x300   : > { %v13909_v1 = vpop.eup %13908  ;;  %13186 = vmatprep.subr.mxu0 %v16587_v10  ;;  %v869_v3 = vmul.f32 %v13907_v0, %v13899_v49 }
 0x301   : > { %v868_v4 = vmul.f32 %v13909_v1, %v13901_v50 }
 0x302   : > { %13179 = vmatmul.mubr.msk.f32.vlgmr.msra.gmra.mxu0 %vm534_vm2, %v869_v3 }
 0x303   : > { %13174 = vmatmul.mubr.msk.f32.vlgmr.msra.gmra.mxu1 %vm534_vm2, %v868_v4  ;;  %13187 = vmatpush3.xpose.msk.msra.mxu0 %vm534_vm2, %v1181_v2 }
 0x304   : > { %13182 = vmatpush3.msk.msra.mxu1 %vm876_vm3, %v1104_v59  ;;  %13188 = vmatprep.mubr.msk.f32.mxu0 %vm14302_vm1, %v16587_v10 }
 0x305   : > { %13196 = vmatprep.subr.mxu0 %v16587_v10  ;;  %13183 = vmatprep.mubr.msk.f32.mxu1 %vm14302_vm1, %v16587_v10 }
 0x306   : > { %13189 = vmatmul.mubr.msk.f32.vlgmr.msra.gmra.mxu0 %vm534_vm2, %v527_v5  ;;  %13191 = vmatprep.subr.mxu1 %v16587_v10 }
 0x307   : > { %13197 = vmatpush3.xpose.msk.msra.mxu0 %vm534_vm2, %v1332_v6  ;;  %13198 = vmatprep.mubr.msk.f32.mxu0 %vm14302_vm1, %v16587_v10 }
 0x308   : > { %13206 = vmatprep.subr.mxu0 %v16587_v10 }
 0x30a   : > { %13199 = vmatmul.mubr.msk.f32.vlgmr.msra.gmra.mxu0 %vm534_vm2, %v527_v5 }
 0x30b   : > { %13208 = vmatprep.mubr.msk.f32.mxu0 %vm14302_vm1, %v16587_v10 }
 0x327   : > { %v862_v8 = vpop.xlane.xlu1 %861 }
 0x328   : > { %13910 = vrcp.f32 %v862_v8 }
 0x32b   : > { %v1406_v12 = vpop.permute.xlu1 %1405 }
 0x335   : > { %v13911_v9 = vpop.eup %13910 }
 0x336   : > { %v870_v11 = vmul.f32 %v13911_v9, %v13903_v56 }
 0x338   : > { %13184 = vmatmul.mubr.msk.f32.vlgmr.msra.gmra.mxu1 %vm534_vm2, %v870_v11 }
 0x339   : > { %13192 = vmatpush3.xpose.msk.msra.mxu1 %vm534_vm2, %v1258_v7  ;;  %13193 = vmatprep.mubr.msk.f32.mxu1 %vm14302_vm1, %v16587_v10 }
 0x33a   : > { %13201 = vmatprep.subr.mxu1 %v16587_v10 }
 0x33c   : > { %13194 = vmatmul.mubr.msk.f32.vlgmr.msra.gmra.mxu1 %vm534_vm2, %v527_v5 }
 0x33d   : > { %13202 = vmatpush3.xpose.msk.msra.mxu1 %vm534_vm2, %v1406_v12  ;;  %13203 = vmatprep.mubr.msk.f32.mxu1 %vm14302_vm1, %v16587_v10 }
 0x33e   : > { %13211 = vmatprep.subr.mxu1 %v16587_v10 }
 0x340   : > { %13204 = vmatmul.mubr.msk.f32.vlgmr.msra.gmra.mxu1 %vm534_vm2, %v527_v5  ;;  %v528_v5 = vld [vmem:[%s16564_s1 + $0x8] sm:$0xf] }
 0x341   : > { %13213 = vmatprep.mubr.msk.f32.mxu1 %vm14302_vm1, %v16587_v10 }
 0x3be   : > { %v14601_v13 = vpop.f32.mrf.mxu0 }
 0x3c0   : > { %v13170_v17 = vpop.f32.mrf.mxu0 }
 0x3c2   : > { %v14603_v19 = vpop.f32.mrf.mxu0 }
 0x3c3   : > { %v14605_v20 = vpop.f32.mrf.mxu1 }
 0x3c4   : > { %v13180_v22 = vpop.f32.mrf.mxu0 }
 0x3c5   : > { %v13175_v24 = vpop.f32.mrf.mxu1 }
 0x3c6   : > { %v1253_v25 = vpop.f32.mrf.mxu0 }
 0x3c7   : > { %v1479_v26 = vsel %vm16582_vm4, %v1253_v25, -inf }
 0x3c8   : > { %1480 = vmax.xlane.f32.xlu0 %v1479_v26  ;;  %v13190_v27 = vpop.f32.mrf.mxu0 }
 0x3ca   : > { %v1401_v28 = vpop.f32.mrf.mxu0 }
 0x3cb   : > { %v1485_v29 = vsel %vm16582_vm4, %v1401_v28, -inf }
 0x3cc   : > { %1486 = vmax.xlane.f32.xlu0 %v1485_v29  ;;  %v13200_v30 = vpop.f32.mrf.mxu0 }
 0x3f8   : > { %v14609_v31 = vpop.f32.mrf.mxu1 }
 0x3fa   : > { %v13185_v32 = vpop.f32.mrf.mxu1 }
 0x3fc   : > { %v1327_v33 = vpop.f32.mrf.mxu1 }
 0x3fd   : > { %v1482_v34 = vsel %vm16582_vm4, %v1327_v33, -inf }
 0x3fe   : > { %1483 = vmax.xlane.f32.xlu1 %v1482_v34  ;;  %v13195_v35 = vpop.f32.mrf.mxu1 }
 0x400   : > { %v1475_v36 = vpop.f32.mrf.mxu1 }
 0x401   : > { %v1488_v37 = vsel %vm16582_vm4, %v1475_v36, -inf }
 0x402   : > { %1489 = vmax.xlane.f32.xlu0 %v1488_v37  ;;  %v13205_v38 = vpop.f32.mrf.mxu1 }
 0x40f   : > { %1600 = vrot.lane.b32.xlu1 %v14496_v16, %s14305_s21 }
 0x413   : > { %1677 = vrot.lane.b32.xlu1 %v14490_v15, %s14305_s21 }
 0x417   : > { %1754 = vrot.lane.b32.xlu1 %v14514_v18, %s14305_s21 }
 0x418   : > { %1523 = vrot.lane.b32.xlu0 %v14488_v14, %s14305_s21  ;;  %s16579_s21 = smov 24  }
 0x451   : > { %v1481_v39 = vpop.xlane.xlu0 %1480 }
 0x452   : > { %v1491_v40 = vsub.f32 %v1253_v25, %v1481_v39 }
 0x454   : > { %v1495_v41 = vmul.f32 1.442695, %v1491_v40 }
 0x455   : > { %v1487_v42 = vpop.xlane.xlu0 %1486 }
 0x456   : > { %13912 = vpow2.f32 %v1495_v41  ;;  %v1493_v43 = vsub.f32 %v1401_v28, %v1487_v42 }
 0x458   : > { %v1499_v44 = vmul.f32 1.442695, %v1493_v43 }
 0x45a   : > { %13914 = vpow2.f32 %v1499_v44 }
 0x463   : > { %v13913_v45 = vpop.eup %13912 }
 0x464   : > { %v1503_v46 = vsel %vm16582_vm4, %v13913_v45, 0.0 }
 0x465   : > { %1504 = vadd.xlane.f32.xlu0 %v1503_v46 }
 0x467   : > { %v13915_v47 = vpop.eup %13914 }
 0x468   : > { %v1509_v48 = vsel %vm16582_vm4, %v13915_v47, 0.0 }
 0x469   : > { %1510 = vadd.xlane.f32.xlu0 %v1509_v48 }
 0x47f   : > { %1831 = vrot.lane.b32.xlu0 %v14488_v14, %s14306_s17 }
 0x483   : > { %1982 = vrot.lane.b32.xlu0 %v14490_v15, %s14306_s17 }
 0x487   : > { %v1484_v49 = vpop.xlane.xlu1 %1483 }
 0x488   : > { %v1492_v50 = vsub.f32 %v1327_v33, %v1484_v49 }
 0x48a   : > { %v1497_v51 = vmul.f32 1.442695, %v1492_v50 }
 0x48b   : > { %v1601_v52 = vpop.permute.xlu1 %1600  ;;  %v1490_v53 = vpop.xlane.xlu0 %1489 }
 0x48c   : > { %13916 = vpow2.f32 %v1497_v51  ;;  %13212 = vmatpush3.msk.msra.mxu1 %vm876_vm3, %v1601_v52  ;;  %v1494_v57 = vsub.f32 %v1475_v36, %v1490_v53 }
 0x48d   : > { %13221 = vmatprep.subr.mxu1 %v16587_v10 }
 0x48e   : > { %v1501_v58 = vmul.f32 1.442695, %v1494_v57 }
 0x48f   : > { %v1524_v54 = vpop.permute.xlu0 %1523  ;;  %v1678_v1 = vpop.permute.xlu1 %1677 }
 0x490   : > { %13207 = vmatpush3.msk.msra.mxu0 %vm876_vm3, %v1524_v54  ;;  %13918 = vpow2.f32 %v1501_v58 }
 0x491   : > { %13216 = vmatprep.subr.mxu0 %v16587_v10 }
 0x493   : > { %v1755_v7 = vpop.permute.xlu1 %1754 }
 0x499   : > { %v13917_v55 = vpop.eup %13916 }
 0x49a   : > { %v1506_v56 = vsel %vm16582_vm4, %v13917_v55, 0.0 }
 0x49b   : > { %1507 = vadd.xlane.f32.xlu1 %v1506_v56 }
 0x49d   : > { %v13919_v59 = vpop.eup %13918 }
 0x49e   : > { %v1512_v60 = vsel %vm16582_vm4, %v13919_v59, 0.0 }
 0x4ac   : > { %1908 = vrot.lane.b32.xlu1 %v14496_v16, %s14306_s17 }
 0x4d0   : > { %1513 = vadd.xlane.f32.xlu1 %v1512_v60 }
 0x4e1   : > { %2056 = vrot.lane.b32.xlu1 %v14514_v18, %s14306_s17 }
 0x4ee   : > { %v1505_v61 = vpop.xlane.xlu0 %1504 }
 0x4ef   : > { %13920 = vrcp.f32 %v1505_v61 }
 0x4f2   : > { %v1511_v62 = vpop.xlane.xlu0 %1510 }
 0x4f3   : > { %13922 = vrcp.f32 %v1511_v62 }
 0x4f6   : > { %v1832_v3 = vpop.permute.xlu0 %1831 }
 0x4fa   : > { %v1983_v6 = vpop.permute.xlu0 %1982 }
 0x4fc   : > { %v13921_v63 = vpop.eup %13920 }
 0x4fd   : > { %v1519_v0 = vmul.f32 %v13921_v63, %v13913_v45 }
 0x4ff   : > { %13209 = vmatmul.mubr.msk.f32.vlgmr.msra.gmra.mxu0 %vm534_vm2, %v1519_v0 }
 0x500   : > { %v13923_v2 = vpop.eup %13922  ;;  %13217 = vmatpush3.msk.msra.mxu0 %vm876_vm3, %v1678_v1  ;;  %13218 = vmatprep.mubr.msk.f32.mxu0 %vm14302_vm1, %v16587_v10 }
 0x501   : > { %13226 = vmatprep.subr.mxu0 %v16587_v10  ;;  %v1521_v4 = vmul.f32 %v13923_v2, %v13915_v47 }
 0x503   : > { %13219 = vmatmul.mubr.msk.f32.vlgmr.msra.gmra.mxu0 %vm534_vm2, %v1521_v4 }
 0x504   : > { %13227 = vmatpush3.xpose.msk.msra.mxu0 %vm534_vm2, %v1832_v3  ;;  %13228 = vmatprep.mubr.msk.f32.mxu0 %vm14302_vm1, %v16587_v10 }
 0x505   : > { %13236 = vmatprep.subr.mxu0 %v16587_v10 }
 0x507   : > { %13229 = vmatmul.mubr.msk.f32.vlgmr.msra.gmra.mxu0 %vm534_vm2, %v528_v5 }
 0x508   : > { %13237 = vmatpush3.xpose.msk.msra.mxu0 %vm534_vm2, %v1983_v6  ;;  %13238 = vmatprep.mubr.msk.f32.mxu0 %vm14302_vm1, %v16587_v10 }
 0x509   : > { %13246 = vmatprep.subr.mxu0 %v16587_v10 }
 0x50b   : > { %13239 = vmatmul.mubr.msk.f32.vlgmr.msra.gmra.mxu0 %vm534_vm2, %v528_v5 }
 0x50c   : > { %13248 = vmatprep.mubr.msk.f32.mxu0 %vm14302_vm1, %v16587_v10 }
 0x524   : > { %v1508_v8 = vpop.xlane.xlu1 %1507 }
 0x525   : > { %13924 = vrcp.f32 %v1508_v8 }
 0x528   : > { %v1909_v12 = vpop.permute.xlu1 %1908 }
 0x532   : > { %v13925_v9 = vpop.eup %13924 }
 0x533   : > { %v1520_v11 = vmul.f32 %v13925_v9, %v13917_v55 }
 0x535   : > { %13214 = vmatmul.mubr.msk.f32.vlgmr.msra.gmra.mxu1 %vm534_vm2, %v1520_v11 }
 0x536   : > { %13222 = vmatpush3.msk.msra.mxu1 %vm876_vm3, %v1755_v7  ;;  %13223 = vmatprep.mubr.msk.f32.mxu1 %vm14302_vm1, %v16587_v10 }
 0x537   : > { %13231 = vmatprep.subr.mxu1 %v16587_v10 }
 0x559   : > { %v1514_v17 = vpop.xlane.xlu1 %1513 }
 0x55a   : > { %13926 = vrcp.f32 %v1514_v17 }
 0x55d   : > { %v2057_v25 = vpop.permute.xlu1 %2056 }
 0x567   : > { %v13927_v22 = vpop.eup %13926 }
 0x568   : > { %v1522_v24 = vmul.f32 %v13927_v22, %v13919_v59  ;;  %v529_v22 = vld [vmem:[%s16564_s1 + $0xc] sm:$0xf] }
 0x56a   : > { %13224 = vmatmul.mubr.msk.f32.vlgmr.msra.gmra.mxu1 %vm534_vm2, %v1522_v24 }
 0x56b   : > { %13232 = vmatpush3.xpose.msk.msra.mxu1 %vm534_vm2, %v1909_v12  ;;  %13233 = vmatprep.mubr.msk.f32.mxu1 %vm14302_vm1, %v16587_v10 }
 0x56c   : > { %13241 = vmatprep.subr.mxu1 %v16587_v10 }
 0x56e   : > { %13234 = vmatmul.mubr.msk.f32.vlgmr.msra.gmra.mxu1 %vm534_vm2, %v528_v5 }
 0x56f   : > { %13242 = vmatpush3.xpose.msk.msra.mxu1 %vm534_vm2, %v2057_v25  ;;  %13243 = vmatprep.mubr.msk.f32.mxu1 %vm14302_vm1, %v16587_v10 }
 0x570   : > { %13251 = vmatprep.subr.mxu1 %v16587_v10 }
 0x572   : > { %13244 = vmatmul.mubr.msk.f32.vlgmr.msra.gmra.mxu1 %vm534_vm2, %v528_v5 }
 0x573   : > { %13253 = vmatprep.mubr.msk.f32.mxu1 %vm14302_vm1, %v16587_v10 }
 0x5bf   : > { %v14672_v26 = vpop.f32.mrf.mxu0 }
 0x5c1   : > { %v13210_v27 = vpop.f32.mrf.mxu0 }
 0x5c3   : > { %v14674_v28 = vpop.f32.mrf.mxu0 }
 0x5c5   : > { %v13220_v29 = vpop.f32.mrf.mxu0 }
 0x5c7   : > { %v1904_v30 = vpop.f32.mrf.mxu0 }
 0x5c8   : > { %v2130_v32 = vsel %vm16582_vm4, %v1904_v30, -inf }
 0x5c9   : > { %2131 = vmax.xlane.f32.xlu0 %v2130_v32  ;;  %v13230_v33 = vpop.f32.mrf.mxu0 }
 0x5cb   : > { %v2052_v34 = vpop.f32.mrf.mxu0 }
 0x5cc   : > { %v2136_v35 = vsel %vm16582_vm4, %v2052_v34, -inf }
 0x5cd   : > { %2137 = vmax.xlane.f32.xlu0 %v2136_v35  ;;  %v13240_v36 = vpop.f32.mrf.mxu0 }
 0x5f5   : > { %v14678_v37 = vpop.f32.mrf.mxu1 }
 0x5f7   : > { %v13215_v38 = vpop.f32.mrf.mxu1 }
 0x62a   : > { %v14680_v39 = vpop.f32.mrf.mxu1 }
 0x62c   : > { %v13225_v40 = vpop.f32.mrf.mxu1 }
 0x62e   : > { %v1978_v41 = vpop.f32.mrf.mxu1 }
 0x62f   : > { %v2133_v42 = vsel %vm16582_vm4, %v1978_v41, -inf }
 0x630   : > { %2134 = vmax.xlane.f32.xlu1 %v2133_v42  ;;  %v13235_v43 = vpop.f32.mrf.mxu1 }
 0x632   : > { %v2126_v44 = vpop.f32.mrf.mxu1 }
 0x633   : > { %v2139_v45 = vsel %vm16582_vm4, %v2126_v44, -inf }
 0x634   : > { %2140 = vmax.xlane.f32.xlu0 %v2139_v45  ;;  %v13245_v46 = vpop.f32.mrf.mxu1 }
 0x641   : > { %2251 = vrot.lane.b32.xlu1 %v14496_v16, %s14307_s25 }
 0x645   : > { %2328 = vrot.lane.b32.xlu1 %v14490_v15, %s14307_s25 }
 0x649   : > { %2405 = vrot.lane.b32.xlu1 %v14514_v18, %s14307_s25 }
 0x64a   : > { %2174 = vrot.lane.b32.xlu0 %v14488_v14, %s14307_s25  ;;  %s16573_s25 = smov 100  }
 0x652   : > { %v2132_v47 = vpop.xlane.xlu0 %2131 }
 0x653   : > { %v2142_v48 = vsub.f32 %v1904_v30, %v2132_v47 }
 0x655   : > { %v2146_v49 = vmul.f32 1.442695, %v2142_v48 }
 0x656   : > { %v2138_v50 = vpop.xlane.xlu0 %2137 }
 0x657   : > { %13928 = vpow2.f32 %v2146_v49  ;;  %v2144_v51 = vsub.f32 %v2052_v34, %v2138_v50 }
 0x659   : > { %v2150_v52 = vmul.f32 1.442695, %v2144_v51 }
 0x65b   : > { %13930 = vpow2.f32 %v2150_v52 }
 0x664   : > { %v13929_v53 = vpop.eup %13928 }
 0x665   : > { %v2154_v54 = vsel %vm16582_vm4, %v13929_v53, 0.0 }
 0x668   : > { %v13931_v55 = vpop.eup %13930 }
 0x669   : > { %2155 = vadd.xlane.f32.xlu0 %v2154_v54  ;;  %v2160_v56 = vsel %vm16582_vm4, %v13931_v55, 0.0 }
 0x66d   : > { %2161 = vadd.xlane.f32.xlu0 %v2160_v56 }
 0x683   : > { %2482 = vrot.lane.b32.xlu0 %v14488_v14, %s14308_s26 }
 0x687   : > { %2633 = vrot.lane.b32.xlu0 %v14490_v15, %s14308_s26 }
 0x6b9   : > { %v2135_v57 = vpop.xlane.xlu1 %2134 }
 0x6ba   : > { %v2143_v58 = vsub.f32 %v1978_v41, %v2135_v57 }
 0x6bc   : > { %v2148_v59 = vmul.f32 1.442695, %v2143_v58 }
 0x6bd   : > { %v2252_v60 = vpop.permute.xlu1 %2251  ;;  %v2141_v61 = vpop.xlane.xlu0 %2140 }
 0x6be   : > { %13932 = vpow2.f32 %v2148_v59  ;;  %13252 = vmatpush3.msk.msra.mxu1 %vm876_vm3, %v2252_v60  ;;  %v2145_v1 = vsub.f32 %v2126_v44, %v2141_v61 }
 0x6bf   : > { %13261 = vmatprep.subr.mxu1 %v16587_v10 }
 0x6c0   : > { %v2152_v2 = vmul.f32 1.442695, %v2145_v1 }
 0x6c1   : > { %v2175_v62 = vpop.permute.xlu0 %2174  ;;  %v2329_v9 = vpop.permute.xlu1 %2328 }
 0x6c2   : > { %13247 = vmatpush3.msk.msra.mxu0 %vm876_vm3, %v2175_v62  ;;  %13934 = vpow2.f32 %v2152_v2 }
 0x6c3   : > { %13256 = vmatprep.subr.mxu0 %v16587_v10 }
 0x6c5   : > { %v2406_v25 = vpop.permute.xlu1 %2405 }
 0x6cb   : > { %v13933_v63 = vpop.eup %13932 }
 0x6cc   : > { %v2157_v0 = vsel %vm16582_vm4, %v13933_v63, 0.0 }
 0x6cd   : > { %2158 = vadd.xlane.f32.xlu1 %v2157_v0 }
 0x6cf   : > { %v13935_v5 = vpop.eup %13934 }
 0x6d0   : > { %v2163_v7 = vsel %vm16582_vm4, %v13935_v5, 0.0 }
 0x6de   : > { %2559 = vrot.lane.b32.xlu1 %v14496_v16, %s14308_s26 }
 0x6f2   : > { %v2156_v3 = vpop.xlane.xlu0 %2155 }
 0x6f3   : > { %13936 = vrcp.f32 %v2156_v3 }
 0x6f6   : > { %v2162_v4 = vpop.xlane.xlu0 %2161 }
 0x6f7   : > { %13938 = vrcp.f32 %v2162_v4 }
 0x6fa   : > { %v2483_v12 = vpop.permute.xlu0 %2482 }
 0x6fe   : > { %v2634_v24 = vpop.permute.xlu0 %2633 }
 0x700   : > { %v13937_v6 = vpop.eup %13936 }
 0x701   : > { %v2170_v8 = vmul.f32 %v13937_v6, %v13929_v53 }
 0x702   : > { %2164 = vadd.xlane.f32.xlu1 %v2163_v7 }
 0x703   : > { %13249 = vmatmul.mubr.msk.f32.vlgmr.msra.gmra.mxu0 %vm534_vm2, %v2170_v8 }
 0x704   : > { %v13939_v11 = vpop.eup %13938  ;;  %13257 = vmatpush3.msk.msra.mxu0 %vm876_vm3, %v2329_v9  ;;  %13258 = vmatprep.mubr.msk.f32.mxu0 %vm14302_vm1, %v16587_v10 }
 0x705   : > { %13266 = vmatprep.subr.mxu0 %v16587_v10  ;;  %v2172_v17 = vmul.f32 %v13939_v11, %v13931_v55 }
 0x707   : > { %13259 = vmatmul.mubr.msk.f32.vlgmr.msra.gmra.mxu0 %vm534_vm2, %v2172_v17 }
 0x708   : > { %13267 = vmatpush3.xpose.msk.msra.mxu0 %vm534_vm2, %v2483_v12  ;;  %13268 = vmatprep.mubr.msk.f32.mxu0 %vm14302_vm1, %v16587_v10 }
 0x709   : > { %13276 = vmatprep.subr.mxu0 %v16587_v10 }
 0x70b   : > { %13269 = vmatmul.mubr.msk.f32.vlgmr.msra.gmra.mxu0 %vm534_vm2, %v529_v22 }
 0x70c   : > { %13277 = vmatpush3.xpose.msk.msra.mxu0 %vm534_vm2, %v2634_v24  ;;  %13278 = vmatprep.mubr.msk.f32.mxu0 %vm14302_vm1, %v16587_v10 }
 0x70d   : > { %13286 = vmatprep.subr.mxu0 %v16587_v10 }
 0x70f   : > { %13279 = vmatmul.mubr.msk.f32.vlgmr.msra.gmra.mxu0 %vm534_vm2, %v529_v22 }
 0x710   : > { %13288 = vmatprep.mubr.msk.f32.mxu0 %vm14302_vm1, %v16587_v10 }
 0x713   : > { %2707 = vrot.lane.b32.xlu1 %v14514_v18, %s14308_s26 }
 0x756   : > { %v2159_v27 = vpop.xlane.xlu1 %2158 }
 0x757   : > { %13940 = vrcp.f32 %v2159_v27 }
 0x75a   : > { %v2560_v32 = vpop.permute.xlu1 %2559 }
 0x764   : > { %v13941_v29 = vpop.eup %13940 }
 0x765   : > { %v2171_v30 = vmul.f32 %v13941_v29, %v13933_v63 }
 0x767   : > { %13254 = vmatmul.mubr.msk.f32.vlgmr.msra.gmra.mxu1 %vm534_vm2, %v2171_v30 }
 0x768   : > { %13262 = vmatpush3.msk.msra.mxu1 %vm876_vm3, %v2406_v25  ;;  %13263 = vmatprep.mubr.msk.f32.mxu1 %vm14302_vm1, %v16587_v10 }
 0x769   : > { %13271 = vmatprep.subr.mxu1 %v16587_v10 }
 0x78b   : > { %v2165_v33 = vpop.xlane.xlu1 %2164 }
 0x78c   : > { %13942 = vrcp.f32 %v2165_v33 }
 0x78f   : > { %v2708_v36 = vpop.permute.xlu1 %2707 }
 0x799   : > { %v13943_v34 = vpop.eup %13942 }
 0x79a   : > { %v2173_v35 = vmul.f32 %v13943_v34, %v13935_v5 }
 0x79c   : > { %13264 = vmatmul.mubr.msk.f32.vlgmr.msra.gmra.mxu1 %vm534_vm2, %v2173_v35 }
 0x79d   : > { %13272 = vmatpush3.xpose.msk.msra.mxu1 %vm534_vm2, %v2560_v32  ;;  %13273 = vmatprep.mubr.msk.f32.mxu1 %vm14302_vm1, %v16587_v10 }
 0x79e   : > { %13281 = vmatprep.subr.mxu1 %v16587_v10 }
 0x7a0   : > { %13274 = vmatmul.mubr.msk.f32.vlgmr.msra.gmra.mxu1 %vm534_vm2, %v529_v22 }
 0x7a1   : > { %13282 = vmatpush3.xpose.msk.msra.mxu1 %vm534_vm2, %v2708_v36  ;;  %13283 = vmatprep.mubr.msk.f32.mxu1 %vm14302_vm1, %v16587_v10 }
 0x7a2   : > { %13291 = vmatprep.subr.mxu1 %v16587_v10 }
 0x7a4   : > { %13284 = vmatmul.mubr.msk.f32.vlgmr.msra.gmra.mxu1 %vm534_vm2, %v529_v22 }
 0x7a5   : > { %13293 = vmatprep.mubr.msk.f32.mxu1 %vm14302_vm1, %v16587_v10 }
 0x7c3   : > { %v14743_v38 = vpop.f32.mrf.mxu0 }
 0x7c5   : > { %v13250_v40 = vpop.f32.mrf.mxu0 }
 0x7c7   : > { %v14745_v41 = vpop.f32.mrf.mxu0 }
 0x7c9   : > { %v13260_v42 = vpop.f32.mrf.mxu0 }
 0x7ca   : > { %v14785_v42 = vld [vmem:[%s16564_s1 + $0x10] sm:$0xf] }
 0x7cb   : > { %v2555_v43 = vpop.f32.mrf.mxu0 }
 0x7cc   : > { %v2781_v44 = vsel %vm16582_vm4, %v2555_v43, -inf }
 0x7cd   : > { %2782 = vmax.xlane.f32.xlu0 %v2781_v44  ;;  %v13270_v45 = vpop.f32.mrf.mxu0 }
 0x7cf   : > { %v2703_v46 = vpop.f32.mrf.mxu0 }
 0x7d0   : > { %v2787_v47 = vsel %vm16582_vm4, %v2703_v46, -inf }
 0x7d1   : > { %2788 = vmax.xlane.f32.xlu0 %v2787_v47  ;;  %v13280_v48 = vpop.f32.mrf.mxu0 }
 0x827   : > { %v14749_v49 = vpop.f32.mrf.mxu1 }
 0x829   : > { %v13255_v50 = vpop.f32.mrf.mxu1 }
 0x856   : > { %v2783_v59 = vpop.xlane.xlu0 %2782 }
 0x857   : > { %v2793_v60 = vsub.f32 %v2555_v43, %v2783_v59 }
 0x859   : > { %v2797_v62 = vmul.f32 1.442695, %v2793_v60 }
 0x85a   : > { %v2789_v61 = vpop.xlane.xlu0 %2788 }
 0x85b   : > { %v2795_v63 = vsub.f32 %v2703_v46, %v2789_v61  ;;  %13944 = vpow2.f32 %v2797_v62 }
 0x85c   : > { %v14751_v51 = vpop.f32.mrf.mxu1 }
 0x85d   : > { %v2801_v0 = vmul.f32 1.442695, %v2795_v63 }
 0x85e   : > { %v13265_v52 = vpop.f32.mrf.mxu1 }
 0x85f   : > { %13946 = vpow2.f32 %v2801_v0 }
 0x860   : > { %v2629_v53 = vpop.f32.mrf.mxu1 }
 0x861   : > { %v2784_v54 = vsel %vm16582_vm4, %v2629_v53, -inf }
 0x862   : > { %2785 = vmax.xlane.f32.xlu1 %v2784_v54  ;;  %v13275_v55 = vpop.f32.mrf.mxu1 }
 0x864   : > { %v2777_v56 = vpop.f32.mrf.mxu1 }
 0x865   : > { %v2790_v57 = vsel %vm16582_vm4, %v2777_v56, -inf }
 0x866   : > { %2791 = vmax.xlane.f32.xlu0 %v2790_v57  ;;  %v13285_v58 = vpop.f32.mrf.mxu1 }
 0x868   : > { %v13945_v1 = vpop.eup %13944 }
 0x869   : > { %v2805_v2 = vsel %vm16582_vm4, %v13945_v1, 0.0 }
 0x86c   : > { %v13947_v3 = vpop.eup %13946 }
 0x86d   : > { %v2811_v4 = vsel %vm16582_vm4, %v13947_v3, 0.0 }
 0x873   : > { %2902 = vrot.lane.b32.xlu1 %v14496_v16, %s14309_s13 }
 0x877   : > { %2979 = vrot.lane.b32.xlu1 %v14490_v15, %s14309_s13 }
 0x87b   : > { %3056 = vrot.lane.b32.xlu1 %v14514_v18, %s14309_s13 }
 0x87c   : > { %2825 = vrot.lane.b32.xlu0 %v14488_v14, %s14309_s13  ;;  %s16575_s13 = smov 104  }
 0x89b   : > { %2806 = vadd.xlane.f32.xlu0 %v2805_v2 }
 0x89f   : > { %2812 = vadd.xlane.f32.xlu0 %v2811_v4 }
 0x8b5   : > { %3133 = vrot.lane.b32.xlu0 %v14488_v14, %s14310_s19 }
 0x8b9   : > { %3284 = vrot.lane.b32.xlu0 %v14490_v15, %s14310_s19 }
 0x8eb   : > { %v2786_v5 = vpop.xlane.xlu1 %2785 }
 0x8ec   : > { %v2794_v6 = vsub.f32 %v2629_v53, %v2786_v5 }
 0x8ee   : > { %v2799_v7 = vmul.f32 1.442695, %v2794_v6 }
 0x8ef   : > { %v2903_v8 = vpop.permute.xlu1 %2902  ;;  %v2792_v9 = vpop.xlane.xlu0 %2791 }
 0x8f0   : > { %13948 = vpow2.f32 %v2799_v7  ;;  %13292 = vmatpush3.msk.msra.mxu1 %vm876_vm3, %v2903_v8  ;;  %v2796_v22 = vsub.f32 %v2777_v56, %v2792_v9 }
 0x8f1   : > { %13301 = vmatprep.subr.mxu1 %v16587_v10 }
 0x8f2   : > { %v2803_v24 = vmul.f32 1.442695, %v2796_v22 }
 0x8f3   : > { %v2826_v11 = vpop.permute.xlu0 %2825  ;;  %v2980_v34 = vpop.permute.xlu1 %2979 }
 0x8f4   : > { %13287 = vmatpush3.msk.msra.mxu0 %vm876_vm3, %v2826_v11  ;;  %13950 = vpow2.f32 %v2803_v24 }
 0x8f5   : > { %13296 = vmatprep.subr.mxu0 %v16587_v10 }
 0x8f7   : > { %v3057_v44 = vpop.permute.xlu1 %3056 }
 0x8fd   : > { %v13949_v12 = vpop.eup %13948 }
 0x8fe   : > { %v2808_v17 = vsel %vm16582_vm4, %v13949_v12, 0.0 }
 0x8ff   : > { %2809 = vadd.xlane.f32.xlu1 %v2808_v17 }
 0x901   : > { %v13951_v29 = vpop.eup %13950 }
 0x902   : > { %v2814_v32 = vsel %vm16582_vm4, %v13951_v29, 0.0 }
 0x910   : > { %3210 = vrot.lane.b32.xlu1 %v14496_v16, %s14310_s19 }
 0x924   : > { %v2807_v25 = vpop.xlane.xlu0 %2806 }
 0x925   : > { %13952 = vrcp.f32 %v2807_v25 }
 0x928   : > { %v2813_v27 = vpop.xlane.xlu0 %2812 }
 0x929   : > { %13954 = vrcp.f32 %v2813_v27 }
 0x92c   : > { %v3134_v36 = vpop.permute.xlu0 %3133 }
 0x930   : > { %v3285_v43 = vpop.permute.xlu0 %3284 }
 0x932   : > { %v13953_v30 = vpop.eup %13952 }
 0x933   : > { %v2821_v33 = vmul.f32 %v13953_v30, %v13945_v1 }
 0x934   : > { %2815 = vadd.xlane.f32.xlu1 %v2814_v32 }
 0x935   : > { %13289 = vmatmul.mubr.msk.f32.vlgmr.msra.gmra.mxu0 %vm534_vm2, %v2821_v33 }
 0x936   : > { %v13955_v35 = vpop.eup %13954  ;;  %13297 = vmatpush3.msk.msra.mxu0 %vm876_vm3, %v2980_v34  ;;  %13298 = vmatprep.mubr.msk.f32.mxu0 %vm14302_vm1, %v16587_v10 }
 0x937   : > { %13306 = vmatprep.subr.mxu0 %v16587_v10  ;;  %v2823_v40 = vmul.f32 %v13955_v35, %v13947_v3 }
 0x939   : > { %13299 = vmatmul.mubr.msk.f32.vlgmr.msra.gmra.mxu0 %vm534_vm2, %v2823_v40 }
 0x93a   : > { %13307 = vmatpush3.xpose.msk.msra.mxu0 %vm534_vm2, %v3134_v36  ;;  %13308 = vmatprep.mubr.msk.f32.mxu0 %vm14302_vm1, %v16587_v10 }
 0x93b   : > { %13316 = vmatprep.subr.mxu0 %v16587_v10 }
 0x93d   : > { %13309 = vmatmul.mubr.msk.f32.vlgmr.msra.gmra.mxu0 %vm534_vm2, %v14785_v42 }
 0x93e   : > { %13317 = vmatpush3.xpose.msk.msra.mxu0 %vm534_vm2, %v3285_v43  ;;  %13318 = vmatprep.mubr.msk.f32.mxu0 %vm14302_vm1, %v16587_v10 }
 0x93f   : > { %13326 = vmatprep.subr.mxu0 %v16587_v10 }
 0x941   : > { %13319 = vmatmul.mubr.msk.f32.vlgmr.msra.gmra.mxu0 %vm534_vm2, %v14785_v42 }
 0x942   : > { %13328 = vmatprep.mubr.msk.f32.mxu0 %vm14302_vm1, %v16587_v10 }
 0x945   : > { %3358 = vrot.lane.b32.xlu1 %v14514_v18, %s14310_s19 }
 0x988   : > { %v2810_v45 = vpop.xlane.xlu1 %2809 }
 0x989   : > { %13956 = vrcp.f32 %v2810_v45 }
 0x98c   : > { %v3211_v48 = vpop.permute.xlu1 %3210 }
 0x996   : > { %v13957_v46 = vpop.eup %13956 }
 0x997   : > { %v2822_v47 = vmul.f32 %v13957_v46, %v13949_v12 }
 0x999   : > { %13294 = vmatmul.mubr.msk.f32.vlgmr.msra.gmra.mxu1 %vm534_vm2, %v2822_v47 }
 0x99a   : > { %13302 = vmatpush3.msk.msra.mxu1 %vm876_vm3, %v3057_v44  ;;  %13303 = vmatprep.mubr.msk.f32.mxu1 %vm14302_vm1, %v16587_v10 }
 0x99b   : > { %13311 = vmatprep.subr.mxu1 %v16587_v10 }
 0x9bd   : > { %v2816_v50 = vpop.xlane.xlu1 %2815 }
 0x9be   : > { %13958 = vrcp.f32 %v2816_v50 }
 0x9c1   : > { %v3359_v54 = vpop.permute.xlu1 %3358 }
 0x9cb   : > { %v13959_v52 = vpop.eup %13958 }
 0x9cc   : > { %v2824_v53 = vmul.f32 %v13959_v52, %v13951_v29 }
 0x9ce   : > { %13304 = vmatmul.mubr.msk.f32.vlgmr.msra.gmra.mxu1 %vm534_vm2, %v2824_v53 }
 0x9cf   : > { %13312 = vmatpush3.xpose.msk.msra.mxu1 %vm534_vm2, %v3211_v48  ;;  %13313 = vmatprep.mubr.msk.f32.mxu1 %vm14302_vm1, %v16587_v10 }
 0x9d0   : > { %13321 = vmatprep.subr.mxu1 %v16587_v10 }
 0x9d2   : > { %13314 = vmatmul.mubr.msk.f32.vlgmr.msra.gmra.mxu1 %vm534_vm2, %v14785_v42 }
 0x9d3   : > { %13322 = vmatpush3.xpose.msk.msra.mxu1 %vm534_vm2, %v3359_v54  ;;  %13323 = vmatprep.mubr.msk.f32.mxu1 %vm14302_vm1, %v16587_v10 }
 0x9d4   : > { %13331 = vmatprep.subr.mxu1 %v16587_v10 }
 0x9d6   : > { %13324 = vmatmul.mubr.msk.f32.vlgmr.msra.gmra.mxu1 %vm534_vm2, %v14785_v42 }
 0x9d7   : > { %13333 = vmatprep.mubr.msk.f32.mxu1 %vm14302_vm1, %v16587_v10 }
 0x9f5   : > { %v14820_v55 = vpop.f32.mrf.mxu0 }
 0x9f7   : > { %v13290_v56 = vpop.f32.mrf.mxu0 }
 0x9f9   : > { %v14822_v57 = vpop.f32.mrf.mxu0 }
 0x9fb   : > { %v13300_v58 = vpop.f32.mrf.mxu0 }
 0x9fd   : > { %v3206_v59 = vpop.f32.mrf.mxu0 }
 0x9fe   : > { %v3432_v60 = vsel %vm16582_vm4, %v3206_v59, -inf }
 0x9ff   : > { %3433 = vmax.xlane.f32.xlu0 %v3432_v60  ;;  %v13310_v61 = vpop.f32.mrf.mxu0 }
 0xa01   : > { %v3354_v62 = vpop.f32.mrf.mxu0 }
 0xa02   : > { %v3438_v63 = vsel %vm16582_vm4, %v3354_v62, -inf }
 0xa03   : > { %3439 = vmax.xlane.f32.xlu0 %v3438_v63  ;;  %v13320_v0 = vpop.f32.mrf.mxu0  ;;  %v14862_v63 = vld [vmem:[%s16564_s1 + $0x14] sm:$0xf] }
 0xa59   : > { %v14826_v1 = vpop.f32.mrf.mxu1 }
 0xa5b   : > { %v13295_v2 = vpop.f32.mrf.mxu1 }
 0xa88   : > { %v3434_v12 = vpop.xlane.xlu0 %3433 }
 0xa89   : > { %v3444_v17 = vsub.f32 %v3206_v59, %v3434_v12 }
 0xa8b   : > { %v3448_v24 = vmul.f32 1.442695, %v3444_v17 }
 0xa8c   : > { %v3440_v22 = vpop.xlane.xlu0 %3439 }
 0xa8d   : > { %v3446_v25 = vsub.f32 %v3354_v62, %v3440_v22  ;;  %13960 = vpow2.f32 %v3448_v24 }
 0xa8e   : > { %v14828_v3 = vpop.f32.mrf.mxu1 }
 0xa8f   : > { %v3452_v27 = vmul.f32 1.442695, %v3446_v25 }
 0xa90   : > { %v13305_v4 = vpop.f32.mrf.mxu1 }
 0xa91   : > { %13962 = vpow2.f32 %v3452_v27 }
 0xa92   : > { %v3280_v5 = vpop.f32.mrf.mxu1 }
 0xa93   : > { %v3435_v6 = vsel %vm16582_vm4, %v3280_v5, -inf }
 0xa94   : > { %3436 = vmax.xlane.f32.xlu1 %v3435_v6  ;;  %v13315_v7 = vpop.f32.mrf.mxu1 }
 0xa96   : > { %v3428_v8 = vpop.f32.mrf.mxu1 }
 0xa97   : > { %v3441_v9 = vsel %vm16582_vm4, %v3428_v8, -inf }
 0xa98   : > { %3442 = vmax.xlane.f32.xlu0 %v3441_v9  ;;  %v13325_v11 = vpop.f32.mrf.mxu1 }
 0xa9a   : > { %v13961_v29 = vpop.eup %13960 }
 0xa9b   : > { %v3456_v30 = vsel %vm16582_vm4, %v13961_v29, 0.0 }
 0xa9e   : > { %v13963_v32 = vpop.eup %13962 }
 0xa9f   : > { %v3462_v33 = vsel %vm16582_vm4, %v13963_v32, 0.0 }
 0xaa5   : > { %3553 = vrot.lane.b32.xlu1 %v14496_v16, %s14311_s23 }
 0xaa9   : > { %3630 = vrot.lane.b32.xlu1 %v14490_v15, %s14311_s23 }
 0xaad   : > { %3707 = vrot.lane.b32.xlu1 %v14514_v18, %s14311_s23 }
 0xaae   : > { %3476 = vrot.lane.b32.xlu0 %v14488_v14, %s14311_s23  ;;  %s14315_s23 = smov 72  }
 0xacd   : > { %3457 = vadd.xlane.f32.xlu0 %v3456_v30 }
 0xad1   : > { %3463 = vadd.xlane.f32.xlu0 %v3462_v33 }
 0xae7   : > { %3784 = vrot.lane.b32.xlu0 %v14488_v14, %s16577_s24 }
 0xaeb   : > { %3935 = vrot.lane.b32.xlu0 %v14490_v15, %s16577_s24 }
 0xb1d   : > { %v3437_v34 = vpop.xlane.xlu1 %3436 }
 0xb1e   : > { %v3445_v35 = vsub.f32 %v3280_v5, %v3437_v34 }
 0xb20   : > { %v3450_v36 = vmul.f32 1.442695, %v3445_v35 }
 0xb21   : > { %v3554_v40 = vpop.permute.xlu1 %3553  ;;  %v3443_v43 = vpop.xlane.xlu0 %3442 }
 0xb22   : > { %13964 = vpow2.f32 %v3450_v36  ;;  %13332 = vmatpush3.msk.msra.mxu1 %vm876_vm3, %v3554_v40  ;;  %v3447_v47 = vsub.f32 %v3428_v8, %v3443_v43 }
 0xb23   : > { %13341 = vmatprep.subr.mxu1 %v16587_v10 }
 0xb24   : > { %v3454_v48 = vmul.f32 1.442695, %v3447_v47 }
 0xb25   : > { %v3477_v44 = vpop.permute.xlu0 %3476  ;;  %v3631_v59 = vpop.permute.xlu1 %3630 }
 0xb26   : > { %13327 = vmatpush3.msk.msra.mxu0 %vm876_vm3, %v3477_v44  ;;  %13966 = vpow2.f32 %v3454_v48 }
 0xb27   : > { %13336 = vmatprep.subr.mxu0 %v16587_v10 }
 0xb29   : > { %v3708_v2 = vpop.permute.xlu1 %3707 }
 0xb2f   : > { %v13965_v45 = vpop.eup %13964 }
 0xb30   : > { %v3459_v46 = vsel %vm16582_vm4, %v13965_v45, 0.0 }
 0xb31   : > { %3460 = vadd.xlane.f32.xlu1 %v3459_v46 }
 0xb33   : > { %v13967_v53 = vpop.eup %13966 }
 0xb34   : > { %v3465_v56 = vsel %vm16582_vm4, %v13967_v53, 0.0 }
 0xb42   : > { %3861 = vrot.lane.b32.xlu1 %v14496_v16, %s16577_s24 }
 0xb56   : > { %v3458_v50 = vpop.xlane.xlu0 %3457 }
 0xb57   : > { %13968 = vrcp.f32 %v3458_v50 }
 0xb5a   : > { %v3464_v52 = vpop.xlane.xlu0 %3463 }
 0xb5b   : > { %13970 = vrcp.f32 %v3464_v52 }
 0xb5e   : > { %v3785_v61 = vpop.permute.xlu0 %3784 }
 0xb62   : > { %v3936_v0 = vpop.permute.xlu0 %3935 }
 0xb64   : > { %v13969_v54 = vpop.eup %13968 }
 0xb65   : > { %v3472_v58 = vmul.f32 %v13969_v54, %v13961_v29 }
 0xb66   : > { %3466 = vadd.xlane.f32.xlu1 %v3465_v56 }
 0xb67   : > { %13329 = vmatmul.mubr.msk.f32.vlgmr.msra.gmra.mxu0 %vm534_vm2, %v3472_v58 }
 0xb68   : > { %v13971_v60 = vpop.eup %13970  ;;  %13337 = vmatpush3.msk.msra.mxu0 %vm876_vm3, %v3631_v59  ;;  %13338 = vmatprep.mubr.msk.f32.mxu0 %vm14302_vm1, %v16587_v10 }
 0xb69   : > { %13346 = vmatprep.subr.mxu0 %v16587_v10  ;;  %v3474_v62 = vmul.f32 %v13971_v60, %v13963_v32 }
 0xb6b   : > { %13339 = vmatmul.mubr.msk.f32.vlgmr.msra.gmra.mxu0 %vm534_vm2, %v3474_v62 }
 0xb6c   : > { %13347 = vmatpush3.xpose.msk.msra.mxu0 %vm534_vm2, %v3785_v61  ;;  %13348 = vmatprep.mubr.msk.f32.mxu0 %vm14302_vm1, %v16587_v10 }
 0xb6d   : > { %13356 = vmatprep.subr.mxu0 %v16587_v10 }
 0xb6f   : > { %13349 = vmatmul.mubr.msk.f32.vlgmr.msra.gmra.mxu0 %vm534_vm2, %v14862_v63 }
 0xb70   : > { %13357 = vmatpush3.xpose.msk.msra.mxu0 %vm534_vm2, %v3936_v0  ;;  %13358 = vmatprep.mubr.msk.f32.mxu0 %vm14302_vm1, %v16587_v10 }
 0xb71   : > { %13366 = vmatprep.subr.mxu0 %v16587_v10 }
 0xb73   : > { %13359 = vmatmul.mubr.msk.f32.vlgmr.msra.gmra.mxu0 %vm534_vm2, %v14862_v63 }
 0xb74   : > { %13368 = vmatprep.mubr.msk.f32.mxu0 %vm14302_vm1, %v16587_v10 }
 0xb77   : > { %4009 = vrot.lane.b32.xlu1 %v14514_v18, %s16577_s24  ;;  %s14320_s24 = smov 12  }
 0xbba   : > { %v3461_v4 = vpop.xlane.xlu1 %3460 }
 0xbbb   : > { %13972 = vrcp.f32 %v3461_v4 }
 0xbbe   : > { %v3862_v7 = vpop.permute.xlu1 %3861 }
 0xbc8   : > { %v13973_v5 = vpop.eup %13972 }
 0xbc9   : > { %v3473_v6 = vmul.f32 %v13973_v5, %v13965_v45 }
 0xbcb   : > { %13334 = vmatmul.mubr.msk.f32.vlgmr.msra.gmra.mxu1 %vm534_vm2, %v3473_v6 }
 0xbcc   : > { %13342 = vmatpush3.msk.msra.mxu1 %vm876_vm3, %v3708_v2  ;;  %13343 = vmatprep.mubr.msk.f32.mxu1 %vm14302_vm1, %v16587_v10 }
 0xbcd   : > { %13351 = vmatprep.subr.mxu1 %v16587_v10 }
 0xbef   : > { %v3467_v8 = vpop.xlane.xlu1 %3466 }
 0xbf0   : > { %13974 = vrcp.f32 %v3467_v8 }
 0xbf3   : > { %v4010_v12 = vpop.permute.xlu1 %4009 }
 0xbfd   : > { %v13975_v9 = vpop.eup %13974 }
 0xbfe   : > { %v3475_v11 = vmul.f32 %v13975_v9, %v13967_v53 }
 0xc00   : > { %13344 = vmatmul.mubr.msk.f32.vlgmr.msra.gmra.mxu1 %vm534_vm2, %v3475_v11 }
 0xc01   : > { %13352 = vmatpush3.xpose.msk.msra.mxu1 %vm534_vm2, %v3862_v7  ;;  %13353 = vmatprep.mubr.msk.f32.mxu1 %vm14302_vm1, %v16587_v10 }
 0xc02   : > { %13361 = vmatprep.subr.mxu1 %v16587_v10 }
 0xc04   : > { %13354 = vmatmul.mubr.msk.f32.vlgmr.msra.gmra.mxu1 %vm534_vm2, %v14862_v63 }
 0xc05   : > { %13362 = vmatpush3.xpose.msk.msra.mxu1 %vm534_vm2, %v4010_v12  ;;  %13363 = vmatprep.mubr.msk.f32.mxu1 %vm14302_vm1, %v16587_v10 }
 0xc06   : > { %13371 = vmatprep.subr.mxu1 %v16587_v10 }
 0xc08   : > { %13364 = vmatmul.mubr.msk.f32.vlgmr.msra.gmra.mxu1 %vm534_vm2, %v14862_v63 }
 0xc09   : > { %13373 = vmatprep.mubr.msk.f32.mxu1 %vm14302_vm1, %v16587_v10 }
 0xc27   : > { %v14897_v17 = vpop.f32.mrf.mxu0 }
 0xc29   : > { %v13330_v22 = vpop.f32.mrf.mxu0 }
 0xc2b   : > { %v14899_v24 = vpop.f32.mrf.mxu0 }
 0xc2d   : > { %v13340_v25 = vpop.f32.mrf.mxu0 }
 0xc2f   : > { %v3857_v27 = vpop.f32.mrf.mxu0 }
 0xc30   : > { %v4083_v29 = vsel %vm16582_vm4, %v3857_v27, -inf }
 0xc31   : > { %4084 = vmax.xlane.f32.xlu0 %v4083_v29  ;;  %v13350_v30 = vpop.f32.mrf.mxu0 }
 0xc33   : > { %v4005_v32 = vpop.f32.mrf.mxu0 }
 0xc34   : > { %v4089_v33 = vsel %vm16582_vm4, %v4005_v32, -inf }
 0xc35   : > { %4090 = vmax.xlane.f32.xlu0 %v4089_v33  ;;  %v13360_v34 = vpop.f32.mrf.mxu0 }
 0xc8b   : > { %v14903_v35 = vpop.f32.mrf.mxu1 }
 0xc8d   : > { %v13335_v36 = vpop.f32.mrf.mxu1 }
 0xcba   : > { %v4085_v52 = vpop.xlane.xlu0 %4084 }
 0xcbb   : > { %v4095_v53 = vsub.f32 %v3857_v27, %v4085_v52 }
 0xcbd   : > { %v4099_v56 = vmul.f32 1.442695, %v4095_v53 }
 0xcbe   : > { %v4091_v54 = vpop.xlane.xlu0 %4090 }
 0xcbf   : > { %v4097_v58 = vsub.f32 %v4005_v32, %v4091_v54  ;;  %13976 = vpow2.f32 %v4099_v56 }
 0xcc0   : > { %v14905_v40 = vpop.f32.mrf.mxu1 }
 0xcc1   : > { %v4103_v59 = vmul.f32 1.442695, %v4097_v58 }
 0xcc2   : > { %v13345_v43 = vpop.f32.mrf.mxu1 }
 0xcc3   : > { %13978 = vpow2.f32 %v4103_v59 }
 0xcc4   : > { %v3931_v44 = vpop.f32.mrf.mxu1 }
 0xcc5   : > { %v4086_v45 = vsel %vm16582_vm4, %v3931_v44, -inf }
 0xcc6   : > { %4087 = vmax.xlane.f32.xlu1 %v4086_v45  ;;  %v13355_v46 = vpop.f32.mrf.mxu1  ;;  %v14939_v45 = vld [vmem:[%s16564_s1 + $0x18] sm:$0xf] }
 0xcc8   : > { %v4079_v47 = vpop.f32.mrf.mxu1 }
 0xcc9   : > { %v4092_v48 = vsel %vm16582_vm4, %v4079_v47, -inf }
 0xcca   : > { %4093 = vmax.xlane.f32.xlu0 %v4092_v48  ;;  %v13365_v50 = vpop.f32.mrf.mxu1 }
 0xccc   : > { %v13977_v60 = vpop.eup %13976 }
 0xccd   : > { %v4107_v61 = vsel %vm16582_vm4, %v13977_v60, 0.0 }
 0xcd0   : > { %v13979_v62 = vpop.eup %13978 }
 0xcd1   : > { %v4113_v0 = vsel %vm16582_vm4, %v13979_v62, 0.0 }
 0xcd7   : > { %4204 = vrot.lane.b32.xlu1 %v14496_v16, %s14313_s12 }
 0xcdb   : > { %4281 = vrot.lane.b32.xlu1 %v14490_v15, %s14313_s12 }
 0xcdf   : > { %4358 = vrot.lane.b32.xlu1 %v14514_v18, %s14313_s12 }
 0xce0   : > { %4127 = vrot.lane.b32.xlu0 %v14488_v14, %s14313_s12  ;;  %s16583_s12 = smov 20  }
 0xcff   : > { %4108 = vadd.xlane.f32.xlu0 %v4107_v61 }
 0xd03   : > { %4114 = vadd.xlane.f32.xlu0 %v4113_v0 }
 0xd19   : > { %4435 = vrot.lane.b32.xlu0 %v14488_v14, %s16575_s13 }
 0xd1d   : > { %4586 = vrot.lane.b32.xlu0 %v14490_v15, %s16575_s13 }
 0xd4f   : > { %v4088_v2 = vpop.xlane.xlu1 %4087 }
 0xd50   : > { %v4096_v4 = vsub.f32 %v3931_v44, %v4088_v2 }
 0xd52   : > { %v4101_v5 = vmul.f32 1.442695, %v4096_v4 }
 0xd53   : > { %v4205_v6 = vpop.permute.xlu1 %4204  ;;  %v4094_v7 = vpop.xlane.xlu0 %4093 }
 0xd54   : > { %13980 = vpow2.f32 %v4101_v5  ;;  %13372 = vmatpush3.msk.msra.mxu1 %vm876_vm3, %v4205_v6  ;;  %v4098_v12 = vsub.f32 %v4079_v47, %v4094_v7 }
 0xd55   : > { %13381 = vmatprep.subr.mxu1 %v16587_v10 }
 0xd56   : > { %v4105_v22 = vmul.f32 1.442695, %v4098_v12 }
 0xd57   : > { %v4128_v8 = vpop.permute.xlu0 %4127  ;;  %v4282_v34 = vpop.permute.xlu1 %4281 }
 0xd58   : > { %13367 = vmatpush3.msk.msra.mxu0 %vm876_vm3, %v4128_v8  ;;  %13982 = vpow2.f32 %v4105_v22 }
 0xd59   : > { %13376 = vmatprep.subr.mxu0 %v16587_v10 }
 0xd5b   : > { %v4359_v47 = vpop.permute.xlu1 %4358 }
 0xd61   : > { %v13981_v9 = vpop.eup %13980 }
 0xd62   : > { %v4110_v11 = vsel %vm16582_vm4, %v13981_v9, 0.0 }
 0xd63   : > { %4111 = vadd.xlane.f32.xlu1 %v4110_v11 }
 0xd65   : > { %v13983_v29 = vpop.eup %13982 }
 0xd66   : > { %v4116_v32 = vsel %vm16582_vm4, %v13983_v29, 0.0 }
 0xd74   : > { %4512 = vrot.lane.b32.xlu1 %v14496_v16, %s16575_s13 }
 0xd88   : > { %v4109_v25 = vpop.xlane.xlu0 %4108 }
 0xd89   : > { %13984 = vrcp.f32 %v4109_v25 }
 0xd8c   : > { %v4115_v27 = vpop.xlane.xlu0 %4114 }
 0xd8d   : > { %13986 = vrcp.f32 %v4115_v27 }
 0xd90   : > { %v4436_v43 = vpop.permute.xlu0 %4435 }
 0xd94   : > { %v4587_v46 = vpop.permute.xlu0 %4586 }
 0xd96   : > { %v13985_v30 = vpop.eup %13984 }
 0xd97   : > { %v4123_v33 = vmul.f32 %v13985_v30, %v13977_v60 }
 0xd98   : > { %4117 = vadd.xlane.f32.xlu1 %v4116_v32 }
 0xd99   : > { %13369 = vmatmul.mubr.msk.f32.vlgmr.msra.gmra.mxu0 %vm534_vm2, %v4123_v33 }
 0xd9a   : > { %v13987_v36 = vpop.eup %13986  ;;  %13377 = vmatpush3.msk.msra.mxu0 %vm876_vm3, %v4282_v34  ;;  %13378 = vmatprep.mubr.msk.f32.mxu0 %vm14302_vm1, %v16587_v10 }
 0xd9b   : > { %13386 = vmatprep.subr.mxu0 %v16587_v10  ;;  %v4125_v44 = vmul.f32 %v13987_v36, %v13979_v62 }
 0xd9d   : > { %13379 = vmatmul.mubr.msk.f32.vlgmr.msra.gmra.mxu0 %vm534_vm2, %v4125_v44 }
 0xd9e   : > { %13387 = vmatpush3.xpose.msk.msra.mxu0 %vm534_vm2, %v4436_v43  ;;  %13388 = vmatprep.mubr.msk.f32.mxu0 %vm14302_vm1, %v16587_v10 }
 0xd9f   : > { %13396 = vmatprep.subr.mxu0 %v16587_v10 }
 0xda1   : > { %13389 = vmatmul.mubr.msk.f32.vlgmr.msra.gmra.mxu0 %vm534_vm2, %v14939_v45 }
 0xda2   : > { %13397 = vmatpush3.xpose.msk.msra.mxu0 %vm534_vm2, %v4587_v46  ;;  %13398 = vmatprep.mubr.msk.f32.mxu0 %vm14302_vm1, %v16587_v10 }
 0xda3   : > { %13406 = vmatprep.subr.mxu0 %v16587_v10 }
 0xda5   : > { %13399 = vmatmul.mubr.msk.f32.vlgmr.msra.gmra.mxu0 %vm534_vm2, %v14939_v45 }
 0xda6   : > { %13408 = vmatprep.mubr.msk.f32.mxu0 %vm14302_vm1, %v16587_v10 }
 0xda9   : > { %4660 = vrot.lane.b32.xlu1 %v14514_v18, %s16575_s13  ;;  %s14319_s13 = smov 8  }
 0xdec   : > { %v4112_v48 = vpop.xlane.xlu1 %4111 }
 0xded   : > { %13988 = vrcp.f32 %v4112_v48 }
 0xdf0   : > { %v4513_v53 = vpop.permute.xlu1 %4512 }
 0xdfa   : > { %v13989_v50 = vpop.eup %13988 }
 0xdfb   : > { %v4124_v52 = vmul.f32 %v13989_v50, %v13981_v9 }
 0xdfd   : > { %13374 = vmatmul.mubr.msk.f32.vlgmr.msra.gmra.mxu1 %vm534_vm2, %v4124_v52 }
 0xdfe   : > { %13382 = vmatpush3.msk.msra.mxu1 %vm876_vm3, %v4359_v47  ;;  %13383 = vmatprep.mubr.msk.f32.mxu1 %vm14302_vm1, %v16587_v10 }
 0xdff   : > { %13391 = vmatprep.subr.mxu1 %v16587_v10 }
 0xe21   : > { %v4118_v54 = vpop.xlane.xlu1 %4117 }
 0xe22   : > { %13990 = vrcp.f32 %v4118_v54 }
 0xe25   : > { %v4661_v59 = vpop.permute.xlu1 %4660 }
 0xe2f   : > { %v13991_v56 = vpop.eup %13990 }
 0xe30   : > { %v4126_v58 = vmul.f32 %v13991_v56, %v13983_v29 }
 0xe32   : > { %13384 = vmatmul.mubr.msk.f32.vlgmr.msra.gmra.mxu1 %vm534_vm2, %v4126_v58 }
 0xe33   : > { %13392 = vmatpush3.xpose.msk.msra.mxu1 %vm534_vm2, %v4513_v53  ;;  %13393 = vmatprep.mubr.msk.f32.mxu1 %vm14302_vm1, %v16587_v10 }
 0xe34   : > { %13401 = vmatprep.subr.mxu1 %v16587_v10 }
 0xe36   : > { %13394 = vmatmul.mubr.msk.f32.vlgmr.msra.gmra.mxu1 %vm534_vm2, %v14939_v45 }
 0xe37   : > { %13402 = vmatpush3.xpose.msk.msra.mxu1 %vm534_vm2, %v4661_v59  ;;  %13403 = vmatprep.mubr.msk.f32.mxu1 %vm14302_vm1, %v16587_v10 }
 0xe38   : > { %13411 = vmatprep.subr.mxu1 %v16587_v10 }
 0xe3a   : > { %13404 = vmatmul.mubr.msk.f32.vlgmr.msra.gmra.mxu1 %vm534_vm2, %v14939_v45 }
 0xe3b   : > { %13413 = vmatprep.mubr.msk.f32.mxu1 %vm14302_vm1, %v16587_v10 }
 0xe59   : > { %v14974_v60 = vpop.f32.mrf.mxu0 }
 0xe5b   : > { %v13370_v61 = vpop.f32.mrf.mxu0 }
 0xe5d   : > { %v14976_v62 = vpop.f32.mrf.mxu0 }
 0xe5f   : > { %v13380_v0 = vpop.f32.mrf.mxu0 }
 0xe61   : > { %v4508_v2 = vpop.f32.mrf.mxu0 }
 0xe62   : > { %v4734_v4 = vsel %vm16582_vm4, %v4508_v2, -inf }
 0xe63   : > { %4735 = vmax.xlane.f32.xlu0 %v4734_v4  ;;  %v13390_v5 = vpop.f32.mrf.mxu0 }
 0xe65   : > { %v4656_v6 = vpop.f32.mrf.mxu0 }
 0xe66   : > { %v4740_v7 = vsel %vm16582_vm4, %v4656_v6, -inf }
 0xe67   : > { %4741 = vmax.xlane.f32.xlu0 %v4740_v7  ;;  %v13400_v8 = vpop.f32.mrf.mxu0 }
 0xebd   : > { %v14980_v9 = vpop.f32.mrf.mxu1 }
 0xebf   : > { %v13375_v11 = vpop.f32.mrf.mxu1 }
 0xeec   : > { %v4736_v34 = vpop.xlane.xlu0 %4735 }
 0xeed   : > { %v4746_v36 = vsub.f32 %v4508_v2, %v4736_v34  ;;  %v15016_v34 = vld [vmem:[%s16564_s1 + $0x1c] sm:$0xf] }
 0xeef   : > { %v4750_v44 = vmul.f32 1.442695, %v4746_v36 }
 0xef0   : > { %v4742_v43 = vpop.xlane.xlu0 %4741 }
 0xef1   : > { %v4748_v46 = vsub.f32 %v4656_v6, %v4742_v43  ;;  %13992 = vpow2.f32 %v4750_v44 }
 0xef2   : > { %v14982_v12 = vpop.f32.mrf.mxu1 }
 0xef3   : > { %v4754_v47 = vmul.f32 1.442695, %v4748_v46 }
 0xef4   : > { %v13385_v22 = vpop.f32.mrf.mxu1 }
 0xef5   : > { %13994 = vpow2.f32 %v4754_v47 }
 0xef6   : > { %v4582_v25 = vpop.f32.mrf.mxu1 }
 0xef7   : > { %v4737_v27 = vsel %vm16582_vm4, %v4582_v25, -inf }
 0xef8   : > { %4738 = vmax.xlane.f32.xlu1 %v4737_v27  ;;  %v13395_v29 = vpop.f32.mrf.mxu1 }
 0xefa   : > { %v4730_v30 = vpop.f32.mrf.mxu1 }
 0xefb   : > { %v4743_v32 = vsel %vm16582_vm4, %v4730_v30, -inf }
 0xefc   : > { %4744 = vmax.xlane.f32.xlu0 %v4743_v32  ;;  %v13405_v33 = vpop.f32.mrf.mxu1 }
 0xefe   : > { %v13993_v48 = vpop.eup %13992 }
 0xeff   : > { %v4758_v50 = vsel %vm16582_vm4, %v13993_v48, 0.0 }
 0xf02   : > { %v13995_v52 = vpop.eup %13994 }
 0xf03   : > { %v4764_v53 = vsel %vm16582_vm4, %v13995_v52, 0.0 }
 0xf09   : > { %4855 = vrot.lane.b32.xlu1 %v14496_v16, %s14315_s23 }
 0xf0d   : > { %4932 = vrot.lane.b32.xlu1 %v14490_v15, %s14315_s23 }
 0xf11   : > { %5009 = vrot.lane.b32.xlu1 %v14514_v18, %s14315_s23 }
 0xf12   : > { %4778 = vrot.lane.b32.xlu0 %v14488_v14, %s14315_s23  ;;  %s16687_s23 = smov 24  }
 0xf31   : > { %4759 = vadd.xlane.f32.xlu0 %v4758_v50 }
 0xf35   : > { %4765 = vadd.xlane.f32.xlu0 %v4764_v53 }
 0xf4b   : > { %5086 = vrot.lane.b32.xlu0 %v14488_v14, %s16573_s25 }
 0xf4f   : > { %5237 = vrot.lane.b32.xlu0 %v14490_v15, %s16573_s25 }
 0xf81   : > { %v4739_v54 = vpop.xlane.xlu1 %4738 }
 0xf82   : > { %v4747_v56 = vsub.f32 %v4582_v25, %v4739_v54 }
 0xf84   : > { %v4752_v58 = vmul.f32 1.442695, %v4747_v56 }
 0xf85   : > { %v4856_v59 = vpop.permute.xlu1 %4855  ;;  %v4745_v61 = vpop.xlane.xlu0 %4744 }
 0xf86   : > { %13996 = vpow2.f32 %v4752_v58  ;;  %13412 = vmatpush3.msk.msra.mxu1 %vm876_vm3, %v4856_v59  ;;  %v4749_v5 = vsub.f32 %v4730_v30, %v4745_v61 }
 0xf87   : > { %13421 = vmatprep.subr.mxu1 %v16587_v10 }
 0xf88   : > { %v4756_v6 = vmul.f32 1.442695, %v4749_v5 }
 0xf89   : > { %v4779_v0 = vpop.permute.xlu0 %4778  ;;  %v4933_v29 = vpop.permute.xlu1 %4932 }
 0xf8a   : > { %13407 = vmatpush3.msk.msra.mxu0 %vm876_vm3, %v4779_v0  ;;  %13998 = vpow2.f32 %v4756_v6 }
 0xf8b   : > { %13416 = vmatprep.subr.mxu0 %v16587_v10 }
 0xf8d   : > { %v5010_v43 = vpop.permute.xlu1 %5009 }
 0xf93   : > { %v13997_v2 = vpop.eup %13996 }
 0xf94   : > { %v4761_v4 = vsel %vm16582_vm4, %v13997_v2, 0.0 }
 0xf95   : > { %4762 = vadd.xlane.f32.xlu1 %v4761_v4 }
 0xf97   : > { %v13999_v11 = vpop.eup %13998 }
 0xf98   : > { %v4767_v25 = vsel %vm16582_vm4, %v13999_v11, 0.0 }
 0xfa6   : > { %5163 = vrot.lane.b32.xlu1 %v14496_v16, %s16573_s25 }
 0xfba   : > { %v4760_v7 = vpop.xlane.xlu0 %4759 }
 0xfbb   : > { %14000 = vrcp.f32 %v4760_v7 }
 0xfbe   : > { %v4766_v8 = vpop.xlane.xlu0 %4765 }
 0xfbf   : > { %14002 = vrcp.f32 %v4766_v8 }
 0xfc2   : > { %v5087_v30 = vpop.permute.xlu0 %5086 }
 0xfc6   : > { %v5238_v36 = vpop.permute.xlu0 %5237 }
 0xfc8   : > { %v14001_v22 = vpop.eup %14000 }
 0xfc9   : > { %v4774_v27 = vmul.f32 %v14001_v22, %v13993_v48 }
 0xfca   : > { %4768 = vadd.xlane.f32.xlu1 %v4767_v25 }
 0xfcb   : > { %13409 = vmatmul.mubr.msk.f32.vlgmr.msra.gmra.mxu0 %vm534_vm2, %v4774_v27 }
 0xfcc   : > { %v14003_v32 = vpop.eup %14002  ;;  %13417 = vmatpush3.msk.msra.mxu0 %vm876_vm3, %v4933_v29  ;;  %13418 = vmatprep.mubr.msk.f32.mxu0 %vm14302_vm1, %v16587_v10 }
 0xfcd   : > { %13426 = vmatprep.subr.mxu0 %v16587_v10  ;;  %v4776_v33 = vmul.f32 %v14003_v32, %v13995_v52 }
 0xfcf   : > { %13419 = vmatmul.mubr.msk.f32.vlgmr.msra.gmra.mxu0 %vm534_vm2, %v4776_v33 }
 0xfd0   : > { %13427 = vmatpush3.xpose.msk.msra.mxu0 %vm534_vm2, %v5087_v30  ;;  %13428 = vmatprep.mubr.msk.f32.mxu0 %vm14302_vm1, %v16587_v10 }
 0xfd1   : > { %13436 = vmatprep.subr.mxu0 %v16587_v10 }
 0xfd3   : > { %13429 = vmatmul.mubr.msk.f32.vlgmr.msra.gmra.mxu0 %vm534_vm2, %v15016_v34 }
 0xfd4   : > { %13437 = vmatpush3.xpose.msk.msra.mxu0 %vm534_vm2, %v5238_v36  ;;  %13438 = vmatprep.mubr.msk.f32.mxu0 %vm14302_vm1, %v16587_v10 }
 0xfd5   : > { %13446 = vmatprep.subr.mxu0 %v16587_v10 }
 0xfd7   : > { %13439 = vmatmul.mubr.msk.f32.vlgmr.msra.gmra.mxu0 %vm534_vm2, %v15016_v34 }
 0xfd8   : > { %13448 = vmatprep.mubr.msk.f32.mxu0 %vm14302_vm1, %v16587_v10 }
 0xfdb   : > { %5311 = vrot.lane.b32.xlu1 %v14514_v18, %s16573_s25  ;;  %s16585_s25 = smov 16  }
0x101e   : > { %v4763_v44 = vpop.xlane.xlu1 %4762 }
0x101f   : > { %14004 = vrcp.f32 %v4763_v44 }
0x1022   : > { %v5164_v48 = vpop.permute.xlu1 %5163 }
0x102c   : > { %v14005_v46 = vpop.eup %14004 }
0x102d   : > { %v4775_v47 = vmul.f32 %v14005_v46, %v13997_v2 }
0x102f   : > { %13414 = vmatmul.mubr.msk.f32.vlgmr.msra.gmra.mxu1 %vm534_vm2, %v4775_v47 }
0x1030   : > { %13422 = vmatpush3.msk.msra.mxu1 %vm876_vm3, %v5010_v43  ;;  %13423 = vmatprep.mubr.msk.f32.mxu1 %vm14302_vm1, %v16587_v10 }
0x1031   : > { %13431 = vmatprep.subr.mxu1 %v16587_v10 }
0x1053   : > { %v4769_v50 = vpop.xlane.xlu1 %4768 }
0x1054   : > { %14006 = vrcp.f32 %v4769_v50 }
0x1057   : > { %v5312_v54 = vpop.permute.xlu1 %5311 }
0x1061   : > { %v14007_v52 = vpop.eup %14006 }
0x1062   : > { %v4777_v53 = vmul.f32 %v14007_v52, %v13999_v11 }
0x1064   : > { %13424 = vmatmul.mubr.msk.f32.vlgmr.msra.gmra.mxu1 %vm534_vm2, %v4777_v53 }
0x1065   : > { %13432 = vmatpush3.xpose.msk.msra.mxu1 %vm534_vm2, %v5164_v48  ;;  %13433 = vmatprep.mubr.msk.f32.mxu1 %vm14302_vm1, %v16587_v10 }
0x1066   : > { %13441 = vmatprep.subr.mxu1 %v16587_v10 }
0x1068   : > { %13434 = vmatmul.mubr.msk.f32.vlgmr.msra.gmra.mxu1 %vm534_vm2, %v15016_v34 }
0x1069   : > { %13442 = vmatpush3.xpose.msk.msra.mxu1 %vm534_vm2, %v5312_v54  ;;  %13443 = vmatprep.mubr.msk.f32.mxu1 %vm14302_vm1, %v16587_v10 }
0x106a   : > { %13451 = vmatprep.subr.mxu1 %v16587_v10 }
0x106c   : > { %13444 = vmatmul.mubr.msk.f32.vlgmr.msra.gmra.mxu1 %vm534_vm2, %v15016_v34 }
0x106d   : > { %13453 = vmatprep.mubr.msk.f32.mxu1 %vm14302_vm1, %v16587_v10 }
0x108b   : > { %v4851_v56 = vpop.f32.mrf.mxu0 }
0x108d   : > { %v13410_v58 = vpop.f32.mrf.mxu0 }
0x108f   : > { %v15051_v59 = vpop.f32.mrf.mxu0 }
0x1091   : > { %v13420_v61 = vpop.f32.mrf.mxu0 }
0x1092   : > { %v15074_v61 = vld [vmem:[%s16564_s1 + $0x4] sm:$0xf] }
0x1093   : > { %v5159_v0 = vpop.f32.mrf.mxu0 }
0x1094   : > { %v5385_v2 = vsel %vm16582_vm4, %v5159_v0, -inf }
0x1095   : > { %5386 = vmax.xlane.f32.xlu0 %v5385_v2  ;;  %v13430_v4 = vpop.f32.mrf.mxu0  ;;  %v15082_v2 = vld [vmem:[%s16564_s1 + $0x8] sm:$0xf] }
0x1096   : > { %v2248_v4 = vadd.f32 %v15082_v2, %v14743_v38  ;;  %v1751_v38 = vadd.f32 %v15074_v61, %v14674_v28 }
0x1097   : > { %v5307_v5 = vpop.f32.mrf.mxu0 }
0x1098   : > { %v5391_v6 = vsel %vm16582_vm4, %v5307_v5, -inf }
0x1099   : > { %5392 = vmax.xlane.f32.xlu0 %v5391_v6  ;;  %v13440_v7 = vpop.f32.mrf.mxu0  ;;  %v4201_v6 = vadd.f32 %v14974_v60, %v14862_v63  ;;  %v3704_v60 = vadd.f32 %v14899_v24, %v14785_v42 }
0x10ef   : > { %v15055_v8 = vpop.f32.mrf.mxu1 }
0x10f1   : > { %v13415_v11 = vpop.f32.mrf.mxu1 }
0x111e   : > { %v5387_v22 = vpop.xlane.xlu0 %5386 }
0x111f   : > { %v5397_v25 = vsub.f32 %v5159_v0, %v5387_v22  ;;  %v1597_v0 = vadd.f32 %v15074_v61, %v14672_v26 }
0x1121   : > { %v5401_v27 = vmul.f32 1.442695, %v5397_v25 }
0x1122   : > { %v5393_v29 = vpop.xlane.xlu0 %5392 }
0x1123   : > { %14008 = vpow2.f32 %v5401_v27  ;;  %v5399_v32 = vsub.f32 %v5307_v5, %v5393_v29  ;;  %v3550_v5 = vadd.f32 %v14897_v17, %v14785_v42  ;;  %v4852_v17 = vadd.f32 %v4851_v56, %v14939_v45 }
0x1124   : > { %v15057_v30 = vpop.f32.mrf.mxu1  ;;  %v5006_v56 = vadd.f32 %v15051_v59, %v14939_v45 }
0x1125   : > { %v5405_v33 = vmul.f32 1.442695, %v5399_v32 }
0x1126   : > { %v13425_v36 = vpop.f32.mrf.mxu1 }
0x1127   : > { %14010 = vpow2.f32 %v5405_v33 }
0x1128   : > { %v5233_v43 = vpop.f32.mrf.mxu1 }
0x1129   : > { %v5388_v44 = vsel %vm16582_vm4, %v5233_v43, -inf }
0x112a   : > { %5389 = vmax.xlane.f32.xlu1 %v5388_v44  ;;  %v13435_v46 = vpop.f32.mrf.mxu1 }
0x112b   : > { %v1674_v46 = vadd.f32 %v15074_v61, %v14678_v37  ;;  %v4278_v37 = vadd.f32 %v14980_v9, %v14862_v63  ;;  %v5083_v9 = vadd.f32 %v15057_v30, %v14939_v45 }
0x112c   : > { %v15060_v47 = vpop.f32.mrf.mxu1 }
0x112d   : > { %v5394_v48 = vsel %vm16582_vm4, %v15060_v47, -inf }
0x112e   : > { %5395 = vmax.xlane.f32.xlu0 %v5394_v48  ;;  %v13445_v50 = vpop.f32.mrf.mxu1 }
0x1130   : > { %v14009_v52 = vpop.eup %14008 }
0x1131   : > { %v5409_v53 = vsel %vm16582_vm4, %v14009_v52, 0.0 }
0x1132   : > { %5410 = vadd.xlane.f32.xlu0 %v5409_v53 }
0x1134   : > { %v15065_v54 = vpop.eup %14010 }
0x1135   : > { %v5415_v58 = vsel %vm16582_vm4, %v15065_v54, 0.0 }
0x1136   : > { %5416 = vadd.xlane.f32.xlu0 %v5415_v58 }
0x114c   : > { %5429 = vrot.lane.b32.xlu0 %v14488_v14, %s14317_s20  ;;  %v15090_v14 = vld [vmem:[%s16564_s1 + $0xc] sm:$0xf] }
0x114d   : > { %v2899_v26 = vadd.f32 %v15090_v14, %v14820_v55  ;;  %v2402_v55 = vadd.f32 %v15082_v2, %v14745_v41  ;;  %v3053_v28 = vadd.f32 %v15090_v14, %v14822_v57  ;;  %v4355_v41 = vadd.f32 %v14976_v62, %v14862_v63 }
0x1150   : > { %5741 = vrot.lane.b32.xlu0 %v1597_v0, %s14318_s10 }
0x1154   : > { %5757 = vrot.lane.b32.xlu0 %v2248_v4, %s14319_s13 }
0x1158   : > { %5773 = vrot.lane.b32.xlu0 %v2899_v26, %s14320_s24 }
0x115c   : > { %5789 = vrot.lane.b32.xlu0 %v3550_v5, %s16585_s25 }
0x1160   : > { %5745 = vrot.lane.b32.xlu0 %v1751_v38, %s14318_s10 }
0x1164   : > { %5805 = vrot.lane.b32.xlu0 %v4201_v6, %s16583_s12 }
0x1168   : > { %5761 = vrot.lane.b32.xlu0 %v2402_v55, %s14319_s13 }
0x116c   : > { %5821 = vrot.lane.b32.xlu0 %v4852_v17, %s16579_s21 }
0x1170   : > { %5777 = vrot.lane.b32.xlu0 %v3053_v28, %s14320_s24  ;;  %v15202_v28 = vld [vmem:[%s16564_s1] sm:$0xf] }
0x1174   : > { %5793 = vrot.lane.b32.xlu0 %v3704_v60, %s16585_s25  ;;  %v946_v60 = vadd.f32 %v15202_v28, %v14601_v13 }
0x1178   : > { %5809 = vrot.lane.b32.xlu0 %v4355_v41, %s16583_s12 }
0x117c   : > { %5825 = vrot.lane.b32.xlu0 %v5006_v56, %s16579_s21 }
0x11b3   : > { %v5390_v7 = vpop.xlane.xlu1 %5389 }
0x11b4   : > { %v5398_v11 = vsub.f32 %v5233_v43, %v5390_v7 }
0x11b6   : > { %v5403_v57 = vmul.f32 1.442695, %v5398_v11 }
0x11b7   : > { %v5396_v22 = vpop.xlane.xlu0 %5395 }
0x11b8   : > { %14012 = vpow2.f32 %v5403_v57  ;;  %v5400_v33 = vsub.f32 %v15060_v47, %v5396_v22  ;;  %v3627_v47 = vadd.f32 %v14903_v35, %v14785_v42  ;;  %v3781_v35 = vadd.f32 %v14905_v40, %v14785_v42 }
0x11ba   : > { %v5407_v36 = vmul.f32 1.442695, %v5400_v33 }
0x11bb   : > { %v5411_v25 = vpop.xlane.xlu0 %5410 }
0x11bc   : > { %14014 = vrcp.f32 %v5411_v25 }
0x11bd   : > { %14016 = vpow2.f32 %v5407_v36 }
0x11bf   : > { %v5417_v24 = vpop.xlane.xlu0 %5416 }
0x11c0   : > { %14018 = vrcp.f32 %v5417_v24 }
0x11c3   : > { %v5430_v27 = vpop.permute.xlu0 %5429 }
0x11c4   : > { %13447 = vmatpush3.msk.msra.mxu0 %vm876_vm3, %v5430_v27 }
0x11c5   : > { %v14013_v29 = vpop.eup %14012  ;;  %13456 = vmatprep.subr.mxu0 %v16587_v10 }
0x11c6   : > { %v5412_v62 = vsel %vm16582_vm4, %v14013_v29, 0.0 }
0x11c7   : > { %5413 = vadd.xlane.f32.xlu1 %v5412_v62 }
0x11c9   : > { %v14015_v59 = vpop.eup %14014 }
0x11ca   : > { %v5425_v32 = vmul.f32 %v14015_v59, %v14009_v52  ;;  %v14017_v43 = vpop.eup %14016 }
0x11cb   : > { %v5418_v44 = vsel %vm16582_vm4, %v14017_v43, 0.0 }
0x11cc   : > { %13449 = vmatmul.mubr.msk.f32.vlgmr.msra.gmra.mxu0 %vm534_vm2, %v5425_v32 }
0x11cd   : > { %13458 = vmatprep.mubr.msk.f32.mxu0 %vm14302_vm1, %v16587_v10  ;;  %v14019_v48 = vpop.eup %14018 }
0x11ce   : > { %v5427_v40 = vmul.f32 %v14019_v48, %v15065_v54  ;;  %v16593_v48 = vmov 920167782  }
0x11d8   : > { %5506 = vrot.lane.b32.xlu1 %v14496_v16, %s14317_s20  ;;  %v2325_v16 = vadd.f32 %v15082_v2, %v14749_v49  ;;  %v2479_v49 = vadd.f32 %v15082_v2, %v14751_v51  ;;  %v4432_v51 = vadd.f32 %v14982_v12, %v14862_v63 }
0x11dc   : > { %5583 = vrot.lane.b32.xlu1 %v14490_v15, %s14317_s20  ;;  %v2976_v15 = vadd.f32 %v15090_v14, %v14826_v1  ;;  %v4929_v1 = vadd.f32 %v15055_v8, %v14939_v45 }
0x1200   : > { %5419 = vadd.xlane.f32.xlu1 %v5418_v44 }
0x1211   : > { %5660 = vrot.lane.b32.xlu1 %v14514_v18, %s14317_s20  ;;  %v1828_v18 = vadd.f32 %v15074_v61, %v14680_v39  ;;  %v3130_v39 = vadd.f32 %v15090_v14, %v14828_v3  ;;  %s14324_s20 = smov 28   ;;  %v5742_v61 = vpop.permute.xlu0 %5741 }
0x1212   : > { %v5849_v41 = vsel %vm534_vm2, %v946_v60, %v5742_v61 }
0x1215   : > { %5743 = vrot.lane.b32.xlu1 %v1674_v46, %s14318_s10  ;;  %v5758_v0 = vpop.permute.xlu0 %5757 }
0x1216   : > { %v5854_v56 = vsel %vm5853_vm5, %v5849_v41, %v5758_v0 }
0x1219   : > { %5759 = vrot.lane.b32.xlu1 %v2325_v16, %s14319_s13  ;;  %v5774_v2 = vpop.permute.xlu0 %5773 }
0x121a   : > { %v5859_v11 = vsel %vm5858_vm6, %v5854_v56, %v5774_v2 }
0x121d   : > { %5775 = vrot.lane.b32.xlu1 %v2976_v15, %s14320_s24  ;;  %v5790_v4 = vpop.permute.xlu0 %5789 }
0x121e   : > { %v5864_v57 = vsel %vm5863_vm7, %v5859_v11, %v5790_v4 }
0x1221   : > { %5791 = vrot.lane.b32.xlu1 %v3627_v47, %s16585_s25  ;;  %v15189_v14 = vpop.permute.xlu0 %5745  ;;  %v16601_v47 = vmov 683565275  }
0x1225   : > { %5747 = vrot.lane.b32.xlu1 %v1828_v18, %s14318_s10  ;;  %v5806_v26 = vpop.permute.xlu0 %5805 }
0x1226   : > { %v5869_v22 = vsel %vm16605_vm8, %v5864_v57, %v5806_v26 }
0x1229   : > { %5807 = vrot.lane.b32.xlu1 %v4278_v37, %s16583_s12  ;;  %v15191_v5 = vpop.permute.xlu0 %5761  ;;  %v16599_v37 = vmov 2475754826  }
0x122d   : > { %5763 = vrot.lane.b32.xlu1 %v2479_v49, %s14319_s13  ;;  %v5822_v38 = vpop.permute.xlu0 %5821 }
0x122e   : > { %v5874_v13 = vsel %vm16604_vm9, %v5869_v22, %v5822_v38 }
0x1231   : > { %5823 = vrot.lane.b32.xlu1 %v4929_v1, %s16579_s21  ;;  %v15193_v6 = vpop.permute.xlu0 %5777 }
0x1235   : > { %5779 = vrot.lane.b32.xlu1 %v3130_v39, %s14320_s24  ;;  %v15195_v55 = vpop.permute.xlu0 %5793  ;;  %v16597_v39 = vmov 2131351028  }
0x1239   : > { %5795 = vrot.lane.b32.xlu1 %v3781_v35, %s16585_s25  ;;  %v15197_v17 = vpop.permute.xlu0 %5809 }
0x123d   : > { %5811 = vrot.lane.b32.xlu1 %v4432_v51, %s16583_s12  ;;  %v15208_v7 = vpop.permute.xlu0 %5825 }
0x1241   : > { %5827 = vrot.lane.b32.xlu1 %v5083_v9, %s16579_s21  ;;  %v16591_v9 = vmov 2102212464   ;;  %s16686_s21 = smov 20  }
0x1250   : > { %v5414_v8 = vpop.xlane.xlu1 %5413 }
0x1251   : > { %14020 = vrcp.f32 %v5414_v8 }
0x1254   : > { %v5507_v3 = vpop.permute.xlu1 %5506 }
0x1255   : > { %13452 = vmatpush3.msk.msra.mxu1 %vm876_vm3, %v5507_v3 }
0x1256   : > { %13461 = vmatprep.subr.mxu1 %v16587_v10 }
0x1258   : > { %v5584_v42 = vpop.permute.xlu1 %5583 }
0x1259   : > { %13457 = vmatpush3.msk.msra.mxu0 %vm876_vm3, %v5584_v42 }
0x125a   : > { %13459 = vmatmul.mubr.msk.f32.vlgmr.msra.gmra.mxu0 %vm534_vm2, %v5427_v40  ;;  %13466 = vmatprep.subr.mxu0 %v16587_v10 }
0x125b   : > { %13468 = vmatprep.mubr.msk.f32.mxu0 %vm14302_vm1, %v16587_v10 }
0x125e   : > { %v14021_v63 = vpop.eup %14020 }
0x125f   : > { %v5426_v45 = vmul.f32 %v14021_v63, %v14013_v29  ;;  %v16595_v63 = vmov 1326507024  }
0x1261   : > { %13454 = vmatmul.mubr.msk.f32.vlgmr.msra.gmra.mxu1 %vm534_vm2, %v5426_v45 }
0x1262   : > { %13463 = vmatprep.mubr.msk.f32.mxu1 %vm14302_vm1, %v16587_v10 }
0x1289   : > { %v5420_v12 = vpop.xlane.xlu1 %5419 }
0x128a   : > { %14022 = vrcp.f32 %v5420_v12 }
0x128c   : > { %v5502_v30 = vpop.f32.mrf.mxu0 }
0x128d   : > { %v5661_v50 = vpop.permute.xlu1 %5660  ;;  %v5503_v52 = vadd.f32 %v5502_v30, %v15016_v34 }
0x128e   : > { %13462 = vmatpush3.msk.msra.mxu1 %vm876_vm3, %v5661_v50  ;;  %v13450_v53 = vpop.f32.mrf.mxu0 }
0x128f   : > { %13471 = vmatprep.subr.mxu1 %v16587_v10  ;;  %5837 = vrot.lane.b32.xlu0 %v5503_v52, %s14324_s20 }
0x1297   : > { %v14023_v54 = vpop.eup %14022 }
0x1298   : > { %v5428_v58 = vmul.f32 %v14023_v54, %v14017_v43 }
0x129a   : > { %13464 = vmatmul.mubr.msk.f32.vlgmr.msra.gmra.mxu1 %vm534_vm2, %v5428_v58 }
0x129b   : > { %13473 = vmatprep.mubr.msk.f32.mxu1 %vm14302_vm1, %v16587_v10 }
0x1301   : > { %v5838_v25 = vpop.permute.xlu0 %5837 }
0x1302   : > { %v15215_v24 = vsel %vm16603_vm10, %v5874_v13, %v5838_v25 }
0x1303   : > { %v15218_v27 = vmul.f32 0.3926991, %v15215_v24 }
0x1305   : > { %v5892_v29 = vand.u32 2139095040, %v15218_v27  ;;  %v5889_v32 = vand.u32 2147483647, %v15218_v27  ;;  %vm5981_vm4 = vweird.f32 %v15218_v27 }
0x1307   : > { %v5893_v62 = vshrl.u32 %v5892_v29, 23  ;;  %v5896_v36 = vand.u32 8388607, %v5889_v32 }
0x1309   : > { %v12690_v59 = vadd.s32 4294967169, %v5893_v62  ;;  %v5897_v16 = vor.u32 8388608, %v5896_v36 }
0x130b   : > { %v5899_v33 = vadd.s32 1, %v12690_v59  ;;  %v5937_v26 = vshll.u32 %v5897_v16, 8 }
0x130d   : > { %vm5900_vm11 = vcmp.gt.s32.totalorder %v5899_v33, 0 }
0x130e   : > { %v5901_v43 = vsel %vm5900_vm11, %v5899_v33, 0 }
0x130f   : > { %v5903_v44 = vand.u32 31, %v5901_v43  ;;  %v5902_v15 = vshrl.u32 %v5901_v43, 5 }
0x1311   : > { %v5904_v46 = vsub.s32 32, %v5903_v44  ;;  %v5906_v18 = vshll.u32 %v16601_v47, %v5903_v44  ;;  %v5909_v49 = vshll.u32 %v16599_v37, %v5903_v44  ;;  %v5912_v51 = vshll.u32 %v16597_v39, %v5903_v44 }
0x1312   : > { %v5915_v3 = vshll.u32 %v16591_v9, %v5903_v44  ;;  %v5918_v40 = vshll.u32 %v16593_v48, %v5903_v44  ;;  %vm5921_vm12 = vcmp.lt.s32.totalorder %v5902_v15, 1  ;;  %vm5924_vm13 = vcmp.lt.s32.totalorder %v5902_v15, 4 }
0x1313   : > { %v5907_v1 = vshrl.u32 %v16599_v37, %v5904_v46  ;;  %v5910_v35 = vshrl.u32 %v16597_v39, %v5904_v46  ;;  %v5913_v8 = vshrl.u32 %v16591_v9, %v5904_v46  ;;  %v5916_v42 = vshrl.u32 %v16593_v48, %v5904_v46 }
0x1314   : > { %v5919_v45 = vshrl.u32 %v16595_v63, %v5904_v46  ;;  %v5905_v54 = vshrl.u32 %v16601_v47, %v5904_v46  ;;  %vm5923_vm14 = vcmp.lt.s32.totalorder %v5902_v15, 3  ;;  %vm5922_vm15 = vcmp.lt.s32.totalorder %v5902_v15, 2 }
0x1315   : > { %v5908_v12 = vor.u32 %v5907_v1, %v5906_v18  ;;  %v5911_v30 = vor.u32 %v5910_v35, %v5909_v49  ;;  %v5914_v50 = vor.u32 %v5913_v8, %v5912_v51  ;;  %v5917_v52 = vor.u32 %v5916_v42, %v5915_v3 }
0x1316   : > { %v5920_v53 = vor.u32 %v5919_v45, %v5918_v40 }
0x1317   : > { %v5926_v58 = vsel %vm5924_vm13, %v5914_v50, 2102212464  ;;  %v5929_v61 = vsel %vm5921_vm12, %v5908_v12, %v5911_v30  ;;  %v5933_v0 = vsel %vm5921_vm12, %v5911_v30, %v5914_v50  ;;  %v5930_v2 = vsel %vm5924_vm13, %v5917_v52, 920167782 }
0x1318   : > { %v5934_v4 = vsel %vm5924_vm13, %v5920_v53, 1326507024  ;;  %v5925_v38 = vsel %vm5921_vm12, %v5905_v54, %v5908_v12  ;;  %v5931_v60 = vsel %vm5923_vm14, %v5914_v50, %v5930_v2  ;;  %v5927_v11 = vsel %vm5923_vm14, %v5911_v30, %v5926_v58 }
0x1319   : > { %v5935_v41 = vsel %vm5923_vm14, %v5917_v52, %v5934_v4  ;;  %v5932_v57 = vsel %vm5922_vm15, %v5929_v61, %v5931_v60  ;;  %v5928_v36 = vsel %vm5922_vm15, %v5925_v38, %v5927_v11  ;;  %vm5891_vm13 = vcmp.lt.s32.totalorder %v15218_v27, 0 }
0x131a   : > { %v5656_v56 = vpop.f32.mrf.mxu0  ;;  %v5936_v22 = vsel %vm5922_vm15, %v5933_v0, %v5935_v41  ;;  %v15239_v62 = vmul.u32.u64.low %v5937_v26, %v5932_v57  ;;  %v15240_v59 = vmul.u32.u64.high %v5937_v26, %v5932_v57, %v15239_v62  ;;  %v5944_v44 = vmul.u32 %v5937_v26, %v5928_v36 }
0x131b   : > { %v5657_v13 = vadd.f32 %v5656_v56, %v15016_v34  ;;  %v15236_v25 = vmul.u32.u64.low %v5937_v26, %v5936_v22  ;;  %v15237_v29 = vmul.u32.u64.high %v5937_v26, %v5936_v22, %v15236_v25  ;;  %vm5890_vm14 = vcmp.le.f32.partialorder %v5889_v32, 0.7853982 }
0x131c   : > { %v13460_v33 = vpop.f32.mrf.mxu0  ;;  %v5947_v43 = vadd.s32 1, %v15240_v59 }
0x131d   : > { %5841 = vrot.lane.b32.xlu0 %v5657_v13, %s14324_s20  ;;  %vm5946_vm11 = vc.u32 %v15237_v29, %v15239_v62  ;;  %v5945_v30 = vadd.s32 %v15239_v62, %v15237_v29  ;;  %v6717_v13 = vlaneseq  ;;  %v15253_v29 = vpop.permute.xlu1 %5743 }
0x131e   : > { %v5948_v16 = vsel %vm5946_vm11, %v5947_v43, %v15240_v59 }
0x131f   : > { %v5949_v18 = vadd.s32 %v5948_v16, %v5944_v44  ;;  %v15255_v62 = vshrl.u32 %v6717_v13, 7 }
0x1321   : > { %v5579_v46 = vpop.f32.mrf.mxu1  ;;  %v5950_v1 = vadd.s32 536870912, %v5949_v18  ;;  %v6739_v32 = vsub.s32 1, %v15255_v62 }
0x1322   : > { %v5580_v15 = vadd.f32 %v5579_v46, %v15016_v34  ;;  %v15257_v46 = vpop.permute.xlu1 %5759 }
0x1323   : > { %v13455_v49 = vpop.f32.mrf.mxu1  ;;  %v5951_v35 = vshrl.u32 %v5950_v1, 30 }
0x1324   : > { %5839 = vrot.lane.b32.xlu1 %v5580_v15, %s14324_s20  ;;  %v15263_v49 = vld [vmem:[%s16569_s6] sm:$0xff] }
0x1325   : > { %v5952_v51 = vshll.u32 %v5951_v35, 30  ;;  %v5975_v41 = vsub.s32 4, %v5951_v35 }
0x1327   : > { %v5953_v8 = vsub.s32 %v5949_v18, %v5952_v51  ;;  %v5976_v57 = vsel %vm5891_vm13, %v5975_v41, %v5951_v35  ;;  %v6719_v51 = vsub.s32 0, %v15255_v62  ;;  %v6835_v41 = vsub.s32 3, %v15255_v62 }
0x1328   : > { %v5978_v22 = vsel %vm5890_vm14, 0, %v5976_v57 }
0x1329   : > { %v5955_v3 = vsub.s32 0, %v5953_v8  ;;  %v5982_v25 = vadd.s32 3, %v5978_v22  ;;  %v6398_v33 = vand.u32 3, %v5978_v22 }
0x132b   : > { %v12691_v42 = vmin.u32 %v5955_v3, %v5953_v8  ;;  %v5983_v59 = vand.u32 3, %v5982_v25  ;;  %vm6403_vm11 = vcmp.eq.s32.totalorder %v6398_v33, 2  ;;  %vm6399_vm0 = vcmp.lt.s32.totalorder %v6398_v33, 2 }
0x132d   : > { %v5957_v40 = vclz %v12691_v42  ;;  %vm5988_vm15 = vcmp.eq.s32.totalorder %v5983_v59, 2  ;;  %v15270_v42 = vld [vmem:[%s16570_s7] sm:$0xff] }
0x132f   : > { %v12692_v45 = vadd.s32 4294967294, %v5957_v40  ;;  %v6787_v40 = vsub.s32 2, %v15255_v62 }
0x1331   : > { %vm12693_vm12 = vcmp.lt.s32.totalorder %v12692_v45, 0  ;;  %v15304_v57 = vrot.slane %v15270_v42, %v6787_v40 }
0x1332   : > { %v5960_v12 = vsel %vm12693_vm12, 0, %v12692_v45  ;;  %vm5985_vm12 = vcmp.eq.s32.totalorder %v5983_v59, 0 }
0x1333   : > { %v5961_v50 = vsub.s32 32, %v5960_v12  ;;  %v5965_v52 = vsub.s32 4294967266, %v5960_v12  ;;  %v5962_v53 = vshll.u32 %v5953_v8, %v5960_v12 }
0x1335   : > { %v5963_v54 = vshrl.u32 %v5945_v30, %v5961_v50  ;;  %v5966_v58 = vadd.s32 127, %v5965_v52  ;;  %v15278_v50 = vrot.slane %v15263_v49, %v6739_v32 }
0x1337   : > { %v5964_v61 = vor.u32 %v5963_v54, %v5962_v53  ;;  %v5967_v0 = vshll.u32 %v5966_v58, 23  ;;  %v15283_v54 = vpop.permute.xlu1 %5775 }
0x1339   : > { %v5968_v2 = vor.u32 4788187, %v5967_v0  ;;  %v5971_v26 = vcvt.s32.f32 %v5964_v61  ;;  %v15286_v61 = vrot.slane %v15270_v42, %v6719_v51  ;;  %v15289_v0 = vrot.slane %v15270_v42, %v6739_v32 }
0x133b   : > { %v5969_v4 = vand.u32 2147483647, %v5968_v2 }
0x133d   : > { %v5972_v38 = vmul.f32 %v5971_v26, %v5969_v4  ;;  %v15295_v26 = vrot.slane %v15263_v49, %v6787_v40 }
0x133f   : > { %v5973_v60 = vxor.u32 2147483648, %v5972_v38 }
0x1341   : > { %v5974_v56 = vsel %vm5891_vm13, %v5973_v60, %v5972_v38  ;;  %vm6400_vm13 = vcmp.eq.s32.totalorder %v6398_v33, 0 }
0x1342   : > { %v5977_v11 = vsel %vm5890_vm14, %v15218_v27, %v5974_v56  ;;  %vm5984_vm14 = vcmp.lt.s32.totalorder %v5983_v59, 2  ;;  %v15308_v59 = vpop.permute.xlu1 %5791 }
0x1343   : > { %14024 = vcosq.f32 %v5977_v11 }
0x1344   : > { %14026 = vsinq.f32 %v5977_v11 }
0x1350   : > { %v14025_v36 = vpop.eup %14024 }
0x1351   : > { %v14027_v43 = vpop.eup %14026  ;;  %v5989_v44 = vxor.u32 2147483648, %v14025_v36 }
0x1352   : > { %v5986_v16 = vxor.u32 2147483648, %v14027_v43 }
0x1353   : > { %v5990_v15 = vsel %vm5988_vm15, %v5989_v44, %v14027_v43  ;;  %v6405_v18 = vsel %vm6403_vm11, %v5989_v44, %v14027_v43 }
0x1354   : > { %v5987_v1 = vsel %vm5985_vm12, %v14025_v36, %v5986_v16  ;;  %v6402_v35 = vsel %vm6400_vm13, %v14025_v36, %v5986_v16  ;;  %v15314_v16 = vrot.slane %v15263_v49, %v6835_v41 }
0x1355   : > { %v5991_v8 = vsel %vm5984_vm14, %v5987_v1, %v5990_v15  ;;  %v6406_v3 = vsel %vm6399_vm0, %v6402_v35, %v6405_v18  ;;  %v6883_v15 = vsub.s32 4, %v15255_v62 }
0x1356   : > { %v15273_v45 = vsel %vm5981_vm4, nan, %v5991_v8  ;;  %v15275_v12 = vsel %vm5981_vm4, nan, %v6406_v3  ;;  %v15321_v8 = vrot.slane %v15270_v42, %v6835_v41 }
0x1357   : > { %v6721_v52 = vmul.f32 0.0, %v15275_v12  ;;  %v6729_v27 = vmul.f32 0.0, %v15273_v45 }
0x1359   : > { %v6725_v2 = vadd.f32 %v6721_v52, %v15273_v45  ;;  %v6733_v4 = vsub.f32 %v15275_v12, %v6729_v27  ;;  %v15323_v52 = vpop.permute.xlu1 %5747  ;;  %v15326_v27 = vrot.slane %v15263_v49, %v6883_v15 }
0x135a   : > { %v5733_v30 = vpop.f32.mrf.mxu1 }
0x135b   : > { %v5734_v53 = vadd.f32 %v5733_v30, %v15016_v34  ;;  %v6741_v34 = vmul.f32 %v15278_v50, %v6725_v2  ;;  %v6761_v38 = vmul.f32 %v6725_v2, %v15275_v12  ;;  %v6765_v60 = vmul.f32 %v6733_v4, %v15273_v45 }
0x135c   : > { %v13465_v58 = vpop.f32.mrf.mxu1  ;;  %v6773_v56 = vmul.f32 %v6733_v4, %v15275_v12  ;;  %v6777_v11 = vmul.f32 %v6725_v2, %v15273_v45  ;;  %v6753_v13 = vmul.f32 %v15289_v0, %v6733_v4  ;;  %v6931_v4 = vsub.s32 5, %v15255_v62 }
0x135d   : > { %5843 = vrot.lane.b32.xlu1 %v5734_v53, %s14324_s20  ;;  %v6745_v22 = vadd.f32 %v6741_v34, %v15286_v61  ;;  %v6769_v25 = vadd.f32 %v6765_v60, %v6761_v38  ;;  %v15335_v60 = vrot.slane %v15270_v42, %v6883_v15 }
0x135e   : > { %v6781_v33 = vsub.f32 %v6773_v56, %v6777_v11 }
0x135f   : > { %v6757_v36 = vadd.f32 %v6753_v13, %v6745_v22  ;;  %v6789_v43 = vmul.f32 %v15295_v26, %v6769_v25  ;;  %v6809_v44 = vmul.f32 %v6769_v25, %v15275_v12  ;;  %v6825_v32 = vmul.f32 %v6769_v25, %v15273_v45 }
0x1360   : > { %v6813_v18 = vmul.f32 %v6781_v33, %v15273_v45  ;;  %v6821_v1 = vmul.f32 %v6781_v33, %v15275_v12  ;;  %v6801_v51 = vmul.f32 %v15304_v57, %v6781_v33 }
0x1361   : > { %v6793_v35 = vadd.f32 %v6789_v43, %v6757_v36  ;;  %v15342_v43 = vrot.slane %v15263_v49, %v6931_v4 }
0x1362   : > { %v6817_v3 = vadd.f32 %v6813_v18, %v6809_v44  ;;  %v6829_v40 = vsub.f32 %v6821_v1, %v6825_v32  ;;  %v6979_v44 = vsub.s32 6, %v15255_v62  ;;  %v15347_v18 = vpop.permute.xlu1 %5807 }
0x1363   : > { %v6805_v30 = vadd.f32 %v6801_v51, %v6793_v35  ;;  %v15351_v51 = vrot.slane %v15270_v42, %v6931_v4 }
0x1364   : > { %v6837_v53 = vmul.f32 %v15314_v16, %v6817_v3  ;;  %v6857_v58 = vmul.f32 %v6817_v3, %v15275_v12  ;;  %v6861_v2 = vmul.f32 %v6829_v40, %v15273_v45  ;;  %v6869_v34 = vmul.f32 %v6829_v40, %v15275_v12 }
0x1365   : > { %v6873_v38 = vmul.f32 %v6817_v3, %v15273_v45  ;;  %v6849_v56 = vmul.f32 %v15321_v8, %v6829_v40  ;;  %v15363_v4 = vrot.slane %v15270_v42, %v6979_v44 }
0x1366   : > { %v6841_v41 = vadd.f32 %v6837_v53, %v6805_v30  ;;  %v6865_v11 = vadd.f32 %v6861_v2, %v6857_v58  ;;  %v15354_v53 = vrot.slane %v15263_v49, %v6979_v44 }
0x1367   : > { %v6877_v22 = vsub.f32 %v6869_v34, %v6873_v38  ;;  %v7027_v38 = vsub.s32 7, %v15255_v62 }
0x1368   : > { %v6853_v13 = vadd.f32 %v6849_v56, %v6841_v41  ;;  %v6885_v25 = vmul.f32 %v15326_v27, %v6865_v11  ;;  %v6905_v33 = vmul.f32 %v6865_v11, %v15275_v12  ;;  %v6921_v36 = vmul.f32 %v6865_v11, %v15273_v45 }
0x1369   : > { %v6909_v32 = vmul.f32 %v6877_v22, %v15273_v45  ;;  %v6917_v15 = vmul.f32 %v6877_v22, %v15275_v12  ;;  %v6897_v35 = vmul.f32 %v15335_v60, %v6877_v22 }
0x136a   : > { %v6889_v1 = vadd.f32 %v6885_v25, %v6853_v13  ;;  %v15366_v25 = vpop.permute.xlu1 %5763 }
0x136b   : > { %v6913_v3 = vadd.f32 %v6909_v32, %v6905_v33  ;;  %v6925_v40 = vsub.f32 %v6917_v15, %v6921_v36 }
0x136c   : > { %v6901_v30 = vadd.f32 %v6897_v35, %v6889_v1  ;;  %v15372_v1 = vrot.slane %v15263_v49, %v7027_v38 }
0x136d   : > { %v6933_v58 = vmul.f32 %v15342_v43, %v6913_v3  ;;  %v6953_v2 = vmul.f32 %v6913_v3, %v15275_v12  ;;  %v6957_v34 = vmul.f32 %v6925_v40, %v15273_v45  ;;  %v6965_v41 = vmul.f32 %v6925_v40, %v15275_v12 }
0x136e   : > { %v6969_v56 = vmul.f32 %v6913_v3, %v15273_v45  ;;  %v6945_v22 = vmul.f32 %v15351_v51, %v6925_v40 }
0x136f   : > { %v6937_v11 = vadd.f32 %v6933_v58, %v6901_v30  ;;  %v6961_v13 = vadd.f32 %v6957_v34, %v6953_v2  ;;  %v15378_v30 = vrot.slane %v15270_v42, %v7027_v38  ;;  %v14172_v42 = vld [vmem:[%s16568_s5] ss:$0 sm:$0xff] }
0x1370   : > { %v6973_v33 = vsub.f32 %v6965_v41, %v6969_v56  ;;  %v5824_v41 = vpop.permute.xlu1 %5823 }
0x1371   : > { %v6949_v36 = vadd.f32 %v6945_v22, %v6937_v11  ;;  %v6981_v32 = vmul.f32 %v15354_v53, %v6961_v13  ;;  %v7001_v15 = vmul.f32 %v6961_v13, %v15275_v12  ;;  %v7017_v62 = vmul.f32 %v6961_v13, %v15273_v45 }
0x1372   : > { %v7005_v44 = vmul.f32 %v6973_v33, %v15273_v45  ;;  %v7013_v35 = vmul.f32 %v6973_v33, %v15275_v12  ;;  %v6993_v40 = vmul.f32 %v15363_v4, %v6973_v33  ;;  %v15393_v12 = vadd.f32 %v14172_v42, %v14538_v23 }
0x1373   : > { %v6985_v3 = vadd.f32 %v6981_v32, %v6949_v36 }
0x1374   : > { %v7009_v58 = vadd.f32 %v7005_v44, %v7001_v15  ;;  %v7021_v2 = vsub.f32 %v7013_v35, %v7017_v62  ;;  %v15382_v13 = vpop.permute.xlu1 %5779 }
0x1375   : > { %v6997_v34 = vadd.f32 %v6993_v40, %v6985_v3 }
0x1376   : > { %v7029_v56 = vmul.f32 %v15372_v1, %v7009_v58  ;;  %v7041_v49 = vmul.f32 %v15378_v30, %v7021_v2 }
0x1378   : > { %v7033_v11 = vadd.f32 %v7029_v56, %v6997_v34  ;;  %v15398_v38 = vpop.permute.xlu1 %5795 }
0x137a   : > { %v7045_v22 = vadd.f32 %v7041_v49, %v7033_v11 }
0x137c   : > { %v15385_v45 = vadd.f32 %v7045_v22, %v15215_v24  ;;  %v1100_v24 = vadd.f32 %v15202_v28, %v14603_v19  ;;  %v15410_v32 = vpop.permute.xlu1 %5811  ;;  %v1023_v19 = vadd.f32 %v15202_v28, %v14605_v20 }
0x137e   : > { %13467 = vmatpush3.xpose.msk.msra.mxu0 %vm534_vm2, %v15385_v45  ;;  %v5851_v33 = vsel %vm534_vm2, %v1100_v24, %v15189_v14 }
0x137f   : > { %13476 = vmatprep.subr.mxu0 %v16587_v10  ;;  %v5856_v23 = vsel %vm5853_vm5, %v5851_v33, %v15191_v5 }
0x1380   : > { %v5861_v36 = vsel %vm5858_vm6, %v5856_v23, %v15193_v6  ;;  %v5850_v6 = vsel %vm534_vm2, %v1023_v19, %v15253_v29 }
0x1381   : > { %13469 = vmatmul.mubr.msk.f32.vlgmr.msra.gmra.mxu0 %vm534_vm2, %v15393_v12  ;;  %v5866_v15 = vsel %vm5863_vm7, %v5861_v36, %v15195_v55  ;;  %v5855_v55 = vsel %vm5853_vm5, %v5850_v6, %v15257_v46 }
0x1382   : > { %13478 = vmatprep.mubr.msk.f32.mxu0 %vm14302_vm1, %v16587_v10  ;;  %v5871_v62 = vsel %vm16605_vm8, %v5866_v15, %v15197_v17  ;;  %v15430_v17 = vpop.permute.xlu1 %5827  ;;  %v5860_v20 = vsel %vm5858_vm6, %v5855_v55, %v15283_v54 }
0x1383   : > { %v5876_v14 = vsel %vm16604_vm9, %v5871_v62, %v15208_v7  ;;  %v5865_v40 = vsel %vm5863_vm7, %v5860_v20, %v15308_v59 }
0x1384   : > { %v5870_v29 = vsel %vm16605_vm8, %v5865_v40, %v15347_v18 }
0x1385   : > { %v5875_v2 = vsel %vm16604_vm9, %v5870_v29, %v5824_v41 }
0x138f   : > { %v5842_v44 = vpop.permute.xlu0 %5841 }
0x1390   : > { %v15421_v5 = vsel %vm16603_vm10, %v5876_v14, %v5842_v44 }
0x1391   : > { %v15426_v35 = vmul.f32 0.3926991, %v15421_v5 }
0x1393   : > { %v16590_v7 = vand.u32 2147483647, %v15426_v35  ;;  %v6100_v3 = vand.u32 2139095040, %v15426_v35 }
0x1395   : > { %v6101_v58 = vshrl.u32 %v6100_v3, 23  ;;  %v6104_v56 = vand.u32 8388607, %v16590_v7 }
0x1396   : > { %v5840_v34 = vpop.permute.xlu1 %5839 }
0x1397   : > { %v12698_v46 = vadd.s32 4294967169, %v6101_v58  ;;  %v15444_v54 = vsel %vm16603_vm10, %v5875_v2, %v5840_v34  ;;  %v6105_v22 = vor.u32 8388608, %v6104_v56 }
0x1398   : > { %v15447_v11 = vmul.f32 0.3926991, %v15444_v54 }
0x1399   : > { %v6107_v49 = vadd.s32 1, %v12698_v46  ;;  %v6145_v36 = vshll.u32 %v6105_v22, 8 }
0x139a   : > { %v5996_v59 = vand.u32 2139095040, %v15447_v11  ;;  %v16589_v18 = vand.u32 2147483647, %v15447_v11 }
0x139b   : > { %vm6108_vm0 = vcmp.gt.s32.totalorder %v6107_v49, 0 }
0x139c   : > { %v6109_v42 = vsel %vm6108_vm0, %v6107_v49, 0  ;;  %v5997_v41 = vshrl.u32 %v5996_v59, 23  ;;  %v15453_v62 = vand.u32 8388607, %v16589_v18 }
0x139d   : > { %v6111_v24 = vand.u32 31, %v6109_v42  ;;  %v6110_v33 = vshrl.u32 %v6109_v42, 5 }
0x139e   : > { %v12694_v15 = vadd.s32 4294967169, %v5997_v41 }
0x139f   : > { %v6112_v23 = vsub.s32 32, %v6111_v24  ;;  %v6114_v19 = vshll.u32 %v16601_v47, %v6111_v24  ;;  %v6117_v14 = vshll.u32 %v16599_v37, %v6111_v24  ;;  %v6120_v44 = vshll.u32 %v16597_v39, %v6111_v24 }
0x13a0   : > { %v6123_v6 = vshll.u32 %v16591_v9, %v6111_v24  ;;  %v6126_v40 = vshll.u32 %v16593_v48, %v6111_v24  ;;  %vm6129_vm4 = vcmp.lt.s32.totalorder %v6110_v33, 1  ;;  %v6003_v49 = vadd.s32 1, %v12694_v15 }
0x13a1   : > { %v6115_v55 = vshrl.u32 %v16599_v37, %v6112_v23  ;;  %v6118_v20 = vshrl.u32 %v16597_v39, %v6112_v23  ;;  %v6121_v3 = vshrl.u32 %v16591_v9, %v6112_v23  ;;  %v6113_v29 = vshrl.u32 %v16601_v47, %v6112_v23 }
0x13a2   : > { %v6124_v58 = vshrl.u32 %v16593_v48, %v6112_v23  ;;  %v6127_v2 = vshrl.u32 %v16595_v63, %v6112_v23  ;;  %vm6131_vm15 = vcmp.lt.s32.totalorder %v6110_v33, 3  ;;  %vm6132_vm11 = vcmp.lt.s32.totalorder %v6110_v33, 4 }
0x13a3   : > { %v6116_v34 = vor.u32 %v6115_v55, %v6114_v19  ;;  %v6119_v46 = vor.u32 %v6118_v20, %v6117_v14  ;;  %v6122_v56 = vor.u32 %v6121_v3, %v6120_v44  ;;  %vm6004_vm12 = vcmp.gt.s32.totalorder %v6003_v49, 0 }
0x13a4   : > { %v6125_v59 = vor.u32 %v6124_v58, %v6123_v6  ;;  %v6128_v22 = vor.u32 %v6127_v2, %v6126_v40  ;;  %vm6130_vm13 = vcmp.lt.s32.totalorder %v6110_v33, 2  ;;  %v6005_v63 = vsel %vm6004_vm12, %v6003_v49, 0 }
0x13a5   : > { %v6133_v42 = vsel %vm6129_vm4, %v6113_v29, %v6116_v34  ;;  %v6134_v41 = vsel %vm6132_vm11, %v6122_v56, 2102212464  ;;  %v6137_v10 = vsel %vm6129_vm4, %v6116_v34, %v6119_v46  ;;  %v6141_v18 = vsel %vm6129_vm4, %v6119_v46, %v6122_v56 }
0x13a6   : > { %v6135_v24 = vsel %vm6131_vm15, %v6119_v46, %v6134_v41  ;;  %v6138_v7 = vsel %vm6132_vm11, %v6125_v59, 920167782  ;;  %v6142_v9 = vsel %vm6132_vm11, %v6128_v22, 1326507024  ;;  %v6007_v3 = vand.u32 31, %v6005_v63 }
0x13a7   : > { %v6139_v48 = vsel %vm6131_vm15, %v6122_v56, %v6138_v7  ;;  %v6143_v23 = vsel %vm6131_vm15, %v6125_v59, %v6142_v9  ;;  %v6136_v19 = vsel %vm6130_vm13, %v6133_v42, %v6135_v24  ;;  %v6001_v40 = vor.u32 8388608, %v15453_v62 }
0x13a8   : > { %v6140_v14 = vsel %vm6130_vm13, %v6137_v10, %v6139_v48  ;;  %v6144_v44 = vsel %vm6130_vm13, %v6141_v18, %v6143_v23  ;;  %v6152_v29 = vmul.u32 %v6145_v36, %v6136_v19  ;;  %v6006_v58 = vshrl.u32 %v6005_v63, 5 }
0x13a9   : > { %v15466_v15 = vmul.u32.u64.low %v6145_v36, %v6144_v44  ;;  %v15467_v6 = vmul.u32.u64.high %v6145_v36, %v6144_v44, %v15466_v15  ;;  %v15469_v55 = vmul.u32.u64.low %v6145_v36, %v6140_v14  ;;  %v15470_v20 = vmul.u32.u64.high %v6145_v36, %v6140_v14, %v15469_v55 }
0x13aa   : > { %v6008_v2 = vsub.s32 32, %v6007_v3  ;;  %v6010_v7 = vshll.u32 %v16601_v47, %v6007_v3  ;;  %v6013_v9 = vshll.u32 %v16599_v37, %v6007_v3  ;;  %v6016_v48 = vshll.u32 %v16597_v39, %v6007_v3 }
0x13ab   : > { %vm6154_vm14 = vc.u32 %v15467_v6, %v15469_v55  ;;  %v6155_v10 = vadd.s32 1, %v15470_v20  ;;  %v16614_v34 = vmov 2102212464   ;;  %v16615_v46 = vmov 920167782  }
0x13ac   : > { %v6011_v18 = vshrl.u32 %v16599_v37, %v6008_v2  ;;  %v6014_v33 = vshrl.u32 %v16597_v39, %v6008_v2  ;;  %v6017_v62 = vshrl.u32 %v16614_v34, %v6008_v2  ;;  %v6019_v63 = vshll.u32 %v16614_v34, %v6007_v3 }
0x13ad   : > { %v6156_v36 = vsel %vm6154_vm14, %v6155_v10, %v15470_v20  ;;  %v6020_v56 = vshrl.u32 %v16615_v46, %v6008_v2  ;;  %v6022_v49 = vshll.u32 %v16615_v46, %v6007_v3  ;;  %v16616_v59 = vmov 1326507024  }
0x13ae   : > { %v6023_v22 = vshrl.u32 %v16616_v59, %v6008_v2  ;;  %v6157_v42 = vadd.s32 %v6156_v36, %v6152_v29  ;;  %v6012_v41 = vor.u32 %v6011_v18, %v6010_v7  ;;  %v6015_v24 = vor.u32 %v6014_v33, %v6013_v9 }
0x13af   : > { %v6018_v23 = vor.u32 %v6017_v62, %v6016_v48  ;;  %v6021_v19 = vor.u32 %v6020_v56, %v6019_v63  ;;  %vm6025_vm0 = vcmp.lt.s32.totalorder %v6006_v58, 1  ;;  %v6041_v44 = vshll.u32 %v6001_v40, 8 }
0x13b0   : > { %v6024_v14 = vor.u32 %v6023_v22, %v6022_v49  ;;  %v6158_v15 = vadd.s32 536870912, %v6157_v42  ;;  %vm6026_vm4 = vcmp.lt.s32.totalorder %v6006_v58, 2  ;;  %vm6028_vm15 = vcmp.lt.s32.totalorder %v6006_v58, 4 }
0x13b1   : > { %v6033_v39 = vsel %vm6025_vm0, %v6012_v41, %v6015_v24  ;;  %vm6027_vm11 = vcmp.lt.s32.totalorder %v6006_v58, 3  ;;  %v6034_v20 = vsel %vm6028_vm15, %v6021_v19, 920167782  ;;  %v6037_v10 = vsel %vm6025_vm0, %v6015_v24, %v6018_v23 }
0x13b2   : > { %v6038_v3 = vsel %vm6028_vm15, %v6024_v14, 1326507024  ;;  %v6159_v37 = vshrl.u32 %v6158_v15, 30  ;;  %v6030_v47 = vsel %vm6028_vm15, %v6018_v23, 2102212464  ;;  %v6035_v29 = vsel %vm6027_vm11, %v6018_v23, %v6034_v20 }
0x13b3   : > { %v6039_v7 = vsel %vm6027_vm11, %v6021_v19, %v6038_v3  ;;  %v16617_v9 = vmov 683565275   ;;  %v6036_v18 = vsel %vm6026_vm4, %v6033_v39, %v6035_v29  ;;  %v6031_v56 = vsel %vm6027_vm11, %v6015_v24, %v6030_v47 }
0x13b4   : > { %v6009_v48 = vshrl.u32 %v16617_v9, %v6008_v2  ;;  %v6040_v40 = vsel %vm6026_vm4, %v6037_v10, %v6039_v7  ;;  %v6160_v33 = vshll.u32 %v6159_v37, 30  ;;  %vm6099_vm14 = vcmp.lt.s32.totalorder %v15426_v35, 0 }
0x13b5   : > { %v15493_v62 = vmul.u32.u64.low %v6041_v44, %v6040_v40  ;;  %v15494_v63 = vmul.u32.u64.high %v6041_v44, %v6040_v40, %v15493_v62  ;;  %v15497_v49 = vmul.u32.u64.low %v6041_v44, %v6036_v18  ;;  %v15498_v22 = vmul.u32.u64.high %v6041_v44, %v6036_v18, %v15497_v49 }
0x13b6   : > { %v6029_v36 = vsel %vm6025_vm0, %v6009_v48, %v6012_v41  ;;  %v6161_v14 = vsub.s32 %v6157_v42, %v6160_v33  ;;  %v6153_v42 = vadd.s32 %v15469_v55, %v15467_v6  ;;  %v6183_v55 = vsub.s32 4, %v6159_v37 }
0x13b7   : > { %v6032_v23 = vsel %vm6026_vm4, %v6029_v36, %v6031_v56  ;;  %vm6050_vm12 = vc.u32 %v15494_v63, %v15497_v49  ;;  %v6051_v39 = vadd.s32 1, %v15498_v22  ;;  %vm5995_vm15 = vcmp.lt.s32.totalorder %v15447_v11, 0 }
0x13b8   : > { %v6163_v15 = vsub.s32 0, %v6161_v14  ;;  %v6048_v19 = vmul.u32 %v6041_v44, %v6032_v23  ;;  %v1177_v44 = vadd.f32 %v15202_v28, %v14609_v31 }
0x13b9   : > { %v6052_v20 = vsel %vm6050_vm12, %v6051_v39, %v15498_v22 }
0x13ba   : > { %v12699_v2 = vmin.u32 %v6163_v15, %v6161_v14  ;;  %v6053_v3 = vadd.s32 %v6052_v20, %v6048_v19  ;;  %v5852_v15 = vsel %vm534_vm2, %v1177_v44, %v15323_v52 }
0x13bb   : > { %v5857_v6 = vsel %vm5853_vm5, %v5852_v15, %v15366_v25 }
0x13bc   : > { %v6165_v10 = vclz %v12699_v2  ;;  %v6054_v41 = vadd.s32 536870912, %v6053_v3 }
0x13be   : > { %v12700_v29 = vadd.s32 4294967294, %v6165_v10  ;;  %v6055_v24 = vshrl.u32 %v6054_v41, 30  ;;  %v6184_v10 = vsel %vm6099_vm14, %v6183_v55, %v6159_v37 }
0x13c0   : > { %vm12701_vm13 = vcmp.lt.s32.totalorder %v12700_v29, 0  ;;  %v6056_v48 = vshll.u32 %v6055_v24, 30 }
0x13c1   : > { %v6168_v47 = vsel %vm12701_vm13, 0, %v12700_v29 }
0x13c2   : > { %v6169_v58 = vsub.s32 32, %v6168_v47  ;;  %v6173_v7 = vsub.s32 4294967266, %v6168_v47  ;;  %v6170_v18 = vshll.u32 %v6161_v14, %v6168_v47  ;;  %v6057_v62 = vsub.s32 %v6053_v3, %v6056_v48 }
0x13c3   : > { %v5862_v14 = vsel %vm5858_vm6, %v5857_v6, %v15382_v13  ;;  %v6079_v13 = vsub.s32 4, %v6055_v24 }
0x13c4   : > { %v6171_v40 = vshrl.u32 %v6153_v42, %v6169_v58  ;;  %v6174_v33 = vadd.s32 127, %v6173_v7  ;;  %v6059_v22 = vsub.s32 0, %v6057_v62  ;;  %v5867_v31 = vsel %vm5863_vm7, %v5862_v14, %v15398_v38 }
0x13c5   : > { %v5872_v20 = vsel %vm16605_vm8, %v5867_v31, %v15410_v32  ;;  %v16618_v38 = vand.u32 2147483647, %v15426_v35  ;;  %v6049_v7 = vadd.s32 %v15497_v49, %v15494_v63 }
0x13c6   : > { %v6172_v36 = vor.u32 %v6171_v40, %v6170_v18  ;;  %v6175_v56 = vshll.u32 %v6174_v33, 23  ;;  %v12695_v39 = vmin.u32 %v6059_v22, %v6057_v62  ;;  %v5877_v25 = vsel %vm16604_vm9, %v5872_v20, %v15430_v17 }
0x13c7   : > { %vm6098_vm0 = vcmp.le.f32.partialorder %v16618_v38, 0.7853982  ;;  %v6080_v40 = vsel %vm5995_vm15, %v6079_v13, %v6055_v24 }
0x13c8   : > { %v6176_v23 = vor.u32 4788187, %v6175_v56  ;;  %v6179_v19 = vcvt.s32.f32 %v6172_v36  ;;  %v6061_v28 = vclz %v12695_v39  ;;  %v6186_v58 = vsel %vm6098_vm0, 0, %v6184_v10 }
0x13c9   : > { %v6190_v22 = vadd.s32 3, %v6186_v58  ;;  %v6604_v14 = vand.u32 3, %v6186_v58 }
0x13ca   : > { %v6177_v2 = vand.u32 2147483647, %v6176_v23  ;;  %v12696_v3 = vadd.s32 4294967294, %v6061_v28  ;;  %v16619_v23 = vand.u32 2147483647, %v15447_v11 }
0x13cb   : > { %vm6605_vm13 = vcmp.lt.s32.totalorder %v6604_v14, 2  ;;  %vm6609_vm9 = vcmp.eq.s32.totalorder %v6604_v14, 2 }
0x13cc   : > { %v6180_v52 = vmul.f32 %v6179_v19, %v6177_v2  ;;  %vm12697_vm4 = vcmp.lt.s32.totalorder %v12696_v3, 0  ;;  %vm15537_vm11 = vcmp.le.f32.partialorder %v16619_v23, 0.7853982  ;;  %v6191_v2 = vand.u32 3, %v6190_v22 }
0x13cd   : > { %v6064_v17 = vsel %vm12697_vm4, 0, %v12696_v3  ;;  %v6082_v55 = vsel %vm15537_vm11, 0, %v6080_v40  ;;  %v16623_v40 = vmov 2131351028  }
0x13ce   : > { %v6181_v41 = vxor.u32 2147483648, %v6180_v52  ;;  %v6065_v48 = vsub.s32 32, %v6064_v17  ;;  %v6069_v18 = vsub.s32 4294967266, %v6064_v17  ;;  %v6066_v44 = vshll.u32 %v6057_v62, %v6064_v17 }
0x13cf   : > { %v5844_v29 = vpop.permute.xlu1 %5843  ;;  %v6086_v20 = vadd.s32 3, %v6082_v55  ;;  %vm6192_vm4 = vcmp.lt.s32.totalorder %v6191_v2, 2  ;;  %vm6196_vm8 = vcmp.eq.s32.totalorder %v6191_v2, 2  ;;  %v15549_v13 = vand.u32 3, %v6082_v55 }
0x13d0   : > { %v15522_v47 = vsel %vm16603_vm10, %v5877_v25, %v5844_v29  ;;  %v6182_v42 = vsel %vm6099_vm14, %v6181_v41, %v6180_v52  ;;  %v6067_v36 = vshrl.u32 %v6049_v7, %v6065_v48  ;;  %v6070_v56 = vadd.s32 127, %v6069_v18 }
0x13d1   : > { %v15527_v32 = vmul.f32 0.3926991, %v15522_v47  ;;  %v6185_v37 = vsel %vm6098_vm0, %v15426_v35, %v6182_v42  ;;  %vm6606_vm14 = vcmp.eq.s32.totalorder %v6604_v14, 0  ;;  %vm6189_vm0 = vweird.f32 %v15426_v35 }
0x13d2   : > { %14028 = vcosq.f32 %v6185_v37  ;;  %v6068_v63 = vor.u32 %v6067_v36, %v6066_v44  ;;  %v6071_v49 = vshll.u32 %v6070_v56, 23  ;;  %vm6193_vm10 = vcmp.eq.s32.totalorder %v6191_v2, 0 }
0x13d3   : > { %v6204_v33 = vand.u32 2139095040, %v15527_v32  ;;  %14030 = vsinq.f32 %v6185_v37  ;;  %v6201_v24 = vand.u32 2147483647, %v15527_v32  ;;  %v15547_v41 = vand.u32 3, %v6086_v20 }
0x13d4   : > { %v6072_v62 = vor.u32 4788187, %v6071_v49  ;;  %v6075_v28 = vcvt.s32.f32 %v6068_v63  ;;  %v16622_v48 = vmov 2475754826  }
0x13d5   : > { %v6205_v15 = vshrl.u32 %v6204_v33, 23  ;;  %v6208_v52 = vand.u32 8388607, %v6201_v24 }
0x13d6   : > { %v6073_v31 = vand.u32 2147483647, %v6072_v62 }
0x13d7   : > { %v12702_v39 = vadd.s32 4294967169, %v6205_v15  ;;  %v6209_v38 = vor.u32 8388608, %v6208_v52 }
0x13d8   : > { %v6076_v25 = vmul.f32 %v6075_v28, %v6073_v31 }
0x13d9   : > { %v6211_v19 = vadd.s32 1, %v12702_v39 }
0x13da   : > { %v6077_v29 = vxor.u32 2147483648, %v6076_v25 }
0x13db   : > { %vm6212_vm12 = vcmp.gt.s32.totalorder %v6211_v19, 0 }
0x13dc   : > { %v6213_v10 = vsel %vm6212_vm12, %v6211_v19, 0  ;;  %v6078_v7 = vsel %vm5995_vm15, %v6077_v29, %v6076_v25  ;;  %vm6092_vm15 = vcmp.eq.s32.totalorder %v15547_v41, 2  ;;  %vm6089_vm12 = vcmp.eq.s32.totalorder %v15547_v41, 0 }
0x13dd   : > { %v6215_v3 = vand.u32 31, %v6213_v10  ;;  %v15551_v42 = vshrl.u32 %v6213_v10, 5  ;;  %v6081_v22 = vsel %vm15537_vm11, %v15447_v11, %v6078_v7  ;;  %vm6506_vm11 = vcmp.eq.s32.totalorder %v15549_v13, 2 }
0x13de   : > { %14032 = vcosq.f32 %v6081_v22 }
0x13df   : > { %v6216_v58 = vsub.s32 32, %v6215_v3  ;;  %v6218_v17 = vshll.u32 %v16617_v9, %v6215_v3  ;;  %v14029_v37 = vpop.eup %14028  ;;  %v6221_v18 = vshll.u32 %v16622_v48, %v6215_v3  ;;  %v6224_v33 = vshll.u32 %v16623_v40, %v6215_v3 }
0x13e0   : > { %v6227_v44 = vshll.u32 %v16614_v34, %v6215_v3  ;;  %v14031_v36 = vpop.eup %14030  ;;  %v6197_v56 = vxor.u32 2147483648, %v14029_v37  ;;  %v6230_v23 = vshll.u32 %v16615_v46, %v6215_v3  ;;  %14034 = vsinq.f32 %v6081_v22 }
0x13e1   : > { %v6219_v15 = vshrl.u32 %v16622_v48, %v6216_v58  ;;  %v6194_v63 = vxor.u32 2147483648, %v14031_v36  ;;  %v6222_v49 = vshrl.u32 %v16623_v40, %v6216_v58  ;;  %v6225_v55 = vshrl.u32 %v16614_v34, %v6216_v58 }
0x13e2   : > { %v6198_v39 = vsel %vm6196_vm8, %v6197_v56, %v14031_v36  ;;  %v6611_v62 = vsel %vm6609_vm9, %v6197_v56, %v14031_v36  ;;  %v6228_v10 = vshrl.u32 %v16615_v46, %v6216_v58  ;;  %v6231_v34 = vshrl.u32 %v16616_v59, %v6216_v58 }
0x13e3   : > { %v6220_v19 = vor.u32 %v6219_v15, %v6218_v17  ;;  %v6195_v31 = vsel %vm6193_vm10, %v14029_v37, %v6194_v63  ;;  %v6608_v6 = vsel %vm6606_vm14, %v14029_v37, %v6194_v63  ;;  %v6223_v28 = vor.u32 %v6222_v49, %v6221_v18 }
0x13e4   : > { %v6226_v20 = vor.u32 %v6225_v55, %v6224_v33  ;;  %v6199_v52 = vsel %vm6192_vm4, %v6195_v31, %v6198_v39  ;;  %v6612_v25 = vsel %vm6605_vm13, %v6608_v6, %v6611_v62  ;;  %vm6233_vm8 = vcmp.lt.s32.totalorder %v15551_v42, 1 }
0x13e5   : > { %v15576_v3 = vsel %vm6189_vm0, nan, %v6199_v52  ;;  %v15580_v29 = vsel %vm6189_vm0, nan, %v6612_v25  ;;  %v15583_v17 = vshll.u32 %v6209_v38, 8  ;;  %v6229_v37 = vor.u32 %v6228_v10, %v6227_v44 }
0x13e6   : > { %v6723_v2 = vmul.f32 0.0, %v15580_v29  ;;  %v6731_v14 = vmul.f32 0.0, %v15576_v3  ;;  %v6232_v46 = vor.u32 %v6231_v34, %v6230_v23  ;;  %v6217_v59 = vshrl.u32 %v16617_v9, %v6216_v58 }
0x13e7   : > { %vm6235_vm9 = vcmp.lt.s32.totalorder %v15551_v42, 3  ;;  %vm6236_vm10 = vcmp.lt.s32.totalorder %v15551_v42, 4  ;;  %v6241_v35 = vsel %vm6233_vm8, %v6220_v19, %v6223_v28  ;;  %vm6503_vm13 = vcmp.eq.s32.totalorder %v15549_v13, 0 }
0x13e8   : > { %v6727_v7 = vadd.f32 %v6723_v2, %v15576_v3  ;;  %v6735_v38 = vsub.f32 %v15580_v29, %v6731_v14  ;;  %v6238_v48 = vsel %vm6236_vm10, %v6226_v20, 2102212464  ;;  %v6242_v18 = vsel %vm6236_vm10, %v6229_v37, 920167782 }
0x13e9   : > { %vm6234_vm14 = vcmp.lt.s32.totalorder %v15551_v42, 2  ;;  %v6237_v9 = vsel %vm6233_vm8, %v6217_v59, %v6220_v19  ;;  %v6243_v58 = vsel %vm6235_vm9, %v6226_v20, %v6242_v18  ;;  %v6246_v40 = vsel %vm6236_vm10, %v6232_v46, 1326507024 }
0x13ea   : > { %v6743_v33 = vmul.f32 %v15278_v50, %v6727_v7  ;;  %v6763_v44 = vmul.f32 %v6727_v7, %v15580_v29  ;;  %v6767_v36 = vmul.f32 %v6735_v38, %v15576_v3  ;;  %v6245_v56 = vsel %vm6233_vm8, %v6223_v28, %v6226_v20 }
0x13eb   : > { %v6775_v22 = vmul.f32 %v6735_v38, %v15580_v29  ;;  %v6779_v15 = vmul.f32 %v6727_v7, %v15576_v3  ;;  %vm6088_vm0 = vcmp.lt.s32.totalorder %v15547_v41, 2  ;;  %vm6502_vm4 = vcmp.lt.s32.totalorder %v15549_v13, 2  ;;  %v14033_v20 = vpop.eup %14032 }
0x13ec   : > { %v6239_v23 = vsel %vm6235_vm9, %v6223_v28, %v6238_v48  ;;  %v6244_v63 = vsel %vm6234_vm14, %v6241_v35, %v6243_v58  ;;  %v6747_v49 = vadd.f32 %v6743_v33, %v15286_v61  ;;  %v6755_v55 = vmul.f32 %v15289_v0, %v6735_v38 }
0x13ed   : > { %v6771_v39 = vadd.f32 %v6767_v36, %v6763_v44  ;;  %vm6085_vm8 = vweird.f32 %v15447_v11  ;;  %v6247_v62 = vsel %vm6235_vm9, %v6229_v37, %v6246_v40  ;;  %v6783_v19 = vsub.f32 %v6775_v22, %v6779_v15  ;;  %v14035_v2 = vpop.eup %14034 }
0x13ee   : > { %v6248_v31 = vsel %vm6234_vm14, %v6245_v56, %v6247_v62  ;;  %v15624_v6 = vmul.u32.u64.low %v15583_v17, %v6244_v63  ;;  %v15625_v28 = vmul.u32.u64.high %v15583_v17, %v6244_v63, %v15624_v6  ;;  %v6759_v52 = vadd.f32 %v6755_v55, %v6747_v49 }
0x13ef   : > { %v6791_v25 = vmul.f32 %v15295_v26, %v6771_v39  ;;  %v6811_v10 = vmul.f32 %v6771_v39, %v15580_v29  ;;  %v6827_v34 = vmul.f32 %v6771_v39, %v15576_v3  ;;  %v6803_v14 = vmul.f32 %v15304_v57, %v6783_v19 }
0x13f0   : > { %v6815_v37 = vmul.f32 %v6783_v19, %v15576_v3  ;;  %v6823_v46 = vmul.f32 %v6783_v19, %v15580_v29  ;;  %v6093_v59 = vxor.u32 2147483648, %v14033_v20  ;;  %v6090_v7 = vxor.u32 2147483648, %v14035_v2 }
0x13f1   : > { %v6795_v35 = vadd.f32 %v6791_v25, %v6759_v52  ;;  %v15635_v38 = vmul.u32.u64.low %v15583_v17, %v6248_v31  ;;  %v15636_v48 = vmul.u32.u64.high %v15583_v17, %v6248_v31, %v15635_v38  ;;  %v15648_v22 = vsel %vm6234_vm14, %v6237_v9, %v6239_v23 }
0x13f2   : > { %v6819_v18 = vadd.f32 %v6815_v37, %v6811_v10  ;;  %v6831_v58 = vsub.f32 %v6823_v46, %v6827_v34  ;;  %v6094_v40 = vsel %vm6092_vm15, %v6093_v59, %v14035_v2  ;;  %v6508_v33 = vsel %vm6506_vm11, %v6093_v59, %v14035_v2 }
0x13f3   : > { %v6807_v44 = vadd.f32 %v6803_v14, %v6795_v35  ;;  %v6091_v36 = vsel %vm6089_vm12, %v14033_v20, %v6090_v7  ;;  %v6505_v56 = vsel %vm6503_vm13, %v14033_v20, %v6090_v7  ;;  %v6256_v41 = vmul.u32 %v15583_v17, %v15648_v22 }
0x13f4   : > { %v6839_v15 = vmul.f32 %v15314_v16, %v6819_v18  ;;  %v6851_v63 = vmul.f32 %v15321_v8, %v6831_v58  ;;  %v6859_v49 = vmul.f32 %v6819_v18, %v15580_v29  ;;  %v6863_v55 = vmul.f32 %v6831_v58, %v15576_v3 }
0x13f5   : > { %v6871_v39 = vmul.f32 %v6831_v58, %v15580_v29  ;;  %v6875_v62 = vmul.f32 %v6819_v18, %v15576_v3  ;;  %v6095_v19 = vsel %vm6088_vm0, %v6091_v36, %v6094_v40  ;;  %v6509_v42 = vsel %vm6502_vm4, %v6505_v56, %v6508_v33 }
0x13f6   : > { %v6843_v9 = vadd.f32 %v6839_v15, %v6807_v44  ;;  %v6867_v23 = vadd.f32 %v6863_v55, %v6859_v49  ;;  %v15662_v31 = vsel %vm6085_vm8, nan, %v6095_v19  ;;  %v15666_v20 = vsel %vm6085_vm8, nan, %v6509_v42 }
0x13f7   : > { %v6879_v52 = vsub.f32 %v6871_v39, %v6875_v62  ;;  %v6722_v25 = vmul.f32 0.0, %v15666_v20  ;;  %v6730_v10 = vmul.f32 0.0, %v15662_v31  ;;  %v6259_v59 = vadd.s32 1, %v15625_v28 }
0x13f8   : > { %v6855_v13 = vadd.f32 %v6851_v63, %v6843_v9  ;;  %v6887_v34 = vmul.f32 %v15326_v27, %v6867_v23  ;;  %v6907_v2 = vmul.f32 %v6867_v23, %v15580_v29  ;;  %v6923_v14 = vmul.f32 %v6867_v23, %v15576_v3 }
0x13f9   : > { %v6911_v37 = vmul.f32 %v6879_v52, %v15576_v3  ;;  %v6919_v11 = vmul.f32 %v6879_v52, %v15580_v29  ;;  %v6726_v46 = vadd.f32 %v6722_v25, %v15662_v31  ;;  %v6899_v7 = vmul.f32 %v15335_v60, %v6879_v52 }
0x13fa   : > { %v6891_v35 = vadd.f32 %v6887_v34, %v6855_v13  ;;  %v6734_v17 = vsub.f32 %v15666_v20, %v6730_v10  ;;  %vm6258_vm9 = vc.u32 %v15636_v48, %v15624_v6  ;;  %vm6203_vm15 = vcmp.lt.s32.totalorder %v15527_v32, 0 }
0x13fb   : > { %v6915_v38 = vadd.f32 %v6911_v37, %v6907_v2  ;;  %v6927_v18 = vsub.f32 %v6919_v11, %v6923_v14  ;;  %v6742_v58 = vmul.f32 %v15278_v50, %v6726_v46  ;;  %v6762_v40 = vmul.f32 %v6726_v46, %v15666_v20 }
0x13fc   : > { %v6903_v33 = vadd.f32 %v6899_v7, %v6891_v35  ;;  %v6754_v44 = vmul.f32 %v15289_v0, %v6734_v17  ;;  %v6766_v36 = vmul.f32 %v6734_v17, %v15662_v31  ;;  %v6774_v56 = vmul.f32 %v6734_v17, %v15666_v20 }
0x13fd   : > { %v6935_v22 = vmul.f32 %v15342_v43, %v6915_v38  ;;  %v6947_v15 = vmul.f32 %v15351_v51, %v6927_v18  ;;  %v6955_v63 = vmul.f32 %v6915_v38, %v15580_v29  ;;  %v6959_v49 = vmul.f32 %v6927_v18, %v15576_v3 }
0x13fe   : > { %v6967_v55 = vmul.f32 %v6927_v18, %v15580_v29  ;;  %v6971_v39 = vmul.f32 %v6915_v38, %v15576_v3  ;;  %v6746_v62 = vadd.f32 %v6742_v58, %v15286_v61  ;;  %v6770_v19 = vadd.f32 %v6766_v36, %v6762_v40 }
0x13ff   : > { %v6939_v42 = vadd.f32 %v6935_v22, %v6903_v33  ;;  %v6963_v9 = vadd.f32 %v6959_v49, %v6955_v63  ;;  %v6778_v23 = vmul.f32 %v6726_v46, %v15662_v31  ;;  %v6260_v52 = vsel %vm6258_vm9, %v6259_v59, %v15625_v28 }
0x1400   : > { %v6975_v25 = vsub.f32 %v6967_v55, %v6971_v39  ;;  %v6758_v10 = vadd.f32 %v6754_v44, %v6746_v62  ;;  %v6790_v13 = vmul.f32 %v15295_v26, %v6770_v19  ;;  %v6810_v34 = vmul.f32 %v6770_v19, %v15666_v20 }
0x1401   : > { %v6951_v2 = vadd.f32 %v6947_v15, %v6939_v42  ;;  %v6983_v14 = vmul.f32 %v15354_v53, %v6963_v9  ;;  %v7003_v37 = vmul.f32 %v6963_v9, %v15580_v29  ;;  %v7019_v11 = vmul.f32 %v6963_v9, %v15576_v3 }
0x1402   : > { %v6995_v46 = vmul.f32 %v15363_v4, %v6975_v25  ;;  %v7007_v35 = vmul.f32 %v6975_v25, %v15576_v3  ;;  %v7015_v7 = vmul.f32 %v6975_v25, %v15580_v29  ;;  %v6782_v28 = vsub.f32 %v6774_v56, %v6778_v23 }
0x1403   : > { %v6987_v59 = vadd.f32 %v6983_v14, %v6951_v2  ;;  %v6794_v17 = vadd.f32 %v6790_v13, %v6758_v10  ;;  %v6826_v38 = vmul.f32 %v6770_v19, %v15662_v31  ;;  %v6261_v18 = vadd.s32 %v6260_v52, %v6256_v41 }
0x1404   : > { %v7011_v58 = vadd.f32 %v7007_v35, %v7003_v37  ;;  %v7023_v40 = vsub.f32 %v7015_v7, %v7019_v11  ;;  %v6802_v33 = vmul.f32 %v15304_v57, %v6782_v28  ;;  %v6814_v44 = vmul.f32 %v6782_v28, %v15662_v31 }
0x1405   : > { %v6999_v36 = vadd.f32 %v6995_v46, %v6987_v59  ;;  %v6822_v22 = vmul.f32 %v6782_v28, %v15666_v20  ;;  %v6262_v15 = vadd.s32 536870912, %v6261_v18  ;;  %vm6202_vm11 = vcmp.le.f32.partialorder %v6201_v24, 0.7853982 }
0x1406   : > { %v7031_v3 = vmul.f32 %v15372_v1, %v7011_v58  ;;  %v6806_v63 = vadd.f32 %v6802_v33, %v6794_v17  ;;  %v6818_v29 = vadd.f32 %v6814_v44, %v6810_v34  ;;  %v7043_v56 = vmul.f32 %v15378_v30, %v7023_v40 }
0x1407   : > { %v6830_v49 = vsub.f32 %v6822_v22, %v6826_v38  ;;  %v15714_v55 = vshrl.u32 %v6262_v15, 30  ;;  %vm6293_vm9 = vweird.f32 %v15527_v32 }
0x1408   : > { %v7035_v41 = vadd.f32 %v7031_v3, %v6999_v36  ;;  %v6838_v39 = vmul.f32 %v15314_v16, %v6818_v29  ;;  %v6858_v62 = vmul.f32 %v6818_v29, %v15666_v20  ;;  %v6874_v19 = vmul.f32 %v6818_v29, %v15662_v31 }
0x1409   : > { %v6862_v42 = vmul.f32 %v6830_v49, %v15662_v31  ;;  %v6870_v9 = vmul.f32 %v6830_v49, %v15666_v20  ;;  %v6264_v23 = vshll.u32 %v15714_v55, 30  ;;  %v6850_v10 = vmul.f32 %v15321_v8, %v6830_v49 }
0x140a   : > { %v7047_v52 = vadd.f32 %v7043_v56, %v7035_v41  ;;  %v6842_v25 = vadd.f32 %v6838_v39, %v6806_v63 }
0x140b   : > { %v6866_v13 = vadd.f32 %v6862_v42, %v6858_v62  ;;  %v6878_v34 = vsub.f32 %v6870_v9, %v6874_v19  ;;  %v6265_v2 = vsub.s32 %v6261_v18, %v6264_v23  ;;  %v16624_v18 = vmov 0.0  }
0x140c   : > { %v15724_v14 = vadd.f32 %v7047_v52, %v15421_v5  ;;  %v6854_v37 = vadd.f32 %v6850_v10, %v6842_v25 }
0x140d   : > { %v6886_v11 = vmul.f32 %v15326_v27, %v6866_v13  ;;  %v6906_v46 = vmul.f32 %v6866_v13, %v15666_v20  ;;  %v6910_v35 = vmul.f32 %v6878_v34, %v15662_v31  ;;  %v6918_v7 = vmul.f32 %v6878_v34, %v15666_v20 }
0x140e   : > { %v6922_v28 = vmul.f32 %v6866_v13, %v15662_v31  ;;  %v6267_v59 = vsub.s32 0, %v6265_v2  ;;  %13477 = vmatpush3.xpose.msk.msra.mxu0 %vm534_vm2, %v15724_v14  ;;  %v6898_v38 = vmul.f32 %v15335_v60, %v6878_v34 }
0x140f   : > { %v6890_v17 = vadd.f32 %v6886_v11, %v6854_v37  ;;  %v6914_v5 = vadd.f32 %v6910_v35, %v6906_v46  ;;  %13486 = vmatprep.subr.mxu0 %v16624_v18  ;;  %v6257_v11 = vadd.s32 %v15624_v6, %v15636_v48 }
0x1410   : > { %v6926_v58 = vsub.f32 %v6918_v7, %v6922_v28  ;;  %v12703_v40 = vmin.u32 %v6267_v59, %v6265_v2 }
0x1411   : > { %v6902_v33 = vadd.f32 %v6898_v38, %v6890_v17  ;;  %v6934_v44 = vmul.f32 %v15342_v43, %v6914_v5  ;;  %v6954_v36 = vmul.f32 %v6914_v5, %v15666_v20  ;;  %v6970_v22 = vmul.f32 %v6914_v5, %v15662_v31  ;;  %13479 = vmatmul.mubr.msk.f32.vlgmr.msra.gmra.mxu0 %vm534_vm2, %v14534_v21 }
0x1412   : > { %v6958_v15 = vmul.f32 %v6926_v58, %v15662_v31  ;;  %v6966_v3 = vmul.f32 %v6926_v58, %v15666_v20  ;;  %v6269_v63 = vclz %v12703_v40  ;;  %13487 = vmatpush3.msk.msra.mxu0 %vm876_vm3, %v15385_v45  ;;  %13488 = vmatprep.mubr.msk.f32.mxu0 %vm14302_vm1, %v16624_v18  ;;  %v6946_v56 = vmul.f32 %v15351_v51, %v6926_v58 }
0x1413   : > { %v6938_v29 = vadd.f32 %v6934_v44, %v6902_v33  ;;  %13496 = vmatprep.subr.mxu0 %v16624_v18 }
0x1414   : > { %v6962_v49 = vadd.f32 %v6958_v15, %v6954_v36  ;;  %v6974_v41 = vsub.f32 %v6966_v3, %v6970_v22  ;;  %v12704_v39 = vadd.s32 4294967294, %v6269_v63 }
0x1415   : > { %v6950_v62 = vadd.f32 %v6946_v56, %v6938_v29 }
0x1416   : > { %v6982_v19 = vmul.f32 %v15354_v53, %v6962_v49  ;;  %v7002_v42 = vmul.f32 %v6962_v49, %v15666_v20  ;;  %v7006_v9 = vmul.f32 %v6974_v41, %v15662_v31  ;;  %v7014_v23 = vmul.f32 %v6974_v41, %v15666_v20 }
0x1417   : > { %v7018_v52 = vmul.f32 %v6962_v49, %v15662_v31  ;;  %vm12705_vm10 = vcmp.lt.s32.totalorder %v12704_v39, 0  ;;  %v6994_v10 = vmul.f32 %v15363_v4, %v6974_v41 }
0x1418   : > { %v6986_v25 = vadd.f32 %v6982_v19, %v6950_v62  ;;  %v7010_v13 = vadd.f32 %v7006_v9, %v7002_v42  ;;  %v6272_v34 = vsel %vm12705_vm10, 0, %v12704_v39  ;;  %vm16625_vm10 = vcmask 27648  }
0x1419   : > { %v7022_v37 = vsub.f32 %v7014_v23, %v7018_v52  ;;  %v6273_v46 = vsub.s32 32, %v6272_v34  ;;  %v6277_v35 = vsub.s32 4294967266, %v6272_v34  ;;  %v6274_v59 = vshll.u32 %v6265_v2, %v6272_v34 }
0x141a   : > { %v6998_v7 = vadd.f32 %v6994_v10, %v6986_v25  ;;  %v7030_v28 = vmul.f32 %v15372_v1, %v7010_v13  ;;  %v15765_v2 = vcombine.high %v15393_v12, %v15393_v12 }
0x141b   : > { %v6275_v17 = vshrl.u32 %v6257_v11, %v6273_v46  ;;  %v6278_v20 = vadd.s32 127, %v6277_v35  ;;  %v7042_v31 = vmul.f32 %v15378_v30, %v7022_v37 }
0x141c   : > { %v7034_v38 = vadd.f32 %v7030_v28, %v6998_v7 }
0x141d   : > { %v6276_v5 = vor.u32 %v6275_v17, %v6274_v59  ;;  %v6279_v58 = vshll.u32 %v6278_v20, 23 }
0x141e   : > { %v7046_v40 = vadd.f32 %v7042_v31, %v7034_v38 }
0x141f   : > { %v6280_v33 = vor.u32 4788187, %v6279_v58  ;;  %v6283_v6 = vcvt.s32.f32 %v6276_v5 }
0x1420   : > { %v15759_v44 = vadd.f32 %v7046_v40, %v15444_v54  ;;  %v6287_v54 = vsub.s32 4, %v15714_v55 }
0x1421   : > { %v6281_v36 = vand.u32 2147483647, %v6280_v33 }
0x1422   : > { %13472 = vmatpush3.xpose.msk.msra.mxu1 %vm534_vm2, %v15759_v44  ;;  %v6288_v63 = vsel %vm6203_vm15, %v6287_v54, %v15714_v55 }
0x1423   : > { %v6284_v48 = vmul.f32 %v6283_v6, %v6281_v36  ;;  %13481 = vmatprep.subr.mxu1 %v16624_v18  ;;  %v6290_v29 = vsel %vm6202_vm11, 0, %v6288_v63 }
0x1424   : > { %v6294_v56 = vadd.s32 3, %v6290_v29  ;;  %v6707_v41 = vand.u32 3, %v6290_v29 }
0x1425   : > { %v6285_v22 = vxor.u32 2147483648, %v6284_v48  ;;  %13474 = vmatmul.mubr.msk.f32.vlgmr.msra.gmra.mxu1 %vm534_vm2, %v15765_v2 }
0x1426   : > { %13483 = vmatprep.mubr.msk.f32.mxu1 %vm14302_vm1, %v16624_v18  ;;  %v6295_v49 = vand.u32 3, %v6294_v56  ;;  %vm6712_vm13 = vcmp.eq.s32.totalorder %v6707_v41, 2  ;;  %vm6709_vm0 = vcmp.eq.s32.totalorder %v6707_v41, 0  ;;  %vm6708_vm8 = vcmp.lt.s32.totalorder %v6707_v41, 2 }
0x1427   : > { %v6286_v15 = vsel %vm6203_vm15, %v6285_v22, %v6284_v48  ;;  %vm16626_vm15 = vmmov %vm16625_vm10 }
0x1428   : > { %v6289_v3 = vsel %vm6202_vm11, %v15527_v32, %v6286_v15  ;;  %vm6300_vm12 = vcmp.eq.s32.totalorder %v6295_v49, 2  ;;  %vm6297_vm14 = vcmp.eq.s32.totalorder %v6295_v49, 0  ;;  %vm6296_vm4 = vcmp.lt.s32.totalorder %v6295_v49, 2  ;;  %vm16627_vm11 = vmmov %vm16625_vm10 }
0x1429   : > { %14036 = vcosq.f32 %v6289_v3 }
0x142a   : > { %14038 = vsinq.f32 %v6289_v3 }
0x1436   : > { %v14037_v39 = vpop.eup %14036 }
0x1437   : > { %v14039_v62 = vpop.eup %14038  ;;  %v6301_v19 = vxor.u32 2147483648, %v14037_v39 }
0x1438   : > { %v6298_v42 = vxor.u32 2147483648, %v14039_v62 }
0x1439   : > { %v6302_v9 = vsel %vm6300_vm12, %v6301_v19, %v14039_v62  ;;  %v6714_v24 = vsel %vm6712_vm13, %v6301_v19, %v14039_v62  ;;  %vm16628_vm12 = vmmov %vm16625_vm10 }
0x143a   : > { %v6299_v23 = vsel %vm6297_vm14, %v14037_v39, %v6298_v42  ;;  %v6711_v52 = vsel %vm6709_vm0, %v14037_v39, %v6298_v42  ;;  %vm16629_vm13 = vmmov %vm16625_vm10 }
0x143b   : > { %v6303_v55 = vsel %vm6296_vm4, %v6299_v23, %v6302_v9  ;;  %v6715_v25 = vsel %vm6708_vm8, %v6711_v52, %v6714_v24  ;;  %vm16630_vm14 = vmmov %vm16625_vm10 }
0x143c   : > { %v15779_v10 = vsel %vm6293_vm9, nan, %v6303_v55  ;;  %v15781_v13 = vsel %vm6293_vm9, nan, %v6715_v25  ;;  %vm16631_vm0 = vmmov %vm16625_vm10 }
0x143d   : > { %v6724_v34 = vmul.f32 0.0, %v15781_v13  ;;  %v6732_v37 = vmul.f32 0.0, %v15779_v10  ;;  %vm16632_vm4 = vmmov %vm16631_vm0 }
0x143e   : > { %vm16633_vm8 = vmmov %vm16631_vm0 }
0x143f   : > { %v6728_v11 = vadd.f32 %v6724_v34, %v15779_v10  ;;  %v6736_v46 = vsub.f32 %v15781_v13, %v6732_v37  ;;  %vm16634_vm9 = vmmov %vm16631_vm0 }
0x1441   : > { %v6744_v35 = vmul.f32 %v15278_v50, %v6728_v11  ;;  %v6764_v7 = vmul.f32 %v6728_v11, %v15781_v13  ;;  %v6768_v32 = vmul.f32 %v6736_v46, %v15779_v10  ;;  %v6776_v28 = vmul.f32 %v6736_v46, %v15781_v13  ;;  %v15794_v5 = vpop.f32.mrf.mxu0 }
0x1442   : > { %v6780_v59 = vmul.f32 %v6728_v11, %v15779_v10  ;;  %v6756_v20 = vmul.f32 %v15289_v0, %v6736_v46 }
0x1443   : > { %v6748_v17 = vadd.f32 %v6744_v35, %v15286_v61  ;;  %v6772_v38 = vadd.f32 %v6768_v32, %v6764_v7  ;;  %v7353_v61 = vsel %vm16625_vm10, %v15794_v5, -inf  ;;  %v13470_v48 = vpop.f32.mrf.mxu0  ;;  %vm16635_vm10 = vmmov %vm16631_vm0 }
0x1444   : > { %v6784_v31 = vsub.f32 %v6776_v28, %v6780_v59  ;;  %7354 = vmax.xlane.f32.xlu0 %v7353_v61 }
0x1445   : > { %v6760_v58 = vadd.f32 %v6756_v20, %v6748_v17  ;;  %v6792_v40 = vmul.f32 %v15295_v26, %v6772_v38  ;;  %v6812_v50 = vmul.f32 %v6772_v38, %v15781_v13  ;;  %v6828_v33 = vmul.f32 %v6772_v38, %v15779_v10 }
0x1446   : > { %v6816_v36 = vmul.f32 %v6784_v31, %v15779_v10  ;;  %v6824_v6 = vmul.f32 %v6784_v31, %v15781_v13  ;;  %v6804_v22 = vmul.f32 %v15304_v57, %v6784_v31 }
0x1447   : > { %v6796_v0 = vadd.f32 %v6792_v40, %v6760_v58 }
0x1448   : > { %v6820_v54 = vadd.f32 %v6816_v36, %v6812_v50  ;;  %v6832_v15 = vsub.f32 %v6824_v6, %v6828_v33 }
0x1449   : > { %v6808_v3 = vadd.f32 %v6804_v22, %v6796_v0 }
0x144a   : > { %v6840_v26 = vmul.f32 %v15314_v16, %v6820_v54  ;;  %v6860_v63 = vmul.f32 %v6820_v54, %v15781_v13  ;;  %v6864_v29 = vmul.f32 %v6832_v15, %v15779_v10  ;;  %v6872_v56 = vmul.f32 %v6832_v15, %v15781_v13 }
0x144b   : > { %v6876_v49 = vmul.f32 %v6820_v54, %v15779_v10  ;;  %v6852_v39 = vmul.f32 %v15321_v8, %v6832_v15 }
0x144c   : > { %v6844_v41 = vadd.f32 %v6840_v26, %v6808_v3  ;;  %v6868_v62 = vadd.f32 %v6864_v29, %v6860_v63 }
0x144d   : > { %v6880_v19 = vsub.f32 %v6872_v56, %v6876_v49 }
0x144e   : > { %v6856_v57 = vadd.f32 %v6852_v39, %v6844_v41  ;;  %v6888_v42 = vmul.f32 %v15326_v27, %v6868_v62  ;;  %v6908_v9 = vmul.f32 %v6868_v62, %v15781_v13  ;;  %v6924_v16 = vmul.f32 %v6868_v62, %v15779_v10 }
0x144f   : > { %v6912_v24 = vmul.f32 %v6880_v19, %v15779_v10  ;;  %v6920_v23 = vmul.f32 %v6880_v19, %v15781_v13  ;;  %v6900_v55 = vmul.f32 %v15335_v60, %v6880_v19 }
0x1450   : > { %v6892_v52 = vadd.f32 %v6888_v42, %v6856_v57 }
0x1451   : > { %v6916_v25 = vadd.f32 %v6912_v24, %v6908_v9  ;;  %v6928_v34 = vsub.f32 %v6920_v23, %v6924_v16 }
0x1452   : > { %v6904_v37 = vadd.f32 %v6900_v55, %v6892_v52 }
0x1453   : > { %v6936_v8 = vmul.f32 %v15342_v43, %v6916_v25  ;;  %v6956_v11 = vmul.f32 %v6916_v25, %v15781_v13  ;;  %v6960_v27 = vmul.f32 %v6928_v34, %v15779_v10  ;;  %v6968_v46 = vmul.f32 %v6928_v34, %v15781_v13 }
0x1454   : > { %v6972_v35 = vmul.f32 %v6916_v25, %v15779_v10  ;;  %v6948_v32 = vmul.f32 %v15351_v51, %v6928_v34 }
0x1455   : > { %v6940_v7 = vadd.f32 %v6936_v8, %v6904_v37  ;;  %v6964_v28 = vadd.f32 %v6960_v27, %v6956_v11 }
0x1456   : > { %v6976_v59 = vsub.f32 %v6968_v46, %v6972_v35 }
0x1457   : > { %v6952_v17 = vadd.f32 %v6948_v32, %v6940_v7  ;;  %v6984_v60 = vmul.f32 %v15354_v53, %v6964_v28  ;;  %v7004_v20 = vmul.f32 %v6964_v28, %v15781_v13  ;;  %v7020_v43 = vmul.f32 %v6964_v28, %v15779_v10 }
0x1458   : > { %v7008_v38 = vmul.f32 %v6976_v59, %v15779_v10  ;;  %v7016_v31 = vmul.f32 %v6976_v59, %v15781_v13  ;;  %v6996_v40 = vmul.f32 %v15363_v4, %v6976_v59  ;;  %v15837_v10 = vcombine.high %v14534_v21, %v14534_v21 }
0x1459   : > { %v6988_v58 = vadd.f32 %v6984_v60, %v6952_v17 }
0x145a   : > { %v7012_v50 = vadd.f32 %v7008_v38, %v7004_v20  ;;  %v7024_v33 = vsub.f32 %v7016_v31, %v7020_v43 }
0x145b   : > { %v7000_v36 = vadd.f32 %v6996_v40, %v6988_v58 }
0x145c   : > { %v7032_v51 = vmul.f32 %v15372_v1, %v7012_v50  ;;  %v7044_v61 = vmul.f32 %v15378_v30, %v7024_v33 }
0x145e   : > { %v7036_v6 = vadd.f32 %v7032_v51, %v7000_v36 }
0x1460   : > { %v7048_v53 = vadd.f32 %v7044_v61, %v7036_v6 }
0x1462   : > { %v15831_v48 = vadd.f32 %v7048_v53, %v15522_v47 }
0x1464   : > { %13482 = vmatpush3.xpose.msk.msra.mxu1 %vm534_vm2, %v15831_v48 }
0x1465   : > { %13491 = vmatprep.subr.mxu1 %v16624_v18 }
0x1467   : > { %13484 = vmatmul.mubr.msk.f32.vlgmr.msra.gmra.mxu1 %vm534_vm2, %v15837_v10 }
0x1468   : > { %13492 = vmatpush3.msk.msra.mxu1 %vm876_vm3, %v15759_v44  ;;  %13493 = vmatprep.mubr.msk.f32.mxu1 %vm14302_vm1, %v16624_v18 }
0x1469   : > { %13501 = vmatprep.subr.mxu1 %v16624_v18 }
0x14cd   : > { %v7355_v22 = vpop.xlane.xlu0 %7354 }
0x14ce   : > { %v7365_v54 = vsub.f32 %v15794_v5, %v7355_v22 }
0x14d0   : > { %v7369_v15 = vmul.f32 1.442695, %v7365_v54 }
0x14d1   : > { %v7274_v4 = vpop.f32.mrf.mxu0 }
0x14d2   : > { %v7359_v1 = vsel %vm16626_vm15, %v7274_v4, -inf  ;;  %14040 = vpow2.f32 %v7369_v15  ;;  %vm16636_vm15 = vmmov %vm16631_vm0 }
0x14d3   : > { %7360 = vmax.xlane.f32.xlu0 %v7359_v1  ;;  %v13480_v30 = vpop.f32.mrf.mxu0 }
0x14df   : > { %v14041_v63 = vpop.eup %14040 }
0x14e0   : > { %v7377_v56 = vsel %vm16629_vm13, %v14041_v63, 0.0  ;;  %vm16639_vm13 = vmmov %vm16631_vm0 }
0x14e5   : > { %v7199_v47 = vpop.f32.mrf.mxu1 }
0x14e6   : > { %v7356_v13 = vsel %vm16627_vm11, %v7199_v47, -inf  ;;  %vm16637_vm11 = vmmov %vm16631_vm0 }
0x14e7   : > { %7357 = vmax.xlane.f32.xlu1 %v7356_v13  ;;  %v13475_v0 = vpop.f32.mrf.mxu1 }
0x1527   : > { %v7349_v3 = vpop.f32.mrf.mxu1 }
0x1528   : > { %v7362_v26 = vsel %vm16628_vm12, %v7349_v3, -inf  ;;  %vm16638_vm12 = vmmov %vm16631_vm0 }
0x1529   : > { %7363 = vmax.xlane.f32.xlu0 %v7362_v26  ;;  %v13485_v29 = vpop.f32.mrf.mxu1 }
0x152d   : > { %7378 = vadd.xlane.f32.xlu0 %v7377_v56 }
0x155c   : > { %v7361_v49 = vpop.xlane.xlu0 %7360 }
0x155d   : > { %v7367_v41 = vsub.f32 %v7274_v4, %v7361_v49 }
0x155f   : > { %v7373_v39 = vmul.f32 1.442695, %v7367_v41 }
0x1561   : > { %14042 = vpow2.f32 %v7373_v39 }
0x156e   : > { %v14043_v62 = vpop.eup %14042 }
0x156f   : > { %v7383_v19 = vsel %vm16630_vm14, %v14043_v62, 0.0  ;;  %vm16640_vm14 = vmmov %vm16631_vm0 }
0x1570   : > { %v7358_v57 = vpop.xlane.xlu1 %7357  ;;  %7384 = vadd.xlane.f32.xlu0 %v7383_v19 }
0x1571   : > { %v7366_v5 = vsub.f32 %v7199_v47, %v7358_v57 }
0x1573   : > { %v7371_v42 = vmul.f32 1.442695, %v7366_v5 }
0x1575   : > { %14044 = vpow2.f32 %v7371_v42 }
0x1582   : > { %v14045_v9 = vpop.eup %14044 }
0x1583   : > { %v7380_v16 = vsel %vm16631_vm0, %v14045_v9, 0.0 }
0x1584   : > { %7381 = vadd.xlane.f32.xlu1 %v7380_v16 }
0x1586   : > { %7699 = vrot.lane.b32.xlu0 %v15385_v45, %s14304_s18 }
0x158a   : > { %7855 = vrot.lane.b32.xlu0 %v15724_v14, %s14304_s18 }
0x158e   : > { %7853 = vrot.lane.b32.xlu0 %v14534_v21, %s14304_s18 }
0x1595   : > { %7777 = vrot.lane.b32.xlu1 %v15759_v44, %s14304_s18 }
0x1599   : > { %7697 = vrot.lane.b32.xlu1 %v15393_v12, %s14304_s18 }
0x159d   : > { %7775 = vrot.lane.b32.xlu1 %v15765_v2, %s14304_s18 }
0x15a1   : > { %7933 = vrot.lane.b32.xlu1 %v15831_v48, %s14304_s18 }
0x15b2   : > { %v7364_v24 = vpop.xlane.xlu0 %7363 }
0x15b3   : > { %v7368_v23 = vsub.f32 %v7349_v3, %v7364_v24 }
0x15b5   : > { %v7375_v52 = vmul.f32 1.442695, %v7368_v23 }
0x15b6   : > { %v7379_v55 = vpop.xlane.xlu0 %7378 }
0x15b7   : > { %14046 = vpow2.f32 %v7375_v52 }
0x15b8   : > { %14048 = vrcp.f32 %v7379_v55 }
0x15c4   : > { %v14047_v25 = vpop.eup %14046 }
0x15c5   : > { %v14049_v34 = vpop.eup %14048  ;;  %v7386_v37 = vsel %vm16632_vm4, %v14047_v25, 0.0  ;;  %vm16641_vm4 = vmmov %vm16631_vm0 }
0x15c6   : > { %v7393_v8 = vmul.f32 %v14049_v34, %v14041_v63  ;;  %7387 = vadd.xlane.f32.xlu1 %v7386_v37 }
0x15c8   : > { %13489 = vmatmul.mubr.msk.f32.vlgmr.msra.gmra.mxu0 %vm534_vm2, %v7393_v8 }
0x15c9   : > { %13497 = vmatpush3.msk.msra.mxu0 %vm876_vm3, %v15724_v14  ;;  %13498 = vmatprep.mubr.msk.f32.mxu0 %vm14302_vm1, %v16624_v18 }
0x15ca   : > { %13506 = vmatprep.subr.mxu0 %v16624_v18 }
0x15d7   : > { %7931 = vrot.lane.b32.xlu1 %v15837_v10, %s14304_s18  ;;  %s16660_s18 = smov 108  }
0x15f9   : > { %v7385_v11 = vpop.xlane.xlu0 %7384 }
0x15fa   : > { %14050 = vrcp.f32 %v7385_v11 }
0x15fd   : > { %v7700_v35 = vpop.permute.xlu0 %7699 }
0x1601   : > { %v15882_v28 = vpop.permute.xlu0 %7855 }
0x1605   : > { %v7854_v17 = vpop.permute.xlu0 %7853 }
0x1607   : > { %v14051_v27 = vpop.eup %14050 }
0x1608   : > { %v7395_v46 = vmul.f32 %v14051_v27, %v14043_v62 }
0x160a   : > { %13499 = vmatmul.mubr.msk.f32.vlgmr.msra.gmra.mxu0 %vm534_vm2, %v7395_v46 }
0x160b   : > { %13507 = vmatpush3.xpose.msk.msra.mxu0 %vm534_vm2, %v7700_v35  ;;  %13508 = vmatprep.mubr.msk.f32.mxu0 %vm14302_vm1, %v16624_v18 }
0x160c   : > { %13516 = vmatprep.subr.mxu0 %v16624_v18 }
0x160d   : > { %v7382_v7 = vpop.xlane.xlu1 %7381 }
0x160e   : > { %14052 = vrcp.f32 %v7382_v7 }
0x1611   : > { %v7778_v32 = vpop.permute.xlu1 %7777 }
0x1615   : > { %v7698_v59 = vpop.permute.xlu1 %7697 }
0x1616   : > { %13509 = vmatmul.mubr.msk.f32.vlgmr.msra.gmra.mxu0 %vm534_vm2, %v7698_v59 }
0x1617   : > { %13517 = vmatpush3.xpose.msk.msra.mxu0 %vm534_vm2, %v15882_v28  ;;  %13518 = vmatprep.mubr.msk.f32.mxu0 %vm14302_vm1, %v16624_v18 }
0x1618   : > { %13526 = vmatprep.subr.mxu0 %v16624_v18 }
0x1619   : > { %v7776_v43 = vpop.permute.xlu1 %7775 }
0x161a   : > { %13519 = vmatmul.mubr.msk.f32.vlgmr.msra.gmra.mxu0 %vm534_vm2, %v7854_v17 }
0x161b   : > { %v14053_v60 = vpop.eup %14052  ;;  %13527 = vmatpush3.msk.msra.mxu0 %vm876_vm3, %v7700_v35  ;;  %13528 = vmatprep.mubr.msk.f32.mxu0 %vm14302_vm1, %v16624_v18 }
0x161c   : > { %v7394_v20 = vmul.f32 %v14053_v60, %v14045_v9  ;;  %13536 = vmatprep.subr.mxu0 %v16624_v18 }
0x161d   : > { %v15901_v38 = vpop.permute.xlu1 %7933 }
0x161e   : > { %13494 = vmatmul.mubr.msk.f32.vlgmr.msra.gmra.mxu1 %vm534_vm2, %v7394_v20 }
0x161f   : > { %13502 = vmatpush3.msk.msra.mxu1 %vm876_vm3, %v15831_v48  ;;  %13503 = vmatprep.mubr.msk.f32.mxu1 %vm14302_vm1, %v16624_v18 }
0x1620   : > { %13511 = vmatprep.subr.mxu1 %v16624_v18 }
0x164f   : > { %v7388_v31 = vpop.xlane.xlu1 %7387 }
0x1650   : > { %14054 = vrcp.f32 %v7388_v31 }
0x1653   : > { %v7932_v50 = vpop.permute.xlu1 %7931 }
0x165d   : > { %v14055_v58 = vpop.eup %14054 }
0x165e   : > { %v7396_v40 = vmul.f32 %v14055_v58, %v14047_v25 }
0x1660   : > { %13504 = vmatmul.mubr.msk.f32.vlgmr.msra.gmra.mxu1 %vm534_vm2, %v7396_v40 }
0x1661   : > { %13512 = vmatpush3.xpose.msk.msra.mxu1 %vm534_vm2, %v7778_v32  ;;  %13513 = vmatprep.mubr.msk.f32.mxu1 %vm14302_vm1, %v16624_v18 }
0x1662   : > { %13521 = vmatprep.subr.mxu1 %v16624_v18 }
0x1664   : > { %13514 = vmatmul.mubr.msk.f32.vlgmr.msra.gmra.mxu1 %vm534_vm2, %v7776_v43 }
0x1665   : > { %13522 = vmatpush3.xpose.msk.msra.mxu1 %vm534_vm2, %v15901_v38  ;;  %13523 = vmatprep.mubr.msk.f32.mxu1 %vm14302_vm1, %v16624_v18 }
0x1666   : > { %13531 = vmatprep.subr.mxu1 %v16624_v18 }
0x1668   : > { %13524 = vmatmul.mubr.msk.f32.vlgmr.msra.gmra.mxu1 %vm534_vm2, %v7932_v50 }
0x1669   : > { %13532 = vmatpush3.msk.msra.mxu1 %vm876_vm3, %v7778_v32  ;;  %13533 = vmatprep.mubr.msk.f32.mxu1 %vm14302_vm1, %v16624_v18 }
0x166a   : > { %13541 = vmatprep.subr.mxu1 %v16624_v18 }
0x1688   : > { %v15919_v33 = vpop.f32.mrf.mxu0 }
0x168a   : > { %v13490_v36 = vpop.f32.mrf.mxu0 }
0x16ca   : > { %v15921_v51 = vpop.f32.mrf.mxu0 }
0x16cc   : > { %v13500_v6 = vpop.f32.mrf.mxu0 }
0x16d6   : > { %v7771_v61 = vpop.f32.mrf.mxu0 }
0x16d7   : > { %v8009_v53 = vsel %vm16633_vm8, %v7771_v61, -inf  ;;  %vm16642_vm8 = vmmov %vm16631_vm0 }
0x16d8   : > { %8010 = vmax.xlane.f32.xlu0 %v8009_v53  ;;  %v13510_v4 = vpop.f32.mrf.mxu0 }
0x16da   : > { %v7927_v1 = vpop.f32.mrf.mxu0 }
0x16db   : > { %v8015_v30 = vsel %vm16634_vm9, %v7927_v1, -inf  ;;  %vm16643_vm9 = vmmov %vm16631_vm0 }
0x16dc   : > { %8016 = vmax.xlane.f32.xlu0 %v8015_v30  ;;  %v13520_v47 = vpop.f32.mrf.mxu0 }
0x16de   : > { %v15925_v13 = vpop.f32.mrf.mxu1 }
0x16e0   : > { %v13495_v0 = vpop.f32.mrf.mxu1 }
0x1720   : > { %v15927_v22 = vpop.f32.mrf.mxu1 }
0x1722   : > { %v13505_v54 = vpop.f32.mrf.mxu1 }
0x1724   : > { %v7849_v15 = vpop.f32.mrf.mxu1 }
0x1725   : > { %v8012_v3 = vsel %vm16635_vm10, %v7849_v15, -inf  ;;  %vm16644_vm10 = vmmov %vm16631_vm0 }
0x1726   : > { %8013 = vmax.xlane.f32.xlu1 %v8012_v3  ;;  %v13515_v26 = vpop.f32.mrf.mxu1 }
0x1728   : > { %v8005_v63 = vpop.f32.mrf.mxu1 }
0x1729   : > { %v8018_v29 = vsel %vm16636_vm15, %v8005_v63, -inf  ;;  %vm16645_vm15 = vmmov %vm16631_vm0 }
0x172a   : > { %8019 = vmax.xlane.f32.xlu0 %v8018_v29  ;;  %v13525_v56 = vpop.f32.mrf.mxu1 }
0x1761   : > { %v8011_v49 = vpop.xlane.xlu0 %8010 }
0x1762   : > { %v8021_v41 = vsub.f32 %v7771_v61, %v8011_v49 }
0x1764   : > { %v8025_v39 = vmul.f32 1.442695, %v8021_v41 }
0x1765   : > { %v8017_v62 = vpop.xlane.xlu0 %8016 }
0x1766   : > { %14056 = vpow2.f32 %v8025_v39  ;;  %v8023_v19 = vsub.f32 %v7927_v1, %v8017_v62 }
0x1768   : > { %v8029_v57 = vmul.f32 1.442695, %v8023_v19 }
0x176a   : > { %14058 = vpow2.f32 %v8029_v57 }
0x1773   : > { %v14057_v5 = vpop.eup %14056 }
0x1774   : > { %v8033_v42 = vsel %vm16637_vm11, %v14057_v5, 0.0  ;;  %vm16646_vm11 = vmmov %vm16631_vm0 }
0x1775   : > { %8034 = vadd.xlane.f32.xlu0 %v8033_v42 }
0x1777   : > { %v14059_v9 = vpop.eup %14058 }
0x1778   : > { %v8039_v16 = vsel %vm16638_vm12, %v14059_v9, 0.0  ;;  %vm16647_vm12 = vmmov %vm16631_vm0 }
0x1779   : > { %8040 = vadd.xlane.f32.xlu0 %v8039_v16 }
0x178f   : > { %8355 = vrot.lane.b32.xlu0 %v15385_v45, %s14306_s17 }
0x1793   : > { %8511 = vrot.lane.b32.xlu0 %v15724_v14, %s14306_s17 }
0x1797   : > { %8509 = vrot.lane.b32.xlu0 %v14534_v21, %s14306_s17 }
0x17af   : > { %v8014_v24 = vpop.xlane.xlu1 %8013 }
0x17b0   : > { %v8022_v23 = vsub.f32 %v7849_v15, %v8014_v24 }
0x17b2   : > { %v8027_v52 = vmul.f32 1.442695, %v8022_v23 }
0x17b3   : > { %v8020_v34 = vpop.xlane.xlu0 %8019 }
0x17b4   : > { %14060 = vpow2.f32 %v8027_v52  ;;  %v8024_v37 = vsub.f32 %v8005_v63, %v8020_v34 }
0x17b6   : > { %v8031_v8 = vmul.f32 1.442695, %v8024_v37 }
0x17b8   : > { %14062 = vpow2.f32 %v8031_v8 }
0x17c1   : > { %v14061_v55 = vpop.eup %14060 }
0x17c2   : > { %v8036_v25 = vsel %vm16639_vm13, %v14061_v55, 0.0  ;;  %vm16648_vm13 = vmmov %vm16631_vm0 }
0x17c3   : > { %8037 = vadd.xlane.f32.xlu1 %v8036_v25 }
0x17c5   : > { %v14063_v27 = vpop.eup %14062 }
0x17c6   : > { %v8042_v35 = vsel %vm16640_vm14, %v14063_v27, 0.0  ;;  %vm16649_vm14 = vmmov %vm16631_vm0 }
0x17d4   : > { %8433 = vrot.lane.b32.xlu1 %v15759_v44, %s14306_s17 }
0x17d8   : > { %8353 = vrot.lane.b32.xlu1 %v15393_v12, %s14306_s17 }
0x17dc   : > { %8431 = vrot.lane.b32.xlu1 %v15765_v2, %s14306_s17 }
0x17e0   : > { %8589 = vrot.lane.b32.xlu1 %v15831_v48, %s14306_s17 }
0x17fe   : > { %v8035_v11 = vpop.xlane.xlu0 %8034 }
0x17ff   : > { %14064 = vrcp.f32 %v8035_v11 }
0x1802   : > { %v8041_v46 = vpop.xlane.xlu0 %8040 }
0x1803   : > { %14066 = vrcp.f32 %v8041_v46 }
0x1804   : > { %8043 = vadd.xlane.f32.xlu1 %v8042_v35 }
0x1806   : > { %v8356_v60 = vpop.permute.xlu0 %8355 }
0x180a   : > { %v15962_v43 = vpop.permute.xlu0 %8511 }
0x180c   : > { %v14065_v7 = vpop.eup %14064 }
0x180d   : > { %v8049_v32 = vmul.f32 %v14065_v7, %v14057_v5 }
0x180e   : > { %v8510_v58 = vpop.permute.xlu0 %8509 }
0x180f   : > { %13529 = vmatmul.mubr.msk.f32.vlgmr.msra.gmra.mxu0 %vm534_vm2, %v8049_v32 }
0x1810   : > { %v14067_v59 = vpop.eup %14066  ;;  %13537 = vmatpush3.msk.msra.mxu0 %vm876_vm3, %v15882_v28  ;;  %13538 = vmatprep.mubr.msk.f32.mxu0 %vm14302_vm1, %v16624_v18 }
0x1811   : > { %13546 = vmatprep.subr.mxu0 %v16624_v18  ;;  %v8051_v17 = vmul.f32 %v14067_v59, %v14059_v9 }
0x1813   : > { %13539 = vmatmul.mubr.msk.f32.vlgmr.msra.gmra.mxu0 %vm534_vm2, %v8051_v17 }
0x1814   : > { %13547 = vmatpush3.xpose.msk.msra.mxu0 %vm534_vm2, %v8356_v60  ;;  %13548 = vmatprep.mubr.msk.f32.mxu0 %vm14302_vm1, %v16624_v18 }
0x1815   : > { %8587 = vrot.lane.b32.xlu1 %v15837_v10, %s14306_s17  ;;  %13556 = vmatprep.subr.mxu0 %v16624_v18  ;;  %s16669_s17 = smov 104  }
0x184c   : > { %v8038_v28 = vpop.xlane.xlu1 %8037 }
0x184d   : > { %14068 = vrcp.f32 %v8038_v28 }
0x1850   : > { %v8434_v20 = vpop.permute.xlu1 %8433 }
0x1854   : > { %v8354_v31 = vpop.permute.xlu1 %8353 }
0x1855   : > { %13549 = vmatmul.mubr.msk.f32.vlgmr.msra.gmra.mxu0 %vm534_vm2, %v8354_v31 }
0x1856   : > { %13557 = vmatpush3.xpose.msk.msra.mxu0 %vm534_vm2, %v15962_v43  ;;  %13558 = vmatprep.mubr.msk.f32.mxu0 %vm14302_vm1, %v16624_v18 }
0x1857   : > { %13566 = vmatprep.subr.mxu0 %v16624_v18 }
0x1858   : > { %v8432_v36 = vpop.permute.xlu1 %8431 }
0x1859   : > { %13559 = vmatmul.mubr.msk.f32.vlgmr.msra.gmra.mxu0 %vm534_vm2, %v8510_v58 }
0x185a   : > { %v14069_v40 = vpop.eup %14068  ;;  %13567 = vmatpush3.msk.msra.mxu0 %vm876_vm3, %v8356_v60  ;;  %13568 = vmatprep.mubr.msk.f32.mxu0 %vm14302_vm1, %v16624_v18 }
0x185b   : > { %v8050_v50 = vmul.f32 %v14069_v40, %v14061_v55  ;;  %13576 = vmatprep.subr.mxu0 %v16624_v18 }
0x185c   : > { %v15981_v6 = vpop.permute.xlu1 %8589 }
0x185d   : > { %13534 = vmatmul.mubr.msk.f32.vlgmr.msra.gmra.mxu1 %vm534_vm2, %v8050_v50 }
0x185e   : > { %13542 = vmatpush3.msk.msra.mxu1 %vm876_vm3, %v15901_v38  ;;  %13543 = vmatprep.mubr.msk.f32.mxu1 %vm14302_vm1, %v16624_v18 }
0x185f   : > { %13551 = vmatprep.subr.mxu1 %v16624_v18 }
0x188d   : > { %v8044_v61 = vpop.xlane.xlu1 %8043 }
0x188e   : > { %14070 = vrcp.f32 %v8044_v61 }
0x1891   : > { %v8588_v38 = vpop.permute.xlu1 %8587 }
0x189b   : > { %v14071_v53 = vpop.eup %14070 }
0x189c   : > { %v8052_v4 = vmul.f32 %v14071_v53, %v14063_v27 }
0x189e   : > { %13544 = vmatmul.mubr.msk.f32.vlgmr.msra.gmra.mxu1 %vm534_vm2, %v8052_v4 }
0x189f   : > { %13552 = vmatpush3.xpose.msk.msra.mxu1 %vm534_vm2, %v8434_v20  ;;  %13553 = vmatprep.mubr.msk.f32.mxu1 %vm14302_vm1, %v16624_v18 }
0x18a0   : > { %13561 = vmatprep.subr.mxu1 %v16624_v18 }
0x18a2   : > { %13554 = vmatmul.mubr.msk.f32.vlgmr.msra.gmra.mxu1 %vm534_vm2, %v8432_v36 }
0x18a3   : > { %13562 = vmatpush3.xpose.msk.msra.mxu1 %vm534_vm2, %v15981_v6  ;;  %13563 = vmatprep.mubr.msk.f32.mxu1 %vm14302_vm1, %v16624_v18 }
0x18a4   : > { %13571 = vmatprep.subr.mxu1 %v16624_v18 }
0x18a6   : > { %13564 = vmatmul.mubr.msk.f32.vlgmr.msra.gmra.mxu1 %vm534_vm2, %v8588_v38 }
0x18a7   : > { %13572 = vmatpush3.msk.msra.mxu1 %vm876_vm3, %v8434_v20  ;;  %13573 = vmatprep.mubr.msk.f32.mxu1 %vm14302_vm1, %v16624_v18 }
0x18a8   : > { %13581 = vmatprep.subr.mxu1 %v16624_v18 }
0x18cf   : > { %v15999_v1 = vpop.f32.mrf.mxu0 }
0x18d1   : > { %v13530_v30 = vpop.f32.mrf.mxu0 }
0x18d3   : > { %v16001_v47 = vpop.f32.mrf.mxu0 }
0x18d5   : > { %v13540_v0 = vpop.f32.mrf.mxu0 }
0x1915   : > { %v8427_v54 = vpop.f32.mrf.mxu0 }
0x1916   : > { %v8665_v15 = vsel %vm16631_vm0, %v8427_v54, -inf }
0x1917   : > { %8666 = vmax.xlane.f32.xlu0 %v8665_v15  ;;  %v13550_v3 = vpop.f32.mrf.mxu0 }
0x1919   : > { %v8583_v26 = vpop.f32.mrf.mxu0 }
0x191a   : > { %v8671_v63 = vsel %vm16641_vm4, %v8583_v26, -inf  ;;  %vm16650_vm4 = vmmov %vm16631_vm0 }
0x191b   : > { %8672 = vmax.xlane.f32.xlu0 %v8671_v63  ;;  %v13560_v29 = vpop.f32.mrf.mxu0 }
0x191d   : > { %v16005_v56 = vpop.f32.mrf.mxu1 }
0x191f   : > { %v13535_v49 = vpop.f32.mrf.mxu1 }
0x195e   : > { %v16007_v41 = vpop.f32.mrf.mxu1 }
0x1960   : > { %v13545_v39 = vpop.f32.mrf.mxu1 }
0x1962   : > { %v8505_v62 = vpop.f32.mrf.mxu1 }
0x1963   : > { %v8668_v19 = vsel %vm16642_vm8, %v8505_v62, -inf  ;;  %vm16651_vm8 = vmmov %vm16631_vm0 }
0x1964   : > { %8669 = vmax.xlane.f32.xlu1 %v8668_v19  ;;  %v13555_v57 = vpop.f32.mrf.mxu1 }
0x1966   : > { %v8661_v5 = vpop.f32.mrf.mxu1 }
0x1967   : > { %v8674_v42 = vsel %vm16643_vm9, %v8661_v5, -inf  ;;  %vm16652_vm9 = vmmov %vm16631_vm0 }
0x1968   : > { %8675 = vmax.xlane.f32.xlu0 %v8674_v42  ;;  %v13565_v9 = vpop.f32.mrf.mxu1 }
0x19a0   : > { %v8667_v16 = vpop.xlane.xlu0 %8666 }
0x19a1   : > { %v8677_v24 = vsub.f32 %v8427_v54, %v8667_v16 }
0x19a3   : > { %v8681_v23 = vmul.f32 1.442695, %v8677_v24 }
0x19a4   : > { %v8673_v52 = vpop.xlane.xlu0 %8672 }
0x19a5   : > { %14072 = vpow2.f32 %v8681_v23  ;;  %v8679_v55 = vsub.f32 %v8583_v26, %v8673_v52 }
0x19a7   : > { %v8685_v25 = vmul.f32 1.442695, %v8679_v55 }
0x19a9   : > { %14074 = vpow2.f32 %v8685_v25 }
0x19b2   : > { %v14073_v34 = vpop.eup %14072 }
0x19b3   : > { %v8689_v37 = vsel %vm16644_vm10, %v14073_v34, 0.0  ;;  %vm16653_vm10 = vmmov %vm16631_vm0 }
0x19b4   : > { %8690 = vadd.xlane.f32.xlu0 %v8689_v37 }
0x19b6   : > { %v14075_v8 = vpop.eup %14074 }
0x19b7   : > { %v8695_v11 = vsel %vm16645_vm15, %v14075_v8, 0.0  ;;  %vm16654_vm15 = vmmov %vm16631_vm0 }
0x19b8   : > { %8696 = vadd.xlane.f32.xlu0 %v8695_v11 }
0x19ce   : > { %9011 = vrot.lane.b32.xlu0 %v15385_v45, %s14308_s26 }
0x19d2   : > { %9167 = vrot.lane.b32.xlu0 %v15724_v14, %s14308_s26 }
0x19d6   : > { %9165 = vrot.lane.b32.xlu0 %v14534_v21, %s14308_s26 }
0x19ed   : > { %v8670_v27 = vpop.xlane.xlu1 %8669 }
0x19ee   : > { %v8678_v46 = vsub.f32 %v8505_v62, %v8670_v27 }
0x19f0   : > { %v8683_v35 = vmul.f32 1.442695, %v8678_v46 }
0x19f1   : > { %v8676_v59 = vpop.xlane.xlu0 %8675 }
0x19f2   : > { %14076 = vpow2.f32 %v8683_v35  ;;  %v8680_v17 = vsub.f32 %v8661_v5, %v8676_v59 }
0x19f4   : > { %v8687_v60 = vmul.f32 1.442695, %v8680_v17 }
0x19f6   : > { %14078 = vpow2.f32 %v8687_v60 }
0x19ff   : > { %v14077_v7 = vpop.eup %14076 }
0x1a00   : > { %v8692_v32 = vsel %vm16646_vm11, %v14077_v7, 0.0  ;;  %vm16655_vm11 = vmmov %vm16631_vm0 }
0x1a01   : > { %8693 = vadd.xlane.f32.xlu1 %v8692_v32 }
0x1a03   : > { %v14079_v20 = vpop.eup %14078 }
0x1a04   : > { %v8698_v58 = vsel %vm16647_vm12, %v14079_v20, 0.0  ;;  %vm16656_vm12 = vmmov %vm16631_vm0 }
0x1a12   : > { %9089 = vrot.lane.b32.xlu1 %v15759_v44, %s14308_s26 }
0x1a16   : > { %9009 = vrot.lane.b32.xlu1 %v15393_v12, %s14308_s26 }
0x1a1a   : > { %9087 = vrot.lane.b32.xlu1 %v15765_v2, %s14308_s26 }
0x1a1e   : > { %9245 = vrot.lane.b32.xlu1 %v15831_v48, %s14308_s26 }
0x1a3d   : > { %v8691_v28 = vpop.xlane.xlu0 %8690 }
0x1a3e   : > { %14080 = vrcp.f32 %v8691_v28 }
0x1a41   : > { %v8697_v31 = vpop.xlane.xlu0 %8696 }
0x1a42   : > { %14082 = vrcp.f32 %v8697_v31  ;;  %8699 = vadd.xlane.f32.xlu1 %v8698_v58 }
0x1a45   : > { %v9012_v53 = vpop.permute.xlu0 %9011 }
0x1a49   : > { %v16042_v38 = vpop.permute.xlu0 %9167 }
0x1a4b   : > { %v14081_v40 = vpop.eup %14080 }
0x1a4c   : > { %v8705_v50 = vmul.f32 %v14081_v40, %v14073_v34 }
0x1a4d   : > { %v9166_v0 = vpop.permute.xlu0 %9165 }
0x1a4e   : > { %13569 = vmatmul.mubr.msk.f32.vlgmr.msra.gmra.mxu0 %vm534_vm2, %v8705_v50 }
0x1a4f   : > { %v14083_v36 = vpop.eup %14082  ;;  %13577 = vmatpush3.msk.msra.mxu0 %vm876_vm3, %v15962_v43  ;;  %13578 = vmatprep.mubr.msk.f32.mxu0 %vm14302_vm1, %v16624_v18 }
0x1a50   : > { %13586 = vmatprep.subr.mxu0 %v16624_v18  ;;  %v8707_v61 = vmul.f32 %v14083_v36, %v14075_v8 }
0x1a52   : > { %13579 = vmatmul.mubr.msk.f32.vlgmr.msra.gmra.mxu0 %vm534_vm2, %v8707_v61 }
0x1a53   : > { %13587 = vmatpush3.xpose.msk.msra.mxu0 %vm534_vm2, %v9012_v53  ;;  %9243 = vrot.lane.b32.xlu1 %v15837_v10, %s14308_s26  ;;  %s16677_s26 = smov 100  }
0x1a54   : > { %13588 = vmatprep.mubr.msk.f32.mxu0 %vm14302_vm1, %v16624_v18  ;;  %13596 = vmatprep.subr.mxu0 %v16624_v18 }
0x1a8a   : > { %v8694_v43 = vpop.xlane.xlu1 %8693 }
0x1a8b   : > { %14084 = vrcp.f32 %v8694_v43 }
0x1a8e   : > { %v9090_v4 = vpop.permute.xlu1 %9089 }
0x1a92   : > { %v9010_v30 = vpop.permute.xlu1 %9009 }
0x1a93   : > { %13589 = vmatmul.mubr.msk.f32.vlgmr.msra.gmra.mxu0 %vm534_vm2, %v9010_v30 }
0x1a94   : > { %13597 = vmatpush3.xpose.msk.msra.mxu0 %vm534_vm2, %v16042_v38  ;;  %13598 = vmatprep.mubr.msk.f32.mxu0 %vm14302_vm1, %v16624_v18 }
0x1a95   : > { %13606 = vmatprep.subr.mxu0 %v16624_v18 }
0x1a96   : > { %v9088_v3 = vpop.permute.xlu1 %9087 }
0x1a97   : > { %13599 = vmatmul.mubr.msk.f32.vlgmr.msra.gmra.mxu0 %vm534_vm2, %v9166_v0 }
0x1a98   : > { %v14085_v54 = vpop.eup %14084  ;;  %13607 = vmatpush3.msk.msra.mxu0 %vm876_vm3, %v9012_v53  ;;  %13608 = vmatprep.mubr.msk.f32.mxu0 %vm14302_vm1, %v16624_v18 }
0x1a99   : > { %v8706_v15 = vmul.f32 %v14085_v54, %v14077_v7  ;;  %13616 = vmatprep.subr.mxu0 %v16624_v18 }
0x1a9a   : > { %v16061_v26 = vpop.permute.xlu1 %9245 }
0x1a9b   : > { %13574 = vmatmul.mubr.msk.f32.vlgmr.msra.gmra.mxu1 %vm534_vm2, %v8706_v15 }
0x1a9c   : > { %13582 = vmatpush3.msk.msra.mxu1 %vm876_vm3, %v15981_v6  ;;  %13583 = vmatprep.mubr.msk.f32.mxu1 %vm14302_vm1, %v16624_v18 }
0x1a9d   : > { %13591 = vmatprep.subr.mxu1 %v16624_v18 }
0x1acb   : > { %v8700_v63 = vpop.xlane.xlu1 %8699 }
0x1acc   : > { %14086 = vrcp.f32 %v8700_v63 }
0x1acf   : > { %v9244_v6 = vpop.permute.xlu1 %9243 }
0x1ad9   : > { %v14087_v29 = vpop.eup %14086 }
0x1ada   : > { %v8708_v49 = vmul.f32 %v14087_v29, %v14079_v20 }
0x1adc   : > { %13584 = vmatmul.mubr.msk.f32.vlgmr.msra.gmra.mxu1 %vm534_vm2, %v8708_v49 }
0x1add   : > { %13592 = vmatpush3.xpose.msk.msra.mxu1 %vm534_vm2, %v9090_v4  ;;  %13593 = vmatprep.mubr.msk.f32.mxu1 %vm14302_vm1, %v16624_v18 }
0x1ade   : > { %13601 = vmatprep.subr.mxu1 %v16624_v18 }
0x1ae0   : > { %13594 = vmatmul.mubr.msk.f32.vlgmr.msra.gmra.mxu1 %vm534_vm2, %v9088_v3 }
0x1ae1   : > { %13602 = vmatpush3.xpose.msk.msra.mxu1 %vm534_vm2, %v16061_v26  ;;  %13603 = vmatprep.mubr.msk.f32.mxu1 %vm14302_vm1, %v16624_v18 }
0x1ae2   : > { %13611 = vmatprep.subr.mxu1 %v16624_v18 }
0x1ae4   : > { %13604 = vmatmul.mubr.msk.f32.vlgmr.msra.gmra.mxu1 %vm534_vm2, %v9244_v6 }
0x1ae5   : > { %13612 = vmatpush3.msk.msra.mxu1 %vm876_vm3, %v9090_v4  ;;  %13613 = vmatprep.mubr.msk.f32.mxu1 %vm14302_vm1, %v16624_v18 }
0x1ae6   : > { %13621 = vmatprep.subr.mxu1 %v16624_v18 }
0x1b0e   : > { %v16079_v39 = vpop.f32.mrf.mxu0 }
0x1b10   : > { %v13570_v62 = vpop.f32.mrf.mxu0 }
0x1b12   : > { %v16081_v19 = vpop.f32.mrf.mxu0 }
0x1b14   : > { %v13580_v57 = vpop.f32.mrf.mxu0 }
0x1b53   : > { %v9083_v5 = vpop.f32.mrf.mxu0 }
0x1b54   : > { %v9321_v42 = vsel %vm16648_vm13, %v9083_v5, -inf  ;;  %vm16657_vm13 = vmmov %vm16631_vm0 }
0x1b55   : > { %9322 = vmax.xlane.f32.xlu0 %v9321_v42  ;;  %v13590_v9 = vpop.f32.mrf.mxu0 }
0x1b57   : > { %v9239_v16 = vpop.f32.mrf.mxu0 }
0x1b58   : > { %v9327_v24 = vsel %vm16649_vm14, %v9239_v16, -inf  ;;  %vm16658_vm14 = vmmov %vm16631_vm0 }
0x1b59   : > { %9328 = vmax.xlane.f32.xlu0 %v9327_v24  ;;  %v13600_v23 = vpop.f32.mrf.mxu0 }
0x1b5b   : > { %v16085_v52 = vpop.f32.mrf.mxu1 }
0x1b5d   : > { %v13575_v55 = vpop.f32.mrf.mxu1 }
0x1b9c   : > { %v16087_v25 = vpop.f32.mrf.mxu1 }
0x1b9e   : > { %v13585_v34 = vpop.f32.mrf.mxu1 }
0x1ba0   : > { %v9161_v37 = vpop.f32.mrf.mxu1 }
0x1ba1   : > { %v9324_v8 = vsel %vm16631_vm0, %v9161_v37, -inf }
0x1ba2   : > { %9325 = vmax.xlane.f32.xlu1 %v9324_v8  ;;  %v13595_v11 = vpop.f32.mrf.mxu1 }
0x1ba4   : > { %v9317_v27 = vpop.f32.mrf.mxu1 }
0x1ba5   : > { %v9330_v46 = vsel %vm16650_vm4, %v9317_v27, -inf  ;;  %vm16659_vm4 = vmmov %vm16631_vm0 }
0x1ba6   : > { %9331 = vmax.xlane.f32.xlu0 %v9330_v46  ;;  %v13605_v35 = vpop.f32.mrf.mxu1 }
0x1bde   : > { %v9323_v7 = vpop.xlane.xlu0 %9322 }
0x1bdf   : > { %v9333_v32 = vsub.f32 %v9083_v5, %v9323_v7 }
0x1be1   : > { %v9337_v59 = vmul.f32 1.442695, %v9333_v32 }
0x1be2   : > { %v9329_v17 = vpop.xlane.xlu0 %9328 }
0x1be3   : > { %14088 = vpow2.f32 %v9337_v59  ;;  %v9335_v60 = vsub.f32 %v9239_v16, %v9329_v17 }
0x1be5   : > { %v9341_v28 = vmul.f32 1.442695, %v9335_v60 }
0x1be7   : > { %14090 = vpow2.f32 %v9341_v28 }
0x1bf0   : > { %v14089_v20 = vpop.eup %14088 }
0x1bf1   : > { %v9345_v31 = vsel %vm16651_vm8, %v14089_v20, 0.0  ;;  %vm16661_vm8 = vmmov %vm16631_vm0 }
0x1bf2   : > { %9346 = vadd.xlane.f32.xlu0 %v9345_v31 }
0x1bf4   : > { %v14091_v58 = vpop.eup %14090 }
0x1bf5   : > { %v9351_v40 = vsel %vm16652_vm9, %v14091_v58, 0.0  ;;  %vm16662_vm9 = vmmov %vm16631_vm0 }
0x1bf6   : > { %9352 = vadd.xlane.f32.xlu0 %v9351_v40 }
0x1c0c   : > { %9667 = vrot.lane.b32.xlu0 %v15385_v45, %s14310_s19 }
0x1c10   : > { %9823 = vrot.lane.b32.xlu0 %v15724_v14, %s14310_s19 }
0x1c14   : > { %9821 = vrot.lane.b32.xlu0 %v14534_v21, %s14310_s19 }
0x1c2b   : > { %v9326_v50 = vpop.xlane.xlu1 %9325 }
0x1c2c   : > { %v9334_v36 = vsub.f32 %v9161_v37, %v9326_v50 }
0x1c2e   : > { %v9339_v61 = vmul.f32 1.442695, %v9334_v36 }
0x1c2f   : > { %v9332_v4 = vpop.xlane.xlu0 %9331 }
0x1c30   : > { %14092 = vpow2.f32 %v9339_v61  ;;  %v9336_v30 = vsub.f32 %v9317_v27, %v9332_v4 }
0x1c32   : > { %v9343_v0 = vmul.f32 1.442695, %v9336_v30 }
0x1c34   : > { %14094 = vpow2.f32 %v9343_v0 }
0x1c3d   : > { %v14093_v53 = vpop.eup %14092 }
0x1c3e   : > { %v9348_v43 = vsel %vm16653_vm10, %v14093_v53, 0.0  ;;  %vm16663_vm10 = vmmov %vm16631_vm0 }
0x1c3f   : > { %9349 = vadd.xlane.f32.xlu1 %v9348_v43 }
0x1c41   : > { %v14095_v15 = vpop.eup %14094 }
0x1c42   : > { %v9354_v63 = vsel %vm16654_vm15, %v14095_v15, 0.0  ;;  %vm16664_vm15 = vmmov %vm16631_vm0 }
0x1c50   : > { %9745 = vrot.lane.b32.xlu1 %v15759_v44, %s14310_s19 }
0x1c54   : > { %9665 = vrot.lane.b32.xlu1 %v15393_v12, %s14310_s19 }
0x1c58   : > { %9743 = vrot.lane.b32.xlu1 %v15765_v2, %s14310_s19 }
0x1c5c   : > { %9901 = vrot.lane.b32.xlu1 %v15831_v48, %s14310_s19 }
0x1c7b   : > { %v9347_v54 = vpop.xlane.xlu0 %9346 }
0x1c7c   : > { %14096 = vrcp.f32 %v9347_v54 }
0x1c7f   : > { %v9353_v3 = vpop.xlane.xlu0 %9352 }
0x1c80   : > { %14098 = vrcp.f32 %v9353_v3  ;;  %9355 = vadd.xlane.f32.xlu1 %v9354_v63 }
0x1c83   : > { %v9668_v57 = vpop.permute.xlu0 %9667 }
0x1c87   : > { %v16122_v42 = vpop.permute.xlu0 %9823 }
0x1c89   : > { %v14097_v29 = vpop.eup %14096 }
0x1c8a   : > { %v9361_v49 = vmul.f32 %v14097_v29, %v14089_v20 }
0x1c8b   : > { %v9822_v16 = vpop.permute.xlu0 %9821 }
0x1c8c   : > { %13609 = vmatmul.mubr.msk.f32.vlgmr.msra.gmra.mxu0 %vm534_vm2, %v9361_v49 }
0x1c8d   : > { %v14099_v6 = vpop.eup %14098  ;;  %13617 = vmatpush3.msk.msra.mxu0 %vm876_vm3, %v16042_v38  ;;  %13618 = vmatprep.mubr.msk.f32.mxu0 %vm14302_vm1, %v16624_v18 }
0x1c8e   : > { %13626 = vmatprep.subr.mxu0 %v16624_v18  ;;  %v9363_v62 = vmul.f32 %v14099_v6, %v14091_v58 }
0x1c90   : > { %13619 = vmatmul.mubr.msk.f32.vlgmr.msra.gmra.mxu0 %vm534_vm2, %v9363_v62 }
0x1c91   : > { %13627 = vmatpush3.xpose.msk.msra.mxu0 %vm534_vm2, %v9668_v57  ;;  %9899 = vrot.lane.b32.xlu1 %v15837_v10, %s14310_s19  ;;  %s16685_s19 = smov 16  }
0x1c92   : > { %13628 = vmatprep.mubr.msk.f32.mxu0 %vm14302_vm1, %v16624_v18  ;;  %13636 = vmatprep.subr.mxu0 %v16624_v18 }
0x1cc8   : > { %v9350_v38 = vpop.xlane.xlu1 %9349 }
0x1cc9   : > { %14100 = vrcp.f32 %v9350_v38 }
0x1ccc   : > { %v9746_v5 = vpop.permute.xlu1 %9745 }
0x1cd0   : > { %v9666_v9 = vpop.permute.xlu1 %9665 }
0x1cd1   : > { %13629 = vmatmul.mubr.msk.f32.vlgmr.msra.gmra.mxu0 %vm534_vm2, %v9666_v9 }
0x1cd2   : > { %13637 = vmatpush3.xpose.msk.msra.mxu0 %vm534_vm2, %v16122_v42  ;;  %13638 = vmatprep.mubr.msk.f32.mxu0 %vm14302_vm1, %v16624_v18 }
0x1cd3   : > { %13646 = vmatprep.subr.mxu0 %v16624_v18 }
0x1cd4   : > { %v9744_v55 = vpop.permute.xlu1 %9743 }
0x1cd5   : > { %13639 = vmatmul.mubr.msk.f32.vlgmr.msra.gmra.mxu0 %vm534_vm2, %v9822_v16 }
0x1cd6   : > { %v14101_v24 = vpop.eup %14100  ;;  %13647 = vmatpush3.msk.msra.mxu0 %vm876_vm3, %v9668_v57  ;;  %13648 = vmatprep.mubr.msk.f32.mxu0 %vm14302_vm1, %v16624_v18 }
0x1cd7   : > { %v9362_v23 = vmul.f32 %v14101_v24, %v14093_v53  ;;  %13656 = vmatprep.subr.mxu0 %v16624_v18 }
0x1cd8   : > { %v16141_v34 = vpop.permute.xlu1 %9901 }
0x1cd9   : > { %13614 = vmatmul.mubr.msk.f32.vlgmr.msra.gmra.mxu1 %vm534_vm2, %v9362_v23 }
0x1cda   : > { %13622 = vmatpush3.msk.msra.mxu1 %vm876_vm3, %v16061_v26  ;;  %13623 = vmatprep.mubr.msk.f32.mxu1 %vm14302_vm1, %v16624_v18 }
0x1cdb   : > { %13631 = vmatprep.subr.mxu1 %v16624_v18 }
0x1d09   : > { %v9356_v37 = vpop.xlane.xlu1 %9355 }
0x1d0a   : > { %14102 = vrcp.f32 %v9356_v37 }
0x1d0d   : > { %v9900_v26 = vpop.permute.xlu1 %9899 }
0x1d17   : > { %v14103_v8 = vpop.eup %14102 }
0x1d18   : > { %v9364_v11 = vmul.f32 %v14103_v8, %v14095_v15 }
0x1d1a   : > { %13624 = vmatmul.mubr.msk.f32.vlgmr.msra.gmra.mxu1 %vm534_vm2, %v9364_v11 }
0x1d1b   : > { %13632 = vmatpush3.xpose.msk.msra.mxu1 %vm534_vm2, %v9746_v5  ;;  %13633 = vmatprep.mubr.msk.f32.mxu1 %vm14302_vm1, %v16624_v18 }
0x1d1c   : > { %13641 = vmatprep.subr.mxu1 %v16624_v18 }
0x1d1e   : > { %13634 = vmatmul.mubr.msk.f32.vlgmr.msra.gmra.mxu1 %vm534_vm2, %v9744_v55 }
0x1d1f   : > { %13642 = vmatpush3.xpose.msk.msra.mxu1 %vm534_vm2, %v16141_v34  ;;  %13643 = vmatprep.mubr.msk.f32.mxu1 %vm14302_vm1, %v16624_v18 }
0x1d20   : > { %13651 = vmatprep.subr.mxu1 %v16624_v18 }
0x1d22   : > { %13644 = vmatmul.mubr.msk.f32.vlgmr.msra.gmra.mxu1 %vm534_vm2, %v9900_v26 }
0x1d23   : > { %13652 = vmatpush3.msk.msra.mxu1 %vm876_vm3, %v9746_v5  ;;  %13653 = vmatprep.mubr.msk.f32.mxu1 %vm14302_vm1, %v16624_v18 }
0x1d24   : > { %13661 = vmatprep.subr.mxu1 %v16624_v18 }
0x1d4c   : > { %v16159_v27 = vpop.f32.mrf.mxu0 }
0x1d4e   : > { %v13610_v46 = vpop.f32.mrf.mxu0 }
0x1d50   : > { %v16161_v35 = vpop.f32.mrf.mxu0 }
0x1d52   : > { %v13620_v7 = vpop.f32.mrf.mxu0 }
0x1d91   : > { %v9739_v32 = vpop.f32.mrf.mxu0 }
0x1d92   : > { %v9977_v59 = vsel %vm16655_vm11, %v9739_v32, -inf  ;;  %vm16665_vm11 = vmmov %vm16631_vm0 }
0x1d93   : > { %9978 = vmax.xlane.f32.xlu0 %v9977_v59  ;;  %v13630_v17 = vpop.f32.mrf.mxu0 }
0x1d95   : > { %v9895_v60 = vpop.f32.mrf.mxu0 }
0x1d96   : > { %v9983_v28 = vsel %vm16656_vm12, %v9895_v60, -inf  ;;  %vm16666_vm12 = vmmov %vm16631_vm0 }
0x1d97   : > { %9984 = vmax.xlane.f32.xlu0 %v9983_v28  ;;  %v13640_v20 = vpop.f32.mrf.mxu0 }
0x1d99   : > { %v16165_v31 = vpop.f32.mrf.mxu1 }
0x1d9b   : > { %v13615_v58 = vpop.f32.mrf.mxu1 }
0x1dda   : > { %v16167_v40 = vpop.f32.mrf.mxu1 }
0x1ddc   : > { %v13625_v50 = vpop.f32.mrf.mxu1 }
0x1dde   : > { %v9817_v36 = vpop.f32.mrf.mxu1 }
0x1ddf   : > { %v9980_v61 = vsel %vm16657_vm13, %v9817_v36, -inf  ;;  %vm16667_vm13 = vmmov %vm16631_vm0 }
0x1de0   : > { %9981 = vmax.xlane.f32.xlu1 %v9980_v61  ;;  %v13635_v53 = vpop.f32.mrf.mxu1 }
0x1de2   : > { %v9973_v43 = vpop.f32.mrf.mxu1 }
0x1de3   : > { %v9986_v4 = vsel %vm16658_vm14, %v9973_v43, -inf  ;;  %vm16668_vm14 = vmmov %vm16631_vm0 }
0x1de4   : > { %9987 = vmax.xlane.f32.xlu0 %v9986_v4  ;;  %v13645_v30 = vpop.f32.mrf.mxu1 }
0x1e1c   : > { %v9979_v0 = vpop.xlane.xlu0 %9978 }
0x1e1d   : > { %v9989_v54 = vsub.f32 %v9739_v32, %v9979_v0 }
0x1e1f   : > { %v9993_v15 = vmul.f32 1.442695, %v9989_v54 }
0x1e20   : > { %v9985_v3 = vpop.xlane.xlu0 %9984 }
0x1e21   : > { %14104 = vpow2.f32 %v9993_v15  ;;  %v9991_v63 = vsub.f32 %v9895_v60, %v9985_v3 }
0x1e23   : > { %v9997_v29 = vmul.f32 1.442695, %v9991_v63 }
0x1e25   : > { %14106 = vpow2.f32 %v9997_v29 }
0x1e2e   : > { %v14105_v49 = vpop.eup %14104 }
0x1e2f   : > { %v10001_v6 = vsel %vm16631_vm0, %v14105_v49, 0.0 }
0x1e30   : > { %10002 = vadd.xlane.f32.xlu0 %v10001_v6 }
0x1e32   : > { %v14107_v62 = vpop.eup %14106 }
0x1e33   : > { %v10007_v57 = vsel %vm16659_vm4, %v14107_v62, 0.0  ;;  %vm16670_vm4 = vmmov %vm16631_vm0 }
0x1e34   : > { %10008 = vadd.xlane.f32.xlu0 %v10007_v57 }
0x1e4a   : > { %10323 = vrot.lane.b32.xlu0 %v15385_v45, %s16660_s18 }
0x1e4e   : > { %10479 = vrot.lane.b32.xlu0 %v15724_v14, %s16660_s18 }
0x1e52   : > { %10477 = vrot.lane.b32.xlu0 %v14534_v21, %s16660_s18 }
0x1e69   : > { %v9982_v38 = vpop.xlane.xlu1 %9981 }
0x1e6a   : > { %v9990_v5 = vsub.f32 %v9817_v36, %v9982_v38 }
0x1e6c   : > { %v9995_v9 = vmul.f32 1.442695, %v9990_v5 }
0x1e6d   : > { %v9988_v23 = vpop.xlane.xlu0 %9987 }
0x1e6e   : > { %14108 = vpow2.f32 %v9995_v9  ;;  %v9992_v55 = vsub.f32 %v9973_v43, %v9988_v23 }
0x1e70   : > { %v9999_v37 = vmul.f32 1.442695, %v9992_v55 }
0x1e72   : > { %14110 = vpow2.f32 %v9999_v37 }
0x1e7b   : > { %v14109_v16 = vpop.eup %14108 }
0x1e7c   : > { %v10004_v24 = vsel %vm16661_vm8, %v14109_v16, 0.0  ;;  %vm16671_vm8 = vmmov %vm16631_vm0 }
0x1e7d   : > { %10005 = vadd.xlane.f32.xlu1 %v10004_v24 }
0x1e7f   : > { %v14111_v11 = vpop.eup %14110 }
0x1e80   : > { %v10010_v46 = vsel %vm16662_vm9, %v14111_v11, 0.0  ;;  %vm16672_vm9 = vmmov %vm16631_vm0 }
0x1e8e   : > { %10401 = vrot.lane.b32.xlu1 %v15759_v44, %s16660_s18 }
0x1e92   : > { %10321 = vrot.lane.b32.xlu1 %v15393_v12, %s16660_s18 }
0x1e96   : > { %10399 = vrot.lane.b32.xlu1 %v15765_v2, %s16660_s18 }
0x1e9a   : > { %10557 = vrot.lane.b32.xlu1 %v15831_v48, %s16660_s18 }
0x1eb9   : > { %v10003_v8 = vpop.xlane.xlu0 %10002 }
0x1eba   : > { %14112 = vrcp.f32 %v10003_v8 }
0x1ebd   : > { %v10009_v26 = vpop.xlane.xlu0 %10008 }
0x1ebe   : > { %14114 = vrcp.f32 %v10009_v26  ;;  %10011 = vadd.xlane.f32.xlu1 %v10010_v46 }
0x1ec1   : > { %v10324_v60 = vpop.permute.xlu0 %10323 }
0x1ec5   : > { %v16202_v20 = vpop.permute.xlu0 %10479 }
0x1ec7   : > { %v14113_v7 = vpop.eup %14112 }
0x1ec8   : > { %v10017_v32 = vmul.f32 %v14113_v7, %v14105_v49 }
0x1ec9   : > { %v10478_v50 = vpop.permute.xlu0 %10477 }
0x1eca   : > { %13649 = vmatmul.mubr.msk.f32.vlgmr.msra.gmra.mxu0 %vm534_vm2, %v10017_v32 }
0x1ecb   : > { %v14115_v59 = vpop.eup %14114  ;;  %13657 = vmatpush3.msk.msra.mxu0 %vm876_vm3, %v16122_v42  ;;  %13658 = vmatprep.mubr.msk.f32.mxu0 %vm14302_vm1, %v16624_v18 }
0x1ecc   : > { %13666 = vmatprep.subr.mxu0 %v16624_v18  ;;  %v10019_v17 = vmul.f32 %v14115_v59, %v14107_v62 }
0x1ece   : > { %13659 = vmatmul.mubr.msk.f32.vlgmr.msra.gmra.mxu0 %vm534_vm2, %v10019_v17 }
0x1ecf   : > { %13667 = vmatpush3.xpose.msk.msra.mxu0 %vm534_vm2, %v10324_v60  ;;  %10555 = vrot.lane.b32.xlu1 %v15837_v10, %s16660_s18 }
0x1ed0   : > { %13668 = vmatprep.mubr.msk.f32.mxu0 %vm14302_vm1, %v16624_v18  ;;  %13676 = vmatprep.subr.mxu0 %v16624_v18 }
0x1f06   : > { %v10006_v42 = vpop.xlane.xlu1 %10005 }
0x1f07   : > { %14116 = vrcp.f32 %v10006_v42 }
0x1f0a   : > { %v10402_v28 = vpop.permute.xlu1 %10401 }
0x1f0e   : > { %v10322_v58 = vpop.permute.xlu1 %10321 }
0x1f0f   : > { %13669 = vmatmul.mubr.msk.f32.vlgmr.msra.gmra.mxu0 %vm534_vm2, %v10322_v58 }
0x1f10   : > { %13677 = vmatpush3.xpose.msk.msra.mxu0 %vm534_vm2, %v16202_v20  ;;  %13678 = vmatprep.mubr.msk.f32.mxu0 %vm14302_vm1, %v16624_v18 }
0x1f11   : > { %13686 = vmatprep.subr.mxu0 %v16624_v18 }
0x1f12   : > { %v10400_v53 = vpop.permute.xlu1 %10399 }
0x1f13   : > { %13679 = vmatmul.mubr.msk.f32.vlgmr.msra.gmra.mxu0 %vm534_vm2, %v10478_v50 }
0x1f14   : > { %v14117_v36 = vpop.eup %14116  ;;  %13687 = vmatpush3.msk.msra.mxu0 %vm876_vm3, %v10324_v60  ;;  %13688 = vmatprep.mubr.msk.f32.mxu0 %vm14302_vm1, %v16624_v18 }
0x1f15   : > { %v10018_v61 = vmul.f32 %v14117_v36, %v14109_v16  ;;  %13696 = vmatprep.subr.mxu0 %v16624_v18 }
0x1f16   : > { %v16221_v43 = vpop.permute.xlu1 %10557 }
0x1f17   : > { %13654 = vmatmul.mubr.msk.f32.vlgmr.msra.gmra.mxu1 %vm534_vm2, %v10018_v61 }
0x1f18   : > { %13662 = vmatpush3.msk.msra.mxu1 %vm876_vm3, %v16141_v34  ;;  %13663 = vmatprep.mubr.msk.f32.mxu1 %vm14302_vm1, %v16624_v18 }
0x1f19   : > { %13671 = vmatprep.subr.mxu1 %v16624_v18 }
0x1f47   : > { %v10012_v4 = vpop.xlane.xlu1 %10011 }
0x1f48   : > { %14118 = vrcp.f32 %v10012_v4 }
0x1f4b   : > { %v10556_v34 = vpop.permute.xlu1 %10555 }
0x1f55   : > { %v14119_v30 = vpop.eup %14118 }
0x1f56   : > { %v10020_v0 = vmul.f32 %v14119_v30, %v14111_v11 }
0x1f58   : > { %13664 = vmatmul.mubr.msk.f32.vlgmr.msra.gmra.mxu1 %vm534_vm2, %v10020_v0 }
0x1f59   : > { %13672 = vmatpush3.xpose.msk.msra.mxu1 %vm534_vm2, %v10402_v28  ;;  %13673 = vmatprep.mubr.msk.f32.mxu1 %vm14302_vm1, %v16624_v18 }
0x1f5a   : > { %13681 = vmatprep.subr.mxu1 %v16624_v18 }
0x1f5c   : > { %13674 = vmatmul.mubr.msk.f32.vlgmr.msra.gmra.mxu1 %vm534_vm2, %v10400_v53 }
0x1f5d   : > { %13682 = vmatpush3.xpose.msk.msra.mxu1 %vm534_vm2, %v16221_v43  ;;  %13683 = vmatprep.mubr.msk.f32.mxu1 %vm14302_vm1, %v16624_v18 }
0x1f5e   : > { %13691 = vmatprep.subr.mxu1 %v16624_v18 }
0x1f60   : > { %13684 = vmatmul.mubr.msk.f32.vlgmr.msra.gmra.mxu1 %vm534_vm2, %v10556_v34 }
0x1f61   : > { %13692 = vmatpush3.msk.msra.mxu1 %vm876_vm3, %v10402_v28  ;;  %13693 = vmatprep.mubr.msk.f32.mxu1 %vm14302_vm1, %v16624_v18 }
0x1f62   : > { %13701 = vmatprep.subr.mxu1 %v16624_v18 }
0x1f8a   : > { %v16239_v54 = vpop.f32.mrf.mxu0 }
0x1f8c   : > { %v13650_v15 = vpop.f32.mrf.mxu0 }
0x1f8e   : > { %v16241_v3 = vpop.f32.mrf.mxu0 }
0x1f90   : > { %v13660_v63 = vpop.f32.mrf.mxu0 }
0x1fcf   : > { %v10395_v29 = vpop.f32.mrf.mxu0 }
0x1fd0   : > { %v10633_v49 = vsel %vm16663_vm10, %v10395_v29, -inf  ;;  %vm16673_vm10 = vmmov %vm16631_vm0 }
0x1fd1   : > { %10634 = vmax.xlane.f32.xlu0 %v10633_v49  ;;  %v13670_v6 = vpop.f32.mrf.mxu0 }
0x1fd3   : > { %v10551_v62 = vpop.f32.mrf.mxu0 }
0x1fd4   : > { %v10639_v57 = vsel %vm16664_vm15, %v10551_v62, -inf  ;;  %vm16674_vm15 = vmmov %vm16631_vm0 }
0x1fd5   : > { %10640 = vmax.xlane.f32.xlu0 %v10639_v57  ;;  %v13680_v38 = vpop.f32.mrf.mxu0 }
0x1fd7   : > { %v16245_v5 = vpop.f32.mrf.mxu1 }
0x1fd9   : > { %v13655_v9 = vpop.f32.mrf.mxu1 }
0x2018   : > { %v16247_v16 = vpop.f32.mrf.mxu1 }
0x201a   : > { %v13665_v24 = vpop.f32.mrf.mxu1 }
0x201c   : > { %v10473_v23 = vpop.f32.mrf.mxu1 }
0x201d   : > { %v10636_v55 = vsel %vm16665_vm11, %v10473_v23, -inf  ;;  %vm16675_vm11 = vmmov %vm16631_vm0 }
0x201e   : > { %10637 = vmax.xlane.f32.xlu1 %v10636_v55  ;;  %v13675_v37 = vpop.f32.mrf.mxu1 }
0x2020   : > { %v10629_v8 = vpop.f32.mrf.mxu1 }
0x2021   : > { %v10642_v11 = vsel %vm16666_vm12, %v10629_v8, -inf  ;;  %vm16676_vm12 = vmmov %vm16631_vm0 }
0x2022   : > { %10643 = vmax.xlane.f32.xlu0 %v10642_v11  ;;  %v13685_v26 = vpop.f32.mrf.mxu1 }
0x205a   : > { %v10635_v46 = vpop.xlane.xlu0 %10634 }
0x205b   : > { %v10645_v7 = vsub.f32 %v10395_v29, %v10635_v46 }
0x205d   : > { %v10649_v32 = vmul.f32 1.442695, %v10645_v7 }
0x205e   : > { %v10641_v59 = vpop.xlane.xlu0 %10640 }
0x205f   : > { %14120 = vpow2.f32 %v10649_v32  ;;  %v10647_v17 = vsub.f32 %v10551_v62, %v10641_v59 }
0x2061   : > { %v10653_v60 = vmul.f32 1.442695, %v10647_v17 }
0x2063   : > { %14122 = vpow2.f32 %v10653_v60 }
0x206c   : > { %v14121_v42 = vpop.eup %14120 }
0x206d   : > { %v10657_v28 = vsel %vm16667_vm13, %v14121_v42, 0.0  ;;  %vm16678_vm13 = vmmov %vm16631_vm0 }
0x206e   : > { %10658 = vadd.xlane.f32.xlu0 %v10657_v28 }
0x2070   : > { %v14123_v58 = vpop.eup %14122 }
0x2071   : > { %v10663_v50 = vsel %vm16668_vm14, %v14123_v58, 0.0  ;;  %vm16679_vm14 = vmmov %vm16631_vm0 }
0x2072   : > { %10664 = vadd.xlane.f32.xlu0 %v10663_v50 }
0x2088   : > { %10979 = vrot.lane.b32.xlu0 %v15385_v45, %s16669_s17 }
0x208c   : > { %11135 = vrot.lane.b32.xlu0 %v15724_v14, %s16669_s17 }
0x2090   : > { %11133 = vrot.lane.b32.xlu0 %v14534_v21, %s16669_s17 }
0x20a7   : > { %v10638_v36 = vpop.xlane.xlu1 %10637 }
0x20a8   : > { %v10646_v61 = vsub.f32 %v10473_v23, %v10638_v36 }
0x20aa   : > { %v10651_v53 = vmul.f32 1.442695, %v10646_v61 }
0x20ab   : > { %v10644_v0 = vpop.xlane.xlu0 %10643 }
0x20ac   : > { %14124 = vpow2.f32 %v10651_v53  ;;  %v10648_v34 = vsub.f32 %v10629_v8, %v10644_v0 }
0x20ae   : > { %v10655_v15 = vmul.f32 1.442695, %v10648_v34 }
0x20b0   : > { %14126 = vpow2.f32 %v10655_v15 }
0x20b9   : > { %v14125_v4 = vpop.eup %14124 }
0x20ba   : > { %v10660_v30 = vsel %vm16631_vm0, %v14125_v4, 0.0 }
0x20bb   : > { %10661 = vadd.xlane.f32.xlu1 %v10660_v30 }
0x20bd   : > { %v14127_v29 = vpop.eup %14126 }
0x20be   : > { %v10666_v6 = vsel %vm16670_vm4, %v14127_v29, 0.0  ;;  %vm16680_vm4 = vmmov %vm16631_vm0 }
0x20cc   : > { %11057 = vrot.lane.b32.xlu1 %v15759_v44, %s16669_s17 }
0x20d0   : > { %10977 = vrot.lane.b32.xlu1 %v15393_v12, %s16669_s17 }
0x20d4   : > { %11055 = vrot.lane.b32.xlu1 %v15765_v2, %s16669_s17 }
0x20d8   : > { %11213 = vrot.lane.b32.xlu1 %v15831_v48, %s16669_s17 }
0x20f7   : > { %v10659_v63 = vpop.xlane.xlu0 %10658 }
0x20f8   : > { %14128 = vrcp.f32 %v10659_v63 }
0x20fb   : > { %v10665_v49 = vpop.xlane.xlu0 %10664 }
0x20fc   : > { %14130 = vrcp.f32 %v10665_v49  ;;  %10667 = vadd.xlane.f32.xlu1 %v10666_v6 }
0x20ff   : > { %v10980_v24 = vpop.permute.xlu0 %10979 }
0x2103   : > { %v16282_v55 = vpop.permute.xlu0 %11135 }
0x2105   : > { %v14129_v62 = vpop.eup %14128 }
0x2106   : > { %v10673_v57 = vmul.f32 %v14129_v62, %v14121_v42 }
0x2107   : > { %v11134_v8 = vpop.permute.xlu0 %11133 }
0x2108   : > { %13689 = vmatmul.mubr.msk.f32.vlgmr.msra.gmra.mxu0 %vm534_vm2, %v10673_v57 }
0x2109   : > { %v14131_v38 = vpop.eup %14130  ;;  %13697 = vmatpush3.msk.msra.mxu0 %vm876_vm3, %v16202_v20  ;;  %13698 = vmatprep.mubr.msk.f32.mxu0 %vm14302_vm1, %v16624_v18 }
0x210a   : > { %v10675_v9 = vmul.f32 %v14131_v38, %v14123_v58  ;;  %13706 = vmatprep.subr.mxu0 %v16624_v18 }
0x210c   : > { %13699 = vmatmul.mubr.msk.f32.vlgmr.msra.gmra.mxu0 %vm534_vm2, %v10675_v9 }
0x210d   : > { %13707 = vmatpush3.xpose.msk.msra.mxu0 %vm534_vm2, %v10980_v24  ;;  %11211 = vrot.lane.b32.xlu1 %v15837_v10, %s16669_s17 }
0x210e   : > { %13708 = vmatprep.mubr.msk.f32.mxu0 %vm14302_vm1, %v16624_v18  ;;  %13716 = vmatprep.subr.mxu0 %v16624_v18 }
0x2144   : > { %v10662_v20 = vpop.xlane.xlu1 %10661 }
0x2145   : > { %14132 = vrcp.f32 %v10662_v20 }
0x2148   : > { %v11058_v23 = vpop.permute.xlu1 %11057 }
0x214c   : > { %v10978_v37 = vpop.permute.xlu1 %10977 }
0x214d   : > { %13709 = vmatmul.mubr.msk.f32.vlgmr.msra.gmra.mxu0 %vm534_vm2, %v10978_v37 }
0x214e   : > { %13717 = vmatpush3.xpose.msk.msra.mxu0 %vm534_vm2, %v16282_v55  ;;  %13718 = vmatprep.mubr.msk.f32.mxu0 %vm14302_vm1, %v16624_v18 }
0x214f   : > { %13726 = vmatprep.subr.mxu0 %v16624_v18 }
0x2150   : > { %v11056_v46 = vpop.permute.xlu1 %11055 }
0x2151   : > { %13719 = vmatmul.mubr.msk.f32.vlgmr.msra.gmra.mxu0 %vm534_vm2, %v11134_v8 }
0x2152   : > { %v14133_v11 = vpop.eup %14132  ;;  %13727 = vmatpush3.msk.msra.mxu0 %vm876_vm3, %v10980_v24  ;;  %13728 = vmatprep.mubr.msk.f32.mxu0 %vm14302_vm1, %v16624_v18 }
0x2153   : > { %v10674_v26 = vmul.f32 %v14133_v11, %v14125_v4  ;;  %13736 = vmatprep.subr.mxu0 %v16624_v18 }
0x2154   : > { %v16301_v7 = vpop.permute.xlu1 %11213 }
0x2155   : > { %13694 = vmatmul.mubr.msk.f32.vlgmr.msra.gmra.mxu1 %vm534_vm2, %v10674_v26 }
0x2156   : > { %13702 = vmatpush3.msk.msra.mxu1 %vm876_vm3, %v16221_v43  ;;  %13703 = vmatprep.mubr.msk.f32.mxu1 %vm14302_vm1, %v16624_v18 }
0x2157   : > { %13711 = vmatprep.subr.mxu1 %v16624_v18 }
0x2185   : > { %v10668_v32 = vpop.xlane.xlu1 %10667 }
0x2186   : > { %14134 = vrcp.f32 %v10668_v32 }
0x2189   : > { %v11212_v43 = vpop.permute.xlu1 %11211 }
0x2193   : > { %v14135_v59 = vpop.eup %14134 }
0x2194   : > { %v10676_v17 = vmul.f32 %v14135_v59, %v14127_v29 }
0x2196   : > { %13704 = vmatmul.mubr.msk.f32.vlgmr.msra.gmra.mxu1 %vm534_vm2, %v10676_v17 }
0x2197   : > { %13712 = vmatpush3.xpose.msk.msra.mxu1 %vm534_vm2, %v11058_v23  ;;  %13713 = vmatprep.mubr.msk.f32.mxu1 %vm14302_vm1, %v16624_v18 }
0x2198   : > { %13721 = vmatprep.subr.mxu1 %v16624_v18 }
0x219a   : > { %13714 = vmatmul.mubr.msk.f32.vlgmr.msra.gmra.mxu1 %vm534_vm2, %v11056_v46 }
0x219b   : > { %13722 = vmatpush3.xpose.msk.msra.mxu1 %vm534_vm2, %v16301_v7  ;;  %13723 = vmatprep.mubr.msk.f32.mxu1 %vm14302_vm1, %v16624_v18 }
0x219c   : > { %13731 = vmatprep.subr.mxu1 %v16624_v18 }
0x219e   : > { %13724 = vmatmul.mubr.msk.f32.vlgmr.msra.gmra.mxu1 %vm534_vm2, %v11212_v43 }
0x219f   : > { %13732 = vmatpush3.msk.msra.mxu1 %vm876_vm3, %v11058_v23  ;;  %13733 = vmatprep.mubr.msk.f32.mxu1 %vm14302_vm1, %v16624_v18 }
0x21a0   : > { %13741 = vmatprep.subr.mxu1 %v16624_v18 }
0x21c8   : > { %v16319_v60 = vpop.f32.mrf.mxu0 }
0x21ca   : > { %v13690_v42 = vpop.f32.mrf.mxu0 }
0x21cc   : > { %v16321_v28 = vpop.f32.mrf.mxu0 }
0x21ce   : > { %v13700_v58 = vpop.f32.mrf.mxu0 }
0x220d   : > { %v11051_v50 = vpop.f32.mrf.mxu0 }
0x220e   : > { %v11289_v36 = vsel %vm16671_vm8, %v11051_v50, -inf  ;;  %vm16681_vm8 = vmmov %vm16631_vm0 }
0x220f   : > { %11290 = vmax.xlane.f32.xlu0 %v11289_v36  ;;  %v13710_v61 = vpop.f32.mrf.mxu0 }
0x2211   : > { %v11207_v53 = vpop.f32.mrf.mxu0 }
0x2212   : > { %v11295_v4 = vsel %vm16672_vm9, %v11207_v53, -inf  ;;  %vm16682_vm9 = vmmov %vm16631_vm0 }
0x2213   : > { %11296 = vmax.xlane.f32.xlu0 %v11295_v4  ;;  %v13720_v30 = vpop.f32.mrf.mxu0 }
0x2215   : > { %v16325_v0 = vpop.f32.mrf.mxu1 }
0x2217   : > { %v13695_v34 = vpop.f32.mrf.mxu1 }
0x2256   : > { %v16327_v15 = vpop.f32.mrf.mxu1 }
0x2258   : > { %v13705_v63 = vpop.f32.mrf.mxu1 }
0x225a   : > { %v11129_v29 = vpop.f32.mrf.mxu1 }
0x225b   : > { %v11292_v49 = vsel %vm16673_vm10, %v11129_v29, -inf  ;;  %vm16683_vm10 = vmmov %vm16631_vm0 }
0x225c   : > { %11293 = vmax.xlane.f32.xlu1 %v11292_v49  ;;  %v13715_v6 = vpop.f32.mrf.mxu1 }
0x225e   : > { %v11285_v62 = vpop.f32.mrf.mxu1 }
0x225f   : > { %v11298_v57 = vsel %vm16674_vm15, %v11285_v62, -inf  ;;  %vm16684_vm15 = vmmov %vm16631_vm0 }
0x2260   : > { %11299 = vmax.xlane.f32.xlu0 %v11298_v57  ;;  %v13725_v38 = vpop.f32.mrf.mxu1 }
0x2298   : > { %v11291_v9 = vpop.xlane.xlu0 %11290 }
0x2299   : > { %v11301_v24 = vsub.f32 %v11051_v50, %v11291_v9 }
0x229b   : > { %v11305_v20 = vmul.f32 1.442695, %v11301_v24 }
0x229c   : > { %v11297_v23 = vpop.xlane.xlu0 %11296 }
0x229d   : > { %14136 = vpow2.f32 %v11305_v20  ;;  %v11303_v37 = vsub.f32 %v11207_v53, %v11297_v23 }
0x229f   : > { %v11309_v8 = vmul.f32 1.442695, %v11303_v37 }
0x22a1   : > { %14138 = vpow2.f32 %v11309_v8 }
0x22aa   : > { %v14137_v11 = vpop.eup %14136 }
0x22ab   : > { %v11313_v26 = vsel %vm16675_vm11, %v14137_v11, 0.0  ;;  %vm16688_vm11 = vmmov %vm16631_vm0 }
0x22ac   : > { %11314 = vadd.xlane.f32.xlu0 %v11313_v26 }
0x22ae   : > { %v14139_v46 = vpop.eup %14138 }
0x22af   : > { %v11319_v32 = vsel %vm16676_vm12, %v14139_v46, 0.0  ;;  %vm16689_vm12 = vmmov %vm16631_vm0 }
0x22b0   : > { %11320 = vadd.xlane.f32.xlu0 %v11319_v32 }
0x22c6   : > { %11635 = vrot.lane.b32.xlu0 %v15385_v45, %s16677_s26 }
0x22ca   : > { %11791 = vrot.lane.b32.xlu0 %v15724_v14, %s16677_s26 }
0x22ce   : > { %11789 = vrot.lane.b32.xlu0 %v14534_v21, %s16677_s26 }
0x22e5   : > { %v11294_v59 = vpop.xlane.xlu1 %11293 }
0x22e6   : > { %v11302_v17 = vsub.f32 %v11129_v29, %v11294_v59 }
0x22e8   : > { %v11307_v43 = vmul.f32 1.442695, %v11302_v17 }
0x22e9   : > { %v11300_v21 = vpop.xlane.xlu0 %11299 }
0x22ea   : > { %14140 = vpow2.f32 %v11307_v43  ;;  %v11304_v45 = vsub.f32 %v11285_v62, %v11300_v21 }
0x22ec   : > { %v11311_v14 = vmul.f32 1.442695, %v11304_v45 }
0x22ee   : > { %14142 = vpow2.f32 %v11311_v14 }
0x22f7   : > { %v14141_v42 = vpop.eup %14140 }
0x22f8   : > { %v11316_v58 = vsel %vm16678_vm13, %v14141_v42, 0.0 }
0x22f9   : > { %11317 = vadd.xlane.f32.xlu1 %v11316_v58 }
0x22fb   : > { %v14143_v36 = vpop.eup %14142 }
0x22fc   : > { %v11322_v53 = vsel %vm16679_vm14, %v14143_v36, 0.0 }
0x230a   : > { %11713 = vrot.lane.b32.xlu1 %v15759_v44, %s16677_s26 }
0x230e   : > { %11633 = vrot.lane.b32.xlu1 %v15393_v12, %s16677_s26 }
0x2312   : > { %11711 = vrot.lane.b32.xlu1 %v15765_v2, %s16677_s26 }
0x2316   : > { %11869 = vrot.lane.b32.xlu1 %v15831_v48, %s16677_s26 }
0x2335   : > { %v11315_v50 = vpop.xlane.xlu0 %11314 }
0x2336   : > { %14144 = vrcp.f32 %v11315_v50 }
0x2339   : > { %v11321_v61 = vpop.xlane.xlu0 %11320 }
0x233a   : > { %14146 = vrcp.f32 %v11321_v61  ;;  %11323 = vadd.xlane.f32.xlu1 %v11322_v53 }
0x233d   : > { %v11636_v4 = vpop.permute.xlu0 %11635 }
0x2341   : > { %v16362_v34 = vpop.permute.xlu0 %11791 }
0x2343   : > { %v14145_v44 = vpop.eup %14144 }
0x2344   : > { %v11329_v12 = vmul.f32 %v14145_v44, %v14137_v11 }
0x2346   : > { %13729 = vmatmul.mubr.msk.f32.vlgmr.msra.gmra.mxu0 %vm534_vm2, %v11329_v12 }
0x2347   : > { %v14147_v2 = vpop.eup %14146  ;;  %13737 = vmatpush3.msk.msra.mxu0 %vm876_vm3, %v16282_v55  ;;  %13738 = vmatprep.mubr.msk.f32.mxu0 %vm14302_vm1, %v16624_v18 }
0x2348   : > { %v11331_v48 = vmul.f32 %v14147_v2, %v14139_v46  ;;  %13746 = vmatprep.subr.mxu0 %v16624_v18 }
0x234a   : > { %13739 = vmatmul.mubr.msk.f32.vlgmr.msra.gmra.mxu0 %vm534_vm2, %v11331_v48 }
0x234b   : > { %13747 = vmatpush3.xpose.msk.msra.mxu0 %vm534_vm2, %v11636_v4  ;;  %11867 = vrot.lane.b32.xlu1 %v15837_v10, %s16677_s26  ;;  %v11790_v10 = vpop.permute.xlu0 %11789 }
0x234c   : > { %13748 = vmatprep.mubr.msk.f32.mxu0 %vm14302_vm1, %v16624_v18  ;;  %13756 = vmatprep.subr.mxu0 %v16624_v18 }
0x2382   : > { %v11318_v55 = vpop.xlane.xlu1 %11317 }
0x2383   : > { %14148 = vrcp.f32 %v11318_v55 }
0x2386   : > { %v11714_v30 = vpop.permute.xlu1 %11713 }
0x238a   : > { %v11634_v63 = vpop.permute.xlu1 %11633 }
0x238b   : > { %13749 = vmatmul.mubr.msk.f32.vlgmr.msra.gmra.mxu0 %vm534_vm2, %v11634_v63 }
0x238c   : > { %13757 = vmatpush3.xpose.msk.msra.mxu0 %vm534_vm2, %v16362_v34  ;;  %13758 = vmatprep.mubr.msk.f32.mxu0 %vm14302_vm1, %v16624_v18 }
0x238d   : > { %13766 = vmatprep.subr.mxu0 %v16624_v18 }
0x238e   : > { %v11712_v6 = vpop.permute.xlu1 %11711 }
0x238f   : > { %13759 = vmatmul.mubr.msk.f32.vlgmr.msra.gmra.mxu0 %vm534_vm2, %v11790_v10 }
0x2390   : > { %v14149_v29 = vpop.eup %14148  ;;  %13767 = vmatpush3.msk.msra.mxu0 %vm876_vm3, %v11636_v4  ;;  %13768 = vmatprep.mubr.msk.f32.mxu0 %vm14302_vm1, %v16624_v18 }
0x2391   : > { %v11330_v49 = vmul.f32 %v14149_v29, %v14141_v42  ;;  %13776 = vmatprep.subr.mxu0 %v16624_v18 }
0x2392   : > { %v16381_v62 = vpop.permute.xlu1 %11869 }
0x2393   : > { %13734 = vmatmul.mubr.msk.f32.vlgmr.msra.gmra.mxu1 %vm534_vm2, %v11330_v49 }
0x2394   : > { %13742 = vmatpush3.msk.msra.mxu1 %vm876_vm3, %v16301_v7  ;;  %13743 = vmatprep.mubr.msk.f32.mxu1 %vm14302_vm1, %v16624_v18 }
0x2395   : > { %13751 = vmatprep.subr.mxu1 %v16624_v18 }
0x23c3   : > { %v11324_v57 = vpop.xlane.xlu1 %11323 }
0x23c4   : > { %14150 = vrcp.f32 %v11324_v57 }
0x23c7   : > { %v11868_v7 = vpop.permute.xlu1 %11867 }
0x23d1   : > { %v14151_v38 = vpop.eup %14150 }
0x23d2   : > { %v11332_v9 = vmul.f32 %v14151_v38, %v14143_v36 }
0x23d4   : > { %13744 = vmatmul.mubr.msk.f32.vlgmr.msra.gmra.mxu1 %vm534_vm2, %v11332_v9 }
0x23d5   : > { %13752 = vmatpush3.xpose.msk.msra.mxu1 %vm534_vm2, %v11714_v30  ;;  %13753 = vmatprep.mubr.msk.f32.mxu1 %vm14302_vm1, %v16624_v18 }
0x23d6   : > { %13761 = vmatprep.subr.mxu1 %v16624_v18 }
0x23d8   : > { %13754 = vmatmul.mubr.msk.f32.vlgmr.msra.gmra.mxu1 %vm534_vm2, %v11712_v6 }
0x23d9   : > { %13762 = vmatpush3.xpose.msk.msra.mxu1 %vm534_vm2, %v16381_v62  ;;  %13763 = vmatprep.mubr.msk.f32.mxu1 %vm14302_vm1, %v16624_v18 }
0x23da   : > { %13771 = vmatprep.subr.mxu1 %v16624_v18 }
0x23dc   : > { %13764 = vmatmul.mubr.msk.f32.vlgmr.msra.gmra.mxu1 %vm534_vm2, %v11868_v7 }
0x23dd   : > { %13772 = vmatpush3.msk.msra.mxu1 %vm876_vm3, %v11714_v30  ;;  %13773 = vmatprep.mubr.msk.f32.mxu1 %vm14302_vm1, %v16624_v18 }
0x23de   : > { %13781 = vmatprep.subr.mxu1 %v16624_v18 }
0x2406   : > { %v11404_v24 = vpop.f32.mrf.mxu0 }
0x2408   : > { %v13730_v20 = vpop.f32.mrf.mxu0 }
0x240a   : > { %v11554_v23 = vpop.f32.mrf.mxu0 }
0x240c   : > { %v13740_v37 = vpop.f32.mrf.mxu0 }
0x244b   : > { %v11707_v8 = vpop.f32.mrf.mxu0 }
0x244c   : > { %v11945_v11 = vsel %vm16631_vm0, %v11707_v8, -inf  ;;  %vm16694_vm0 = vcmask 228352  }
0x244d   : > { %11946 = vmax.xlane.f32.xlu0 %v11945_v11  ;;  %v13750_v26 = vpop.f32.mrf.mxu0 }
0x244f   : > { %v11863_v46 = vpop.f32.mrf.mxu0 }
0x2450   : > { %v11951_v32 = vsel %vm16680_vm4, %v11863_v46, -inf }
0x2451   : > { %11952 = vmax.xlane.f32.xlu0 %v11951_v32  ;;  %v13760_v59 = vpop.f32.mrf.mxu0 }
0x2453   : > { %v16401_v17 = vpop.f32.mrf.mxu1 }
0x2455   : > { %v13735_v43 = vpop.f32.mrf.mxu1 }
0x2494   : > { %v16403_v42 = vpop.f32.mrf.mxu1 }
0x2496   : > { %v13745_v58 = vpop.f32.mrf.mxu1 }
0x2498   : > { %v11785_v21 = vpop.f32.mrf.mxu1 }
0x2499   : > { %v11948_v45 = vsel %vm16681_vm8, %v11785_v21, -inf }
0x249a   : > { %11949 = vmax.xlane.f32.xlu1 %v11948_v45  ;;  %v13755_v14 = vpop.f32.mrf.mxu1 }
0x249c   : > { %v11941_v50 = vpop.f32.mrf.mxu1 }
0x249d   : > { %v11954_v36 = vsel %vm16682_vm9, %v11941_v50, -inf  ;;  %vm16697_vm9 = vmmov %vm16694_vm0 }
0x249e   : > { %11955 = vmax.xlane.f32.xlu0 %v11954_v36  ;;  %v13765_v61 = vpop.f32.mrf.mxu1 }
0x24d6   : > { %v11947_v53 = vpop.xlane.xlu0 %11946 }
0x24d7   : > { %v11957_v44 = vsub.f32 %v11707_v8, %v11947_v53 }
0x24d9   : > { %v11961_v12 = vmul.f32 1.442695, %v11957_v44 }
0x24da   : > { %v11953_v2 = vpop.xlane.xlu0 %11952 }
0x24db   : > { %14152 = vpow2.f32 %v11961_v12  ;;  %v11959_v48 = vsub.f32 %v11863_v46, %v11953_v2 }
0x24dd   : > { %v11965_v4 = vmul.f32 1.442695, %v11959_v48 }
0x24df   : > { %14154 = vpow2.f32 %v11965_v4 }
0x24e8   : > { %v14153_v55 = vpop.eup %14152 }
0x24e9   : > { %v11969_v30 = vsel %vm16683_vm10, %v14153_v55, 0.0 }
0x24ea   : > { %11970 = vadd.xlane.f32.xlu0 %v11969_v30 }
0x24ec   : > { %v14155_v63 = vpop.eup %14154 }
0x24ed   : > { %v11975_v10 = vsel %vm16684_vm15, %v14155_v63, 0.0 }
0x24ee   : > { %11976 = vadd.xlane.f32.xlu0 %v11975_v10 }
0x2504   : > { %12293 = vrot.lane.b32.xlu0 %v15999_v1, %s14318_s10 }
0x2508   : > { %12309 = vrot.lane.b32.xlu0 %v16079_v39, %s14319_s13 }
0x250c   : > { %12313 = vrot.lane.b32.xlu0 %v16081_v19, %s14319_s13 }
0x2510   : > { %12325 = vrot.lane.b32.xlu0 %v16159_v27, %s14320_s24 }
0x2514   : > { %12329 = vrot.lane.b32.xlu0 %v16161_v35, %s14320_s24 }
0x2518   : > { %12341 = vrot.lane.b32.xlu0 %v16239_v54, %s16685_s19 }
0x251c   : > { %12345 = vrot.lane.b32.xlu0 %v16241_v3, %s16685_s19 }
0x2520   : > { %12357 = vrot.lane.b32.xlu0 %v16319_v60, %s16686_s21 }
0x2523   : > { %v11950_v1 = vpop.xlane.xlu1 %11949 }
0x2524   : > { %v11958_v39 = vsub.f32 %v11785_v21, %v11950_v1  ;;  %12361 = vrot.lane.b32.xlu0 %v16321_v28, %s16686_s21 }
0x2526   : > { %v11963_v19 = vmul.f32 1.442695, %v11958_v39 }
0x2527   : > { %v11956_v29 = vpop.xlane.xlu0 %11955 }
0x2528   : > { %14156 = vpow2.f32 %v11963_v19  ;;  %v11960_v27 = vsub.f32 %v11941_v50, %v11956_v29  ;;  %12373 = vrot.lane.b32.xlu0 %v11404_v24, %s16687_s23 }
0x252a   : > { %v11967_v35 = vmul.f32 1.442695, %v11960_v27 }
0x252c   : > { %14158 = vpow2.f32 %v11967_v35  ;;  %12377 = vrot.lane.b32.xlu0 %v11554_v23, %s16687_s23 }
0x2535   : > { %v14157_v54 = vpop.eup %14156 }
0x2536   : > { %v11972_v3 = vsel %vm16688_vm11, %v14157_v54, 0.0 }
0x2537   : > { %11973 = vadd.xlane.f32.xlu1 %v11972_v3 }
0x2539   : > { %v14159_v60 = vpop.eup %14158 }
0x253a   : > { %v11978_v49 = vsel %vm16689_vm12, %v14159_v60, 0.0 }
0x253b   : > { %11979 = vadd.xlane.f32.xlu1 %v11978_v49 }
0x254c   : > { %12295 = vrot.lane.b32.xlu1 %v16005_v56, %s14318_s10 }
0x2550   : > { %12297 = vrot.lane.b32.xlu1 %v16001_v47, %s14318_s10 }
0x2554   : > { %12299 = vrot.lane.b32.xlu1 %v16007_v41, %s14318_s10 }
0x2558   : > { %12311 = vrot.lane.b32.xlu1 %v16085_v52, %s14319_s13 }
0x255c   : > { %12315 = vrot.lane.b32.xlu1 %v16087_v25, %s14319_s13 }
0x2560   : > { %12327 = vrot.lane.b32.xlu1 %v16165_v31, %s14320_s24 }
0x2564   : > { %12331 = vrot.lane.b32.xlu1 %v16167_v40, %s14320_s24  ;;  %s327_s24 = sand.u32 1, %s14287_s28  }
0x2565   : > { %s12553_s10 = sshll.u32 %s327_s24, 4 }
0x2566   : > { %s329_s25 = scalar_lea.vmem [#allocation7], %s12553_s10 }
0x2567   : > { %s12461_s12 = sshll.u32 %s329_s25, 4  ;;  %s16517_s12 = int_to_ptr.vmem [resolvable:$true] %s12461_s12 }
0x2568   : > { %12343 = vrot.lane.b32.xlu1 %v16245_v5, %s16685_s19  ;;  %s14227_s26 = scalar_lea.vmem %s16517_s12, 256 }
0x2569   : > { %p14228_p10 = scmp.ne.s32.totalorder %s16517_s12, %s14227_s26 }
0x256b   : > { %p14229_p12 = pnand %p14228_p10, %p14416_p5 }
0x256c   : > { %12347 = vrot.lane.b32.xlu1 %v16247_v16, %s16685_s19  ;;  %s14331_s19 = smov [#allocation7]  }
0x256d   : > { %p14230_p8 = pneg %p14229_p12 }
0x2570   : > { %12359 = vrot.lane.b32.xlu1 %v16325_v0, %s16686_s21 }
0x2573   : > { %v11971_v47 = vpop.xlane.xlu0 %11970 }
0x2574   : > { %14160 = vrcp.f32 %v11971_v47  ;;  %12363 = vrot.lane.b32.xlu1 %v16327_v15, %s16686_s21  ;;  %s14231_s21 = sshll.u32 %s14331_s19, 4  ;;  %s14232_s21 = int_to_ptr.vmem [resolvable:$false] %s14231_s21 }
0x2575   : > { %p14234_p11 = scmp.lt.s32.totalorder %s16517_s12, %s14232_s21 }
0x2577   : > { %v11977_v56 = vpop.xlane.xlu0 %11976 }
0x2578   : > { %14162 = vrcp.f32 %v11977_v56  ;;  %12375 = vrot.lane.b32.xlu1 %v16401_v17, %s16687_s23 }
0x257b   : > { %v12294_v20 = vpop.permute.xlu0 %12293 }
0x257c   : > { %12379 = vrot.lane.b32.xlu1 %v16403_v42, %s16687_s23  ;;  %s14233_s23 = scalar_lea.vmem %s14232_s21, 512 }
0x257d   : > { %p14235_p0 = scmp.lt.s32.totalorder %s14233_s23, %s14227_s26 }
0x257f   : > { %v12310_v37 = vpop.permute.xlu0 %12309  ;;  %p14236_p1 = por %p14235_p0, %p14234_p11 }
0x2581   : > { %v14161_v41 = vpop.eup %14160  ;;  %p14237_p3 = pnand %p14236_p1, %p14230_p8 }
0x2582   : > { %v11985_v52 = vmul.f32 %v14161_v41, %v14153_v55  ;;  %v12401_v55 = vsel %vm534_vm2, %v15919_v33, %v12294_v20 }
0x2583   : > { %v12314_v11 = vpop.permute.xlu0 %12313  ;;  %v12405_v30 = vsel %vm5853_vm5, %v12401_v55, %v12310_v37 }
0x2584   : > { %13769 = vmatmul.mubr.msk.f32.vlgmr.msra.gmra.mxu0 %vm534_vm2, %v11985_v52 }
0x2585   : > { %v14163_v25 = vpop.eup %14162  ;;  %13777 = vmatpush3.msk.msra.mxu0 %vm876_vm3, %v16362_v34  ;;  %13778 = vmatprep.mubr.msk.f32.mxu0 %vm14302_vm1, %v16624_v18 }
0x2586   : > { %v11987_v31 = vmul.f32 %v14163_v25, %v14155_v63 }
0x2587   : > { %v12326_v46 = vpop.permute.xlu0 %12325 }
0x2588   : > { %13779 = vmatmul.mubr.msk.f32.vlgmr.msra.gmra.mxu0 %vm534_vm2, %v11987_v31  ;;  %v12409_v10 = vsel %vm5858_vm6, %v12405_v30, %v12326_v46 }
0x258b   : > { %v12330_v59 = vpop.permute.xlu0 %12329 }
0x258f   : > { %v12342_v43 = vpop.permute.xlu0 %12341 }
0x2590   : > { %v12413_v39 = vsel %vm5863_vm7, %v12409_v10, %v12342_v43 }
0x2593   : > { %v12346_v58 = vpop.permute.xlu0 %12345 }
0x2597   : > { %v12358_v45 = vpop.permute.xlu0 %12357 }
0x259b   : > { %v12362_v50 = vpop.permute.xlu0 %12361 }
0x259f   : > { %v12374_v61 = vpop.permute.xlu0 %12373 }
0x25a3   : > { %v12378_v2 = vpop.permute.xlu0 %12377 }
0x25c0   : > { %v11974_v40 = vpop.xlane.xlu1 %11973 }
0x25c1   : > { %14164 = vrcp.f32 %v11974_v40 }
0x25c4   : > { %v11980_v5 = vpop.xlane.xlu1 %11979 }
0x25c5   : > { %14166 = vrcp.f32 %v11980_v5 }
0x25ce   : > { %v14165_v16 = vpop.eup %14164 }
0x25cf   : > { %v11986_v28 = vmul.f32 %v14165_v16, %v14157_v54 }
0x25d1   : > { %13774 = vmatmul.mubr.msk.f32.vlgmr.msra.gmra.mxu1 %vm534_vm2, %v11986_v28 }
0x25d2   : > { %v14167_v0 = vpop.eup %14166  ;;  %13782 = vmatpush3.msk.msra.mxu1 %vm876_vm3, %v16381_v62  ;;  %13783 = vmatprep.mubr.msk.f32.mxu1 %vm14302_vm1, %v16624_v18  ;;  %v12296_v18 = vpop.permute.xlu1 %12295  ;;  %vm16690_vm1 = vcmask 162816   ;;  %vm16691_vm3 = vcmask 195584  }
0x25d3   : > { %v11988_v15 = vmul.f32 %v14167_v0, %v14159_v60  ;;  %v12402_v1 = vsel %vm534_vm2, %v15925_v13, %v12296_v18  ;;  %v12417_v27 = vsel %vm16690_vm1, %v12413_v39, %v12358_v45  ;;  %vm16692_vm13 = vmmov %vm16690_vm1  ;;  %v14173_v13 = vld [vmem:[%s14471_s22] sm:$0xff] }
0x25d4   : > { %v12421_v35 = vsel %vm16691_vm3, %v12417_v27, %v12374_v61  ;;  %v12429_v60 = vcombine.high %v14173_v13, %v14173_v13  ;;  %vm16693_vm14 = vmmov %vm16690_vm1 }
0x25d5   : > { %13784 = vmatmul.mubr.msk.f32.vlgmr.msra.gmra.mxu1 %vm534_vm2, %v11988_v15  ;;  %vm16695_vm4 = vmmov %vm16691_vm3  ;;  %v14174_v15 = vld [vmem:[%s14471_s22 + $0x8] sm:$0xff] }
0x25d6   : > { %v12298_v23 = vpop.permute.xlu1 %12297  ;;  %vm16696_vm8 = vmmov %vm16691_vm3 }
0x25d7   : > { %v12403_v44 = vsel %vm534_vm2, %v15921_v51, %v12298_v23  ;;  %vm16700_vm10 = vmmov %vm16691_vm3 }
0x25d8   : > { %v12407_v12 = vsel %vm5853_vm5, %v12403_v44, %v12314_v11 }
0x25d9   : > { %v12411_v4 = vsel %vm5858_vm6, %v12407_v12, %v12330_v59 }
0x25da   : > { %v12300_v8 = vpop.permute.xlu1 %12299  ;;  %v12415_v51 = vsel %vm5863_vm7, %v12411_v4, %v12346_v58 }
0x25db   : > { %v12419_v3 = vsel %vm16692_vm13, %v12415_v51, %v12362_v50  ;;  %v12404_v49 = vsel %vm534_vm2, %v15927_v22, %v12300_v8  ;;  %vm16698_vm2 = vmmov %vm16690_vm1 }
0x25dc   : > { %v12423_v5 = vsel %vm16696_vm8, %v12419_v3, %v12378_v2 }
0x25de   : > { %v12312_v26 = vpop.permute.xlu1 %12311 }
0x25df   : > { %v12406_v19 = vsel %vm5853_vm5, %v12402_v1, %v12312_v26 }
0x25e2   : > { %v12316_v32 = vpop.permute.xlu1 %12315 }
0x25e3   : > { %v12408_v41 = vsel %vm5853_vm5, %v12404_v49, %v12316_v32  ;;  %vm16699_vm5 = vmmov %vm16694_vm0 }
0x25e6   : > { %v12328_v17 = vpop.permute.xlu1 %12327 }
0x25e7   : > { %v12410_v33 = vsel %vm5858_vm6, %v12406_v19, %v12328_v17 }
0x25ea   : > { %v12332_v42 = vpop.permute.xlu1 %12331 }
0x25eb   : > { %v12412_v40 = vsel %vm5858_vm6, %v12408_v41, %v12332_v42  ;;  %vm16701_vm6 = vmmov %vm16694_vm0 }
0x25ee   : > { %v12344_v21 = vpop.permute.xlu1 %12343 }
0x25ef   : > { %v12414_v54 = vsel %vm5863_vm7, %v12410_v33, %v12344_v21 }
0x25f2   : > { %v12348_v14 = vpop.permute.xlu1 %12347 }
0x25f3   : > { %v12416_v22 = vsel %vm5863_vm7, %v12412_v40, %v12348_v14  ;;  %vm16702_vm7 = vcmask 261120  }
0x25f4   : > { %vm16703_vm15 = vmmov %vm16702_vm7 }
0x25f6   : > { %v12360_v36 = vpop.permute.xlu1 %12359 }
0x25f7   : > { %v12418_v47 = vsel %vm16693_vm14, %v12414_v54, %v12360_v36 }
0x25fa   : > { %v12364_v53 = vpop.permute.xlu1 %12363 }
0x25fe   : > { %v12376_v48 = vpop.permute.xlu1 %12375 }
0x25ff   : > { %v12422_v52 = vsel %vm16695_vm4, %v12418_v47, %v12376_v48 }
0x2602   : > { %v12380_v29 = vpop.permute.xlu1 %12379 }
0x2644   : > { %v12060_v34 = vpop.f32.mrf.mxu0 }
0x2645   : > { %12389 = vrot.lane.b32.xlu0 %v12060_v34, %s14324_s20  ;;  %v12430_v34 = vcombine.high %v14174_v15, %v14174_v15 }
0x2646   : > { %v13770_v6 = vpop.f32.mrf.mxu0 }
0x2647   : > { %v12420_v6 = vsel %vm16698_vm2, %v12416_v22, %v12364_v53 }
0x2648   : > { %v12210_v57 = vpop.f32.mrf.mxu0 }
0x2649   : > { %12393 = vrot.lane.b32.xlu0 %v12210_v57, %s14324_s20 }
0x264a   : > { %v13780_v38 = vpop.f32.mrf.mxu0 }
0x264b   : > { %v12424_v38 = vsel %vm16700_vm10, %v12420_v6, %v12380_v29 }
0x2691   : > { %v12135_v9 = vpop.f32.mrf.mxu1 }
0x2692   : > { %12391 = vrot.lane.b32.xlu1 %v12135_v9, %s14324_s20 }
0x2693   : > { %v13775_v7 = vpop.f32.mrf.mxu1 }
0x2695   : > { %v12285_v24 = vpop.f32.mrf.mxu1 }
0x2696   : > { %12395 = vrot.lane.b32.xlu1 %v12285_v24, %s14324_s20  ;;  %s12855_s20 = sshll.u32 %s14399_s9, 8  ;;  %s16522_s9 = scalar_lea.sflag [#allocation4], %s327_s24 }
0x2697   : > { %v13785_v62 = vpop.f32.mrf.mxu1  ;;  %s16515_s17 = scalar_lea.hbm %s16571_s8, %s12855_s20 }
0x26b7   : > { %v12390_v63 = vpop.permute.xlu0 %12389 }
0x26b8   : > { %v12425_v56 = vsel %vm16694_vm0, %v12421_v35, %v12390_v63 }
0x26b9   : > { %v12433_v28 = vadd.f32 %v14173_v13, %v12425_v56 }
0x26bb   : > { %v12394_v25 = vpop.permute.xlu0 %12393 }
0x26bc   : > { %v12427_v57 = vsel %vm16699_vm5, %v12423_v5, %v12394_v25 }
0x26bd   : > { %v12435_v62 = vadd.f32 %v14174_v15, %v12427_v57 }
0x2704   : > { %v12392_v31 = vpop.permute.xlu1 %12391 }
0x2705   : > { %v12426_v16 = vsel %vm16697_vm9, %v12422_v52, %v12392_v31 }
0x2706   : > { %v12434_v0 = vadd.f32 %v12429_v60, %v12426_v16 }
0x2708   : > { %v12441_v9 = vcombine.low %v12433_v28, %v12434_v0  ;;  %v12396_v7 = vpop.permute.xlu1 %12395 }
0x2709   : > { %v12428_v24 = vsel %vm16701_vm6, %v12424_v38, %v12396_v7 }
0x270a   : > { %12445 = vst.msk [vmem:[%s329_s25] sm:$0xff] %vm16702_vm7, %v12441_v9  ;;  %v12436_v18 = vadd.f32 %v12430_v34, %v12428_v24 }
0x270c   : > { %v12442_v20 = vcombine.low %v12435_v62, %v12436_v18 }
0x270e   : > { %12446 = vst.msk [vmem:[%s329_s25 + $0x8] sm:$0xff] %vm16703_vm15, %v12442_v20 }
0x270f   : > { %14240 = shalt.err (!%p14237_p3)
}
0x2710   : > { %s14241_s24 = scalar_lea.hbm %s16515_s17, 256  ;;  %s14245_s25 = scalar_lea.hbm %s16571_s8, 512 }
0x2711   : > { %p14242_p2 = scmp.ne.s32.totalorder %s16515_s17, %s14241_s24  ;;  %p14246_p7 = scmp.lt.s32.totalorder %s16515_s17, %s16571_s8 }
0x2712   : > { %p14247_p6 = scmp.lt.s32.totalorder %s14245_s25, %s14241_s24 }
0x2713   : > { %p14243_p4 = pnand %p14242_p2, %p14416_p5 }
0x2714   : > { %p14248_p9 = por %p14247_p6, %p14246_p7 }
0x2715   : > { %p14244_p13 = pneg %p14243_p4 }
0x2717   : > { %p14249_p10 = pnand %p14248_p9, %p14244_p13 }
0x2719   : > { %14252 = shalt.err (!%p14249_p10)
}
0x271a   : > { %s14332_s26 = smov 128  }
0x271b   : > { %13810 = dma.vmem_to_hbm [thread:$0]  (%p14416_p5), %s16517_s12, 256, %s16515_s17, %s16522_s9, %s14332_s26, %s14332_s26, %s14319_s13  }
0x271c PF: > { %p13827_p12 = scmp.ge.s32.totalorder %s14295_s30, 2  ;;  %s12476_s19 = sand.u32 1, %s14283_s27  }
0x271d   : > { %p16704_p8 = scmp.ne.s32.totalorder %s16607_s16, 0  ;;  %s12477_s21 = scalar_lea.sflag [#allocation4], %s12476_s19 }
0x271f   : > { %p13820_p11 = pnand %p13827_p12, %p16704_p8 }
0x2721   : > { %p13821_p0 = pneg %p13820_p11 }
0x2723   : > { %14278 = dma.done.wait (%p13821_p0), %s12477_s21, 256  }
0x2724   : > { %14280 = vsyncadd (%p13821_p0), %s12477_s21, 4294967040  ;;  %p20_p1 = scmp.ge.s32.totalorder %s14403_s11, 4   ;;  %s16705_s27 = smov %s14287_s28 }
0x2725   : > { %s16706_s28 = smov %s14291_s29  ;;  %s16707_s29 = smov %s14414_s14 }
0x2726   : > { %s16708_s30 = smov %s14403_s11  ;;  %22 = sbr.rel (!%p20_p1) target bundleno = 5 (0x5), region = 96 }
0x272b   :  { %12482 = vsyncpa [#allocation3], 1 }
0x272c   :  { %12484 = vsyncpa [#allocation3 + $0x1], 1 }
0x272d   :  { %12485 = vsyncpa [#allocation6], 1 }
0x272e   :  { %12486 = vsyncpa [#allocation4], 1 }
0x272f   :  { %12488 = vsyncpa [#allocation4 + $0x1], 1 }

</bundles_post_ra>
